<compile_context>
chip_gen: v7x
topology: tpu7x:2x2x1
jax: 0.10.0
libtpu: 0.0.40
codegen_flags: <defaults>
</compile_context>

<pallas_src>
import functools
import math

import jax
import jax.numpy as jnp
from jax.experimental import pallas as pl
from jax.experimental.pallas import tpu as pltpu


# ----------------------------------------------------------------------------
# In-kernel helpers (traced inside Pallas kernels)
# ----------------------------------------------------------------------------
def _layer_norm(x, alpha, bias, eps):
    """Row-wise LayerNorm, unbiased std (ddof=1), matching torch.std default.

    Exact divide (no approx reciprocal) to track the PyTorch reference closely.
    """
    d = x.shape[-1]
    mean = jnp.mean(x, axis=-1, keepdims=True)
    diff = x - mean
    var = jnp.sum(diff * diff, axis=-1, keepdims=True) * (1.0 / float(d - 1))
    std = jnp.sqrt(var)
    return diff / (std + eps) * alpha + bias


def _mha(q, k, v, add_mask, wo, bo, n_heads, scale, mxu_dtype):
    """Head-batched masked attention + single output projection.

    q: (Sq, D) fp32, k/v: (Sk, D) fp32, add_mask: (Sq, Sk) additive fp32,
    wo: (D, D) bf16, bo: (1, D) fp32.
    """
    sq, d = q.shape
    sk = k.shape[0]
    dk = d // n_heads
    # (S, D) -> (H, S, dk); MXU operands in bf16, fp32 accumulation.
    qh = jnp.swapaxes(q.reshape(sq, n_heads, dk), 0, 1).astype(mxu_dtype)
    kh = jnp.swapaxes(k.reshape(sk, n_heads, dk), 0, 1).astype(mxu_dtype)
    vh = jnp.swapaxes(v.reshape(sk, n_heads, dk), 0, 1).astype(mxu_dtype)

    s = jnp.einsum("hqd,hkd->hqk", qh, kh,
                   preferred_element_type=jnp.float32)          # (H, Sq, Sk)
    s = s * scale + add_mask[None, :, :]
    s = s - jnp.max(s, axis=-1, keepdims=True)
    p = jnp.exp(s)
    p = p * pl.reciprocal(jnp.sum(p, axis=-1, keepdims=True), approx=True)

    o = jnp.einsum("hqk,hkd->hqd", p.astype(mxu_dtype), vh,
                   preferred_element_type=jnp.float32)          # (H, Sq, dk)
    o = jnp.swapaxes(o, 0, 1).reshape(sq, d)                    # concat heads
    # One K=D output projection (instead of H small K=dk matmuls).
    return jnp.dot(o.astype(mxu_dtype), wo,
                   preferred_element_type=jnp.float32) + bo


# ----------------------------------------------------------------------------
# Fused decoder-layer kernel (one grid step = one batch element)
# ----------------------------------------------------------------------------
def _decoder_layer_kernel(
    x_ref, enc_ref, tmask_ref, smask_ref,
    ln1a_ref, ln1b_ref, wqkv_ref, bqkv_ref, wos_ref, bos_ref,
    ln2a_ref, ln2b_ref, wqc_ref, bqc_ref, wkvc_ref, bkvc_ref, woc_ref, boc_ref,
    ln3a_ref, ln3b_ref, w1_ref, b1_ref, w2_ref, b2_ref,
    fna_ref, fnb_ref,
    o_ref, *, n_heads, eps, apply_final_norm):
    f32 = jnp.float32
    cdt = wqkv_ref.dtype                      # bf16 MXU compute dtype
    x = x_ref[...].astype(f32)                # (S, D)
    enc = enc_ref[...].astype(cdt)            # (Skv, D) -- matmul operand only
    # Additive masks built in-kernel from the raw 0/1 masks (VPU compare+select).
    neg = jnp.float32(-1e9)
    zero = jnp.float32(0.0)
    tmask = jnp.where(tmask_ref[...] != 0, zero, neg)   # (S, S)
    smask = jnp.where(smask_ref[...] != 0, zero, neg)   # (S, Skv)
    d = x.shape[-1]
    scale = 1.0 / math.sqrt(d // n_heads)

    # --- residual 1: masked self-attention (pre-norm) ---
    h = _layer_norm(x, ln1a_ref[...], ln1b_ref[...], eps)
    qkv = jnp.dot(h.astype(cdt), wqkv_ref[...],
                  preferred_element_type=f32) + bqkv_ref[...]
    q, k, v = qkv[:, :d], qkv[:, d:2 * d], qkv[:, 2 * d:]
    x = x + _mha(q, k, v, tmask, wos_ref[...], bos_ref[...], n_heads, scale, cdt)

    # --- residual 2: cross-attention over encoder output ---
    h = _layer_norm(x, ln2a_ref[...], ln2b_ref[...], eps)
    qc = jnp.dot(h.astype(cdt), wqc_ref[...],
                 preferred_element_type=f32) + bqc_ref[...]
    kv = jnp.dot(enc, wkvc_ref[...],
                 preferred_element_type=f32) + bkvc_ref[...]
    kc, vc = kv[:, :d], kv[:, d:]
    x = x + _mha(qc, kc, vc, smask, woc_ref[...], boc_ref[...], n_heads, scale, cdt)

    # --- residual 3: position-wise feed-forward ---
    h = _layer_norm(x, ln3a_ref[...], ln3b_ref[...], eps)
    f = jnp.dot(h.astype(cdt), w1_ref[...],
                preferred_element_type=f32) + b1_ref[...]
    f = jnp.maximum(f, 0.0)
    x = x + jnp.dot(f.astype(cdt), w2_ref[...],
                    preferred_element_type=f32) + b2_ref[...]

    # --- fused final LayerNormalization (last layer only; static flag) ---
    if apply_final_norm:
        x = _layer_norm(x, fna_ref[...], fnb_ref[...], eps)

    o_ref[...] = x.astype(o_ref.dtype)


def _layer_cost_estimate(B, S, Skv, D, d_ff, n_heads, arrays):
    mm_flops = (
        2 * S * D * (3 * D)        # self qkv projection
        + 4 * S * S * D            # self scores + probs@V
        + 2 * S * D * D            # self output projection
        + 2 * S * D * D            # cross q projection
        + 2 * Skv * D * (2 * D)    # cross k|v projection
        + 4 * S * Skv * D          # cross scores + probs@V
        + 2 * S * D * D            # cross output projection
        + 4 * S * D * d_ff         # ffn
    )
    transcendentals = B * n_heads * (S * S + S * Skv)   # softmax exps
    bytes_accessed = sum(int(a.size) * a.dtype.itemsize for a in arrays)
    return pl.CostEstimate(flops=int(B * mm_flops),
                           transcendentals=int(transcendentals),
                           bytes_accessed=int(bytes_accessed))


def decoder_layer(x, enc_out, src_mask, tgt_mask, p, norm_a, norm_b,
                  n_heads, apply_final_norm, eps=1e-6):
    """One fused decoder layer (optionally fusing the final LayerNorm).

    x: (B,S,D), enc_out: (B,Skv,D), masks: 0/1 (B,S,S) / (B,S,Skv)."""
    B, S, D = x.shape
    Skv = enc_out.shape[1]

    def bspec_b(shape):   # per-batch 3-D block, batch dim squeezed out
        return pl.BlockSpec((None,) + shape, lambda b: (b, 0, 0))

    # Grid-invariant weights: whole array resident in VMEM, no double-buffering.
    wspec = pl.BlockSpec(memory_space=pltpu.MemorySpace.VMEM)

    weights = (
        p["ln1_a"], p["ln1_b"], p["wqkv_s"], p["bqkv_s"], p["wo_s"], p["bo_s"],
        p["ln2_a"], p["ln2_b"], p["wq_c"], p["bq_c"], p["wkv_c"], p["bkv_c"],
        p["wo_c"], p["bo_c"],
        p["ln3_a"], p["ln3_b"], p["ff1_w"], p["ff1_b"], p["ff2_w"], p["ff2_b"],
        norm_a, norm_b,
    )
    d_ff = p["ff1_w"].shape[1]
    cost = _layer_cost_estimate(
        B, S, Skv, D, d_ff, n_heads,
        (x, enc_out, tgt_mask, src_mask) + weights + (x,))

    kern = functools.partial(_decoder_layer_kernel, n_heads=n_heads, eps=eps,
                             apply_final_norm=apply_final_norm)
    return pl.pallas_call(
        kern,
        out_shape=jax.ShapeDtypeStruct((B, S, D), x.dtype),
        grid=(B,),
        in_specs=[bspec_b((S, D)), bspec_b((Skv, D)),
                  bspec_b((S, S)), bspec_b((S, Skv))]
                 + [wspec] * len(weights),
        out_specs=bspec_b((S, D)),
        compiler_params=pltpu.CompilerParams(
            dimension_semantics=("parallel",)),
        cost_estimate=cost,
    )(x, enc_out, tgt_mask, src_mask, *weights)


# ----------------------------------------------------------------------------
# Decoder forward (one fused pallas_call per layer; final norm fused into last)
# ----------------------------------------------------------------------------
def decoder_forward(x, encoder_output, src_mask, tgt_mask, params, n_heads):
    layers = params["layers"]
    n = len(layers)
    for i, layer_p in enumerate(layers):
        x = decoder_layer(x, encoder_output, src_mask, tgt_mask, layer_p,
                          params["norm_a"], params["norm_b"], n_heads,
                          apply_final_norm=(i == n - 1))
    return x


# ----------------------------------------------------------------------------
# Deterministic parameter init (pre-fused weight layout, bf16 matmul weights)
# ----------------------------------------------------------------------------
def init_layer_params(key, d_model, d_ff):
    ks = jax.random.split(key, 10)
    mk = lambda k, shp: (0.02 * jax.random.normal(k, shp, jnp.float32)
                         ).astype(jnp.bfloat16)
    wq_s, wk_s, wv_s = (mk(ks[0], (d_model, d_model)),
                        mk(ks[1], (d_model, d_model)),
                        mk(ks[2], (d_model, d_model)))
    wq_c, wk_c, wv_c = (mk(ks[3], (d_model, d_model)),
                        mk(ks[4], (d_model, d_model)),
                        mk(ks[5], (d_model, d_model)))
    zeros = lambda n: jnp.zeros((1, n), jnp.float32)
    ones = lambda n: jnp.ones((1, n), jnp.float32)
    return {
        # self-attention: q|k|v projections fused along the output (N) dim
        "wqkv_s": jnp.concatenate([wq_s, wk_s, wv_s], axis=1),
        "bqkv_s": zeros(3 * d_model),
        "wo_s": mk(ks[6], (d_model, d_model)),
        "bo_s": zeros(d_model),
        # cross-attention: q from x; k|v fused, from the encoder output
        "wq_c": wq_c, "bq_c": zeros(d_model),
        "wkv_c": jnp.concatenate([wk_c, wv_c], axis=1),
        "bkv_c": zeros(2 * d_model),
        "wo_c": mk(ks[7], (d_model, d_model)),
        "bo_c": zeros(d_model),
        # feed-forward
        "ff1_w": mk(ks[8], (d_model, d_ff)), "ff1_b": zeros(d_ff),
        "ff2_w": mk(ks[9], (d_ff, d_model)), "ff2_b": zeros(d_model),
        # layer norms (fp32)
        "ln1_a": ones(d_model), "ln1_b": zeros(d_model),
        "ln2_a": ones(d_model), "ln2_b": zeros(d_model),
        "ln3_a": ones(d_model), "ln3_b": zeros(d_model),
    }


def init_decoder_params(key, n_layers, d_model, d_ff):
    keys = jax.random.split(key, n_layers)
    return {
        "layers": [init_layer_params(k, d_model, d_ff) for k in keys],
        "norm_a": jnp.ones((1, d_model), jnp.float32),
        "norm_b": jnp.zeros((1, d_model), jnp.float32),
    }


# ----------------------------------------------------------------------------
# Driver
# ----------------------------------------------------------------------------
if __name__ == "__main__":
    # D_MODEL = 128 keeps every operand / the output lane-dense (128 lanes).
    B, S_TGT, S_SRC = 2, 8, 8
    D_MODEL, N_HEADS, D_FF, N_LAYERS = 128, 4, 256, 2

    root = jax.random.PRNGKey(0)
    k_x, k_enc, k_params = jax.random.split(root, 3)

    x = jax.random.normal(k_x, (B, S_TGT, D_MODEL), jnp.float32)
    encoder_output = jax.random.normal(k_enc, (B, S_SRC, D_MODEL), jnp.float32)

    # tgt_mask: causal (keep lower-triangular); src_mask: all visible.
    tgt_mask = jnp.broadcast_to(
        jnp.tril(jnp.ones((S_TGT, S_TGT), jnp.float32)), (B, S_TGT, S_TGT))
    src_mask = jnp.ones((B, S_TGT, S_SRC), jnp.float32)

    params = init_decoder_params(k_params, N_LAYERS, D_MODEL, D_FF)

    fwd = jax.jit(functools.partial(decoder_forward, n_heads=N_HEADS))
    out = fwd(x, encoder_output, src_mask, tgt_mask, params)
    jax.block_until_ready(out)

    assert out.shape == (B, S_TGT, D_MODEL) and out.dtype == jnp.float32
    assert bool(jnp.all(jnp.isfinite(out)))
    print("KERNEL_OK")
</pallas_src>

<mosaic_0001>
module attributes {stable_mosaic.version = 11 : i64} {
  func.func @_decoder_layer_kernel(%arg0: i32, %arg1: memref<1x8x128xf32, #tpu.memory_space<vmem>>, %arg2: memref<1x8x128xf32, #tpu.memory_space<vmem>>, %arg3: memref<1x8x8xf32, #tpu.memory_space<vmem>>, %arg4: memref<1x8x8xf32, #tpu.memory_space<vmem>>, %arg5: memref<1x128xf32, #tpu.memory_space<vmem>>, %arg6: memref<1x128xf32, #tpu.memory_space<vmem>>, %arg7: memref<128x384xbf16, #tpu.memory_space<vmem>>, %arg8: memref<1x384xf32, #tpu.memory_space<vmem>>, %arg9: memref<128x128xbf16, #tpu.memory_space<vmem>>, %arg10: memref<1x128xf32, #tpu.memory_space<vmem>>, %arg11: memref<1x128xf32, #tpu.memory_space<vmem>>, %arg12: memref<1x128xf32, #tpu.memory_space<vmem>>, %arg13: memref<128x128xbf16, #tpu.memory_space<vmem>>, %arg14: memref<1x128xf32, #tpu.memory_space<vmem>>, %arg15: memref<128x256xbf16, #tpu.memory_space<vmem>>, %arg16: memref<1x256xf32, #tpu.memory_space<vmem>>, %arg17: memref<128x128xbf16, #tpu.memory_space<vmem>>, %arg18: memref<1x128xf32, #tpu.memory_space<vmem>>, %arg19: memref<1x128xf32, #tpu.memory_space<vmem>>, %arg20: memref<1x128xf32, #tpu.memory_space<vmem>>, %arg21: memref<128x256xbf16, #tpu.memory_space<vmem>>, %arg22: memref<1x256xf32, #tpu.memory_space<vmem>>, %arg23: memref<256x128xbf16, #tpu.memory_space<vmem>>, %arg24: memref<1x128xf32, #tpu.memory_space<vmem>>, %arg25: memref<1x128xf32, #tpu.memory_space<vmem>>, %arg26: memref<1x128xf32, #tpu.memory_space<vmem>>, %arg27: memref<1x8x128xf32, #tpu.memory_space<vmem>>) attributes {dimension_semantics = [#tpu.dimension_semantics<parallel>], iteration_bounds = array<i64: 2>, scalar_prefetch = 0 : i64, scratch_operands = 0 : i64, tpu.core_type = #tpu.core_type<tc>, window_params = [{transform_indices = @transform_0, window_bounds = array<i64: 1, 8, 128>}, {transform_indices = @transform_1, window_bounds = array<i64: 1, 8, 128>}, {transform_indices = @transform_2, window_bounds = array<i64: 1, 8, 8>}, {transform_indices = @transform_3, window_bounds = array<i64: 1, 8, 8>}, {pipeline_mode = #tpu.pipeline_mode<synchronous>, transform_indices = @transform_4, window_bounds = array<i64: 1, 128>}, {pipeline_mode = #tpu.pipeline_mode<synchronous>, transform_indices = @transform_5, window_bounds = array<i64: 1, 128>}, {pipeline_mode = #tpu.pipeline_mode<synchronous>, transform_indices = @transform_6, window_bounds = array<i64: 128, 384>}, {pipeline_mode = #tpu.pipeline_mode<synchronous>, transform_indices = @transform_7, window_bounds = array<i64: 1, 384>}, {pipeline_mode = #tpu.pipeline_mode<synchronous>, transform_indices = @transform_8, window_bounds = array<i64: 128, 128>}, {pipeline_mode = #tpu.pipeline_mode<synchronous>, transform_indices = @transform_9, window_bounds = array<i64: 1, 128>}, {pipeline_mode = #tpu.pipeline_mode<synchronous>, transform_indices = @transform_10, window_bounds = array<i64: 1, 128>}, {pipeline_mode = #tpu.pipeline_mode<synchronous>, transform_indices = @transform_11, window_bounds = array<i64: 1, 128>}, {pipeline_mode = #tpu.pipeline_mode<synchronous>, transform_indices = @transform_12, window_bounds = array<i64: 128, 128>}, {pipeline_mode = #tpu.pipeline_mode<synchronous>, transform_indices = @transform_13, window_bounds = array<i64: 1, 128>}, {pipeline_mode = #tpu.pipeline_mode<synchronous>, transform_indices = @transform_14, window_bounds = array<i64: 128, 256>}, {pipeline_mode = #tpu.pipeline_mode<synchronous>, transform_indices = @transform_15, window_bounds = array<i64: 1, 256>}, {pipeline_mode = #tpu.pipeline_mode<synchronous>, transform_indices = @transform_16, window_bounds = array<i64: 128, 128>}, {pipeline_mode = #tpu.pipeline_mode<synchronous>, transform_indices = @transform_17, window_bounds = array<i64: 1, 128>}, {pipeline_mode = #tpu.pipeline_mode<synchronous>, transform_indices = @transform_18, window_bounds = array<i64: 1, 128>}, {pipeline_mode = #tpu.pipeline_mode<synchronous>, transform_indices = @transform_19, window_bounds = array<i64: 1, 128>}, {pipeline_mode = #tpu.pipeline_mode<synchronous>, transform_indices = @transform_20, window_bounds = array<i64: 128, 256>}, {pipeline_mode = #tpu.pipeline_mode<synchronous>, transform_indices = @transform_21, window_bounds = array<i64: 1, 256>}, {pipeline_mode = #tpu.pipeline_mode<synchronous>, transform_indices = @transform_22, window_bounds = array<i64: 256, 128>}, {pipeline_mode = #tpu.pipeline_mode<synchronous>, transform_indices = @transform_23, window_bounds = array<i64: 1, 128>}, {pipeline_mode = #tpu.pipeline_mode<synchronous>, transform_indices = @transform_24, window_bounds = array<i64: 1, 128>}, {pipeline_mode = #tpu.pipeline_mode<synchronous>, transform_indices = @transform_25, window_bounds = array<i64: 1, 128>}, {transform_indices = @transform_26, window_bounds = array<i64: 1, 8, 128>}]} {
    %c0 = arith.constant 0 : index
    %c0_0 = arith.constant 0 : index
    %c0_1 = arith.constant 0 : index
    %0 = vector.load %arg1[%c0, %c0_0, %c0_1] : memref<1x8x128xf32, #tpu.memory_space<vmem>>, vector<1x8x128xf32>
    %1 = vector.shape_cast %0 : vector<1x8x128xf32> to vector<8x128xf32>
    %c0_2 = arith.constant 0 : index
    %c0_3 = arith.constant 0 : index
    %c0_4 = arith.constant 0 : index
    %2 = vector.load %arg2[%c0_2, %c0_3, %c0_4] : memref<1x8x128xf32, #tpu.memory_space<vmem>>, vector<1x8x128xf32>
    %3 = vector.shape_cast %2 : vector<1x8x128xf32> to vector<8x128xf32>
    %4 = arith.truncf %3 : vector<8x128xf32> to vector<8x128xbf16>
    %c0_5 = arith.constant 0 : index
    %c0_6 = arith.constant 0 : index
    %c0_7 = arith.constant 0 : index
    %5 = vector.load %arg3[%c0_5, %c0_6, %c0_7] : memref<1x8x8xf32, #tpu.memory_space<vmem>>, vector<1x8x8xf32>
    %6 = vector.shape_cast %5 : vector<1x8x8xf32> to vector<8x8xf32>
    %cst = arith.constant 0.000000e+00 : f32
    %7 = vector.broadcast %cst : f32 to vector<8x8xf32>
    %8 = arith.cmpf one, %6, %7 : vector<8x8xf32>
    %cst_8 = arith.constant 0.000000e+00 : f32
    %cst_9 = arith.constant -1.000000e+09 : f32
    %9 = vector.broadcast %cst_8 : f32 to vector<8x8xf32>
    %10 = vector.broadcast %cst_9 : f32 to vector<8x8xf32>
    %11 = arith.select %8, %9, %10 : vector<8x8xi1>, vector<8x8xf32>
    %c0_10 = arith.constant 0 : index
    %c0_11 = arith.constant 0 : index
    %c0_12 = arith.constant 0 : index
    %12 = vector.load %arg4[%c0_10, %c0_11, %c0_12] : memref<1x8x8xf32, #tpu.memory_space<vmem>>, vector<1x8x8xf32>
    %13 = vector.shape_cast %12 : vector<1x8x8xf32> to vector<8x8xf32>
    %cst_13 = arith.constant 0.000000e+00 : f32
    %14 = vector.broadcast %cst_13 : f32 to vector<8x8xf32>
    %15 = arith.cmpf one, %13, %14 : vector<8x8xf32>
    %cst_14 = arith.constant 0.000000e+00 : f32
    %cst_15 = arith.constant -1.000000e+09 : f32
    %16 = vector.broadcast %cst_14 : f32 to vector<8x8xf32>
    %17 = vector.broadcast %cst_15 : f32 to vector<8x8xf32>
    %18 = arith.select %15, %16, %17 : vector<8x8xi1>, vector<8x8xf32>
    %c0_16 = arith.constant 0 : index
    %c0_17 = arith.constant 0 : index
    %19 = vector.load %arg5[%c0_16, %c0_17] : memref<1x128xf32, #tpu.memory_space<vmem>>, vector<1x128xf32>
    %c0_18 = arith.constant 0 : index
    %c0_19 = arith.constant 0 : index
    %20 = vector.load %arg6[%c0_18, %c0_19] : memref<1x128xf32, #tpu.memory_space<vmem>>, vector<1x128xf32>
    %cst_20 = arith.constant dense<0.000000e+00> : vector<8xf32>
    %21 = vector.multi_reduction <add>, %1, %cst_20 [1] : vector<8x128xf32> to vector<8xf32>
    %22 = vector.shape_cast %21 : vector<8xf32> to vector<8x1xf32>
    %cst_21 = arith.constant 1.280000e+02 : f32
    %23 = vector.broadcast %cst_21 : f32 to vector<8x1xf32>
    %24 = arith.divf %22, %23 : vector<8x1xf32>
    %25 = vector.broadcast %24 : vector<8x1xf32> to vector<8x128xf32>
    %26 = arith.subf %1, %25 : vector<8x128xf32>
    %27 = arith.mulf %26, %26 : vector<8x128xf32>
    %cst_22 = arith.constant dense<0.000000e+00> : vector<8xf32>
    %28 = vector.multi_reduction <add>, %27, %cst_22 [1] : vector<8x128xf32> to vector<8xf32>
    %29 = vector.shape_cast %28 : vector<8xf32> to vector<8x1xf32>
    %cst_23 = arith.constant 0.00787401571 : f32
    %30 = vector.broadcast %cst_23 : f32 to vector<8x1xf32>
    %31 = arith.mulf %29, %30 : vector<8x1xf32>
    %32 = math.sqrt %31 : vector<8x1xf32>
    %cst_24 = arith.constant 9.99999997E-7 : f32
    %33 = vector.broadcast %cst_24 : f32 to vector<8x1xf32>
    %34 = arith.addf %32, %33 : vector<8x1xf32>
    %35 = vector.broadcast %34 : vector<8x1xf32> to vector<8x128xf32>
    %36 = arith.divf %26, %35 : vector<8x128xf32>
    %37 = vector.broadcast %19 : vector<1x128xf32> to vector<8x128xf32>
    %38 = arith.mulf %36, %37 : vector<8x128xf32>
    %39 = vector.broadcast %20 : vector<1x128xf32> to vector<8x128xf32>
    %40 = arith.addf %38, %39 : vector<8x128xf32>
    %41 = arith.truncf %40 : vector<8x128xf32> to vector<8x128xbf16>
    %c0_25 = arith.constant 0 : index
    %c0_26 = arith.constant 0 : index
    %42 = vector.load %arg7[%c0_25, %c0_26] : memref<128x384xbf16, #tpu.memory_space<vmem>>, vector<128x384xbf16>
    %cst_27 = arith.constant dense<0.000000e+00> : vector<8x384xf32>
    %43 = tpu.matmul %41, %42, %cst_27 {dimension_numbers = #tpu.dot_dimension_numbers<[1], [0], [0], [1], [0, 0, 1, 1], [], []>} : vector<8x128xbf16>, vector<128x384xbf16>, vector<8x384xf32> -> vector<8x384xf32>
    %c0_28 = arith.constant 0 : index
    %c0_29 = arith.constant 0 : index
    %44 = vector.load %arg8[%c0_28, %c0_29] : memref<1x384xf32, #tpu.memory_space<vmem>>, vector<1x384xf32>
    %45 = vector.broadcast %44 : vector<1x384xf32> to vector<8x384xf32>
    %46 = arith.addf %43, %45 : vector<8x384xf32>
    %47 = vector.extract_strided_slice %46 {offsets = [0, 0], sizes = [8, 128], strides = [1, 1]} : vector<8x384xf32> to vector<8x128xf32>
    %48 = vector.extract_strided_slice %46 {offsets = [0, 128], sizes = [8, 128], strides = [1, 1]} : vector<8x384xf32> to vector<8x128xf32>
    %49 = vector.extract_strided_slice %46 {offsets = [0, 256], sizes = [8, 128], strides = [1, 1]} : vector<8x384xf32> to vector<8x128xf32>
    %c0_30 = arith.constant 0 : index
    %c0_31 = arith.constant 0 : index
    %50 = vector.load %arg9[%c0_30, %c0_31] : memref<128x128xbf16, #tpu.memory_space<vmem>>, vector<128x128xbf16>
    %c0_32 = arith.constant 0 : index
    %c0_33 = arith.constant 0 : index
    %51 = vector.load %arg10[%c0_32, %c0_33] : memref<1x128xf32, #tpu.memory_space<vmem>>, vector<1x128xf32>
    %52 = vector.shape_cast %47 : vector<8x128xf32> to vector<8x4x32xf32>
    %53 = tpu.transpose %52, [1, 0, 2] : vector<8x4x32xf32> -> vector<4x8x32xf32>
    %54 = arith.truncf %53 : vector<4x8x32xf32> to vector<4x8x32xbf16>
    %55 = vector.shape_cast %48 : vector<8x128xf32> to vector<8x4x32xf32>
    %56 = tpu.transpose %55, [1, 0, 2] : vector<8x4x32xf32> -> vector<4x8x32xf32>
    %57 = arith.truncf %56 : vector<4x8x32xf32> to vector<4x8x32xbf16>
    %58 = vector.shape_cast %49 : vector<8x128xf32> to vector<8x4x32xf32>
    %59 = tpu.transpose %58, [1, 0, 2] : vector<8x4x32xf32> -> vector<4x8x32xf32>
    %60 = arith.truncf %59 : vector<4x8x32xf32> to vector<4x8x32xbf16>
    "tpu.trace_start"() <{level = 10 : i32, message = "hqd,hkd->hqk"}> : () -> ()
    %cst_34 = arith.constant dense<0.000000e+00> : vector<4x8x8xf32>
    %61 = tpu.matmul %54, %57, %cst_34 {dimension_numbers = #tpu.dot_dimension_numbers<[2], [2], [1], [1], [0, 0, 0, 1, 1, 1], [0], [0]>} : vector<4x8x32xbf16>, vector<4x8x32xbf16>, vector<4x8x8xf32> -> vector<4x8x8xf32>
    "tpu.trace_stop"() : () -> ()
    %cst_35 = arith.constant 0.176776692 : f32
    %62 = vector.broadcast %cst_35 : f32 to vector<4x8x8xf32>
    %63 = arith.mulf %61, %62 : vector<4x8x8xf32>
    %64 = vector.shape_cast %11 : vector<8x8xf32> to vector<1x8x8xf32>
    %65 = vector.broadcast %64 : vector<1x8x8xf32> to vector<4x8x8xf32>
    %66 = arith.addf %63, %65 : vector<4x8x8xf32>
    %cst_36 = arith.constant dense<0xFF800000> : vector<4x8xf32>
    %67 = vector.multi_reduction <maximumf>, %66, %cst_36 [2] : vector<4x8x8xf32> to vector<4x8xf32>
    %68 = vector.shape_cast %67 : vector<4x8xf32> to vector<4x8x1xf32>
    %69 = vector.broadcast %68 : vector<4x8x1xf32> to vector<4x8x8xf32>
    %70 = arith.subf %66, %69 : vector<4x8x8xf32>
    %71 = math.exp %70 : vector<4x8x8xf32>
    %cst_37 = arith.constant dense<0.000000e+00> : vector<4x8xf32>
    %72 = vector.multi_reduction <add>, %71, %cst_37 [2] : vector<4x8x8xf32> to vector<4x8xf32>
    %73 = vector.shape_cast %72 : vector<4x8xf32> to vector<4x8x1xf32>
    %74 = tpu.reciprocal %73 {approx = true} : vector<4x8x1xf32> -> vector<4x8x1xf32>
    %75 = vector.broadcast %74 : vector<4x8x1xf32> to vector<4x8x8xf32>
    %76 = arith.mulf %71, %75 : vector<4x8x8xf32>
    %77 = arith.truncf %76 : vector<4x8x8xf32> to vector<4x8x8xbf16>
    "tpu.trace_start"() <{level = 10 : i32, message = "hqk,hkd->hqd"}> : () -> ()
    %cst_38 = arith.constant dense<0.000000e+00> : vector<4x8x32xf32>
    %78 = tpu.matmul %77, %60, %cst_38 {dimension_numbers = #tpu.dot_dimension_numbers<[2], [1], [1], [2], [0, 0, 0, 1, 1, 2], [0], [0]>} : vector<4x8x8xbf16>, vector<4x8x32xbf16>, vector<4x8x32xf32> -> vector<4x8x32xf32>
    "tpu.trace_stop"() : () -> ()
    %79 = tpu.transpose %78, [1, 0, 2] : vector<4x8x32xf32> -> vector<8x4x32xf32>
    %80 = vector.shape_cast %79 : vector<8x4x32xf32> to vector<8x128xf32>
    %81 = arith.truncf %80 : vector<8x128xf32> to vector<8x128xbf16>
    %cst_39 = arith.constant dense<0.000000e+00> : vector<8x128xf32>
    %82 = tpu.matmul %81, %50, %cst_39 {dimension_numbers = #tpu.dot_dimension_numbers<[1], [0], [0], [1], [0, 0, 1, 1], [], []>} : vector<8x128xbf16>, vector<128x128xbf16>, vector<8x128xf32> -> vector<8x128xf32>
    %83 = vector.broadcast %51 : vector<1x128xf32> to vector<8x128xf32>
    %84 = arith.addf %82, %83 : vector<8x128xf32>
    %85 = arith.addf %1, %84 : vector<8x128xf32>
    %c0_40 = arith.constant 0 : index
    %c0_41 = arith.constant 0 : index
    %86 = vector.load %arg11[%c0_40, %c0_41] : memref<1x128xf32, #tpu.memory_space<vmem>>, vector<1x128xf32>
    %c0_42 = arith.constant 0 : index
    %c0_43 = arith.constant 0 : index
    %87 = vector.load %arg12[%c0_42, %c0_43] : memref<1x128xf32, #tpu.memory_space<vmem>>, vector<1x128xf32>
    %cst_44 = arith.constant dense<0.000000e+00> : vector<8xf32>
    %88 = vector.multi_reduction <add>, %85, %cst_44 [1] : vector<8x128xf32> to vector<8xf32>
    %89 = vector.shape_cast %88 : vector<8xf32> to vector<8x1xf32>
    %cst_45 = arith.constant 1.280000e+02 : f32
    %90 = vector.broadcast %cst_45 : f32 to vector<8x1xf32>
    %91 = arith.divf %89, %90 : vector<8x1xf32>
    %92 = vector.broadcast %91 : vector<8x1xf32> to vector<8x128xf32>
    %93 = arith.subf %85, %92 : vector<8x128xf32>
    %94 = arith.mulf %93, %93 : vector<8x128xf32>
    %cst_46 = arith.constant dense<0.000000e+00> : vector<8xf32>
    %95 = vector.multi_reduction <add>, %94, %cst_46 [1] : vector<8x128xf32> to vector<8xf32>
    %96 = vector.shape_cast %95 : vector<8xf32> to vector<8x1xf32>
    %cst_47 = arith.constant 0.00787401571 : f32
    %97 = vector.broadcast %cst_47 : f32 to vector<8x1xf32>
    %98 = arith.mulf %96, %97 : vector<8x1xf32>
    %99 = math.sqrt %98 : vector<8x1xf32>
    %cst_48 = arith.constant 9.99999997E-7 : f32
    %100 = vector.broadcast %cst_48 : f32 to vector<8x1xf32>
    %101 = arith.addf %99, %100 : vector<8x1xf32>
    %102 = vector.broadcast %101 : vector<8x1xf32> to vector<8x128xf32>
    %103 = arith.divf %93, %102 : vector<8x128xf32>
    %104 = vector.broadcast %86 : vector<1x128xf32> to vector<8x128xf32>
    %105 = arith.mulf %103, %104 : vector<8x128xf32>
    %106 = vector.broadcast %87 : vector<1x128xf32> to vector<8x128xf32>
    %107 = arith.addf %105, %106 : vector<8x128xf32>
    %108 = arith.truncf %107 : vector<8x128xf32> to vector<8x128xbf16>
    %c0_49 = arith.constant 0 : index
    %c0_50 = arith.constant 0 : index
    %109 = vector.load %arg13[%c0_49, %c0_50] : memref<128x128xbf16, #tpu.memory_space<vmem>>, vector<128x128xbf16>
    %cst_51 = arith.constant dense<0.000000e+00> : vector<8x128xf32>
    %110 = tpu.matmul %108, %109, %cst_51 {dimension_numbers = #tpu.dot_dimension_numbers<[1], [0], [0], [1], [0, 0, 1, 1], [], []>} : vector<8x128xbf16>, vector<128x128xbf16>, vector<8x128xf32> -> vector<8x128xf32>
    %c0_52 = arith.constant 0 : index
    %c0_53 = arith.constant 0 : index
    %111 = vector.load %arg14[%c0_52, %c0_53] : memref<1x128xf32, #tpu.memory_space<vmem>>, vector<1x128xf32>
    %112 = vector.broadcast %111 : vector<1x128xf32> to vector<8x128xf32>
    %113 = arith.addf %110, %112 : vector<8x128xf32>
    %c0_54 = arith.constant 0 : index
    %c0_55 = arith.constant 0 : index
    %114 = vector.load %arg15[%c0_54, %c0_55] : memref<128x256xbf16, #tpu.memory_space<vmem>>, vector<128x256xbf16>
    %cst_56 = arith.constant dense<0.000000e+00> : vector<8x256xf32>
    %115 = tpu.matmul %4, %114, %cst_56 {dimension_numbers = #tpu.dot_dimension_numbers<[1], [0], [0], [1], [0, 0, 1, 1], [], []>} : vector<8x128xbf16>, vector<128x256xbf16>, vector<8x256xf32> -> vector<8x256xf32>
    %c0_57 = arith.constant 0 : index
    %c0_58 = arith.constant 0 : index
    %116 = vector.load %arg16[%c0_57, %c0_58] : memref<1x256xf32, #tpu.memory_space<vmem>>, vector<1x256xf32>
    %117 = vector.broadcast %116 : vector<1x256xf32> to vector<8x256xf32>
    %118 = arith.addf %115, %117 : vector<8x256xf32>
    %119 = vector.extract_strided_slice %118 {offsets = [0, 0], sizes = [8, 128], strides = [1, 1]} : vector<8x256xf32> to vector<8x128xf32>
    %120 = vector.extract_strided_slice %118 {offsets = [0, 128], sizes = [8, 128], strides = [1, 1]} : vector<8x256xf32> to vector<8x128xf32>
    %c0_59 = arith.constant 0 : index
    %c0_60 = arith.constant 0 : index
    %121 = vector.load %arg17[%c0_59, %c0_60] : memref<128x128xbf16, #tpu.memory_space<vmem>>, vector<128x128xbf16>
    %c0_61 = arith.constant 0 : index
    %c0_62 = arith.constant 0 : index
    %122 = vector.load %arg18[%c0_61, %c0_62] : memref<1x128xf32, #tpu.memory_space<vmem>>, vector<1x128xf32>
    %123 = vector.shape_cast %113 : vector<8x128xf32> to vector<8x4x32xf32>
    %124 = tpu.transpose %123, [1, 0, 2] : vector<8x4x32xf32> -> vector<4x8x32xf32>
    %125 = arith.truncf %124 : vector<4x8x32xf32> to vector<4x8x32xbf16>
    %126 = vector.shape_cast %119 : vector<8x128xf32> to vector<8x4x32xf32>
    %127 = tpu.transpose %126, [1, 0, 2] : vector<8x4x32xf32> -> vector<4x8x32xf32>
    %128 = arith.truncf %127 : vector<4x8x32xf32> to vector<4x8x32xbf16>
    %129 = vector.shape_cast %120 : vector<8x128xf32> to vector<8x4x32xf32>
    %130 = tpu.transpose %129, [1, 0, 2] : vector<8x4x32xf32> -> vector<4x8x32xf32>
    %131 = arith.truncf %130 : vector<4x8x32xf32> to vector<4x8x32xbf16>
    "tpu.trace_start"() <{level = 10 : i32, message = "hqd,hkd->hqk"}> : () -> ()
    %cst_63 = arith.constant dense<0.000000e+00> : vector<4x8x8xf32>
    %132 = tpu.matmul %125, %128, %cst_63 {dimension_numbers = #tpu.dot_dimension_numbers<[2], [2], [1], [1], [0, 0, 0, 1, 1, 1], [0], [0]>} : vector<4x8x32xbf16>, vector<4x8x32xbf16>, vector<4x8x8xf32> -> vector<4x8x8xf32>
    "tpu.trace_stop"() : () -> ()
    %cst_64 = arith.constant 0.176776692 : f32
    %133 = vector.broadcast %cst_64 : f32 to vector<4x8x8xf32>
    %134 = arith.mulf %132, %133 : vector<4x8x8xf32>
    %135 = vector.shape_cast %18 : vector<8x8xf32> to vector<1x8x8xf32>
    %136 = vector.broadcast %135 : vector<1x8x8xf32> to vector<4x8x8xf32>
    %137 = arith.addf %134, %136 : vector<4x8x8xf32>
    %cst_65 = arith.constant dense<0xFF800000> : vector<4x8xf32>
    %138 = vector.multi_reduction <maximumf>, %137, %cst_65 [2] : vector<4x8x8xf32> to vector<4x8xf32>
    %139 = vector.shape_cast %138 : vector<4x8xf32> to vector<4x8x1xf32>
    %140 = vector.broadcast %139 : vector<4x8x1xf32> to vector<4x8x8xf32>
    %141 = arith.subf %137, %140 : vector<4x8x8xf32>
    %142 = math.exp %141 : vector<4x8x8xf32>
    %cst_66 = arith.constant dense<0.000000e+00> : vector<4x8xf32>
    %143 = vector.multi_reduction <add>, %142, %cst_66 [2] : vector<4x8x8xf32> to vector<4x8xf32>
    %144 = vector.shape_cast %143 : vector<4x8xf32> to vector<4x8x1xf32>
    %145 = tpu.reciprocal %144 {approx = true} : vector<4x8x1xf32> -> vector<4x8x1xf32>
    %146 = vector.broadcast %145 : vector<4x8x1xf32> to vector<4x8x8xf32>
    %147 = arith.mulf %142, %146 : vector<4x8x8xf32>
    %148 = arith.truncf %147 : vector<4x8x8xf32> to vector<4x8x8xbf16>
    "tpu.trace_start"() <{level = 10 : i32, message = "hqk,hkd->hqd"}> : () -> ()
    %cst_67 = arith.constant dense<0.000000e+00> : vector<4x8x32xf32>
    %149 = tpu.matmul %148, %131, %cst_67 {dimension_numbers = #tpu.dot_dimension_numbers<[2], [1], [1], [2], [0, 0, 0, 1, 1, 2], [0], [0]>} : vector<4x8x8xbf16>, vector<4x8x32xbf16>, vector<4x8x32xf32> -> vector<4x8x32xf32>
    "tpu.trace_stop"() : () -> ()
    %150 = tpu.transpose %149, [1, 0, 2] : vector<4x8x32xf32> -> vector<8x4x32xf32>
    %151 = vector.shape_cast %150 : vector<8x4x32xf32> to vector<8x128xf32>
    %152 = arith.truncf %151 : vector<8x128xf32> to vector<8x128xbf16>
    %cst_68 = arith.constant dense<0.000000e+00> : vector<8x128xf32>
    %153 = tpu.matmul %152, %121, %cst_68 {dimension_numbers = #tpu.dot_dimension_numbers<[1], [0], [0], [1], [0, 0, 1, 1], [], []>} : vector<8x128xbf16>, vector<128x128xbf16>, vector<8x128xf32> -> vector<8x128xf32>
    %154 = vector.broadcast %122 : vector<1x128xf32> to vector<8x128xf32>
    %155 = arith.addf %153, %154 : vector<8x128xf32>
    %156 = arith.addf %85, %155 : vector<8x128xf32>
    %c0_69 = arith.constant 0 : index
    %c0_70 = arith.constant 0 : index
    %157 = vector.load %arg19[%c0_69, %c0_70] : memref<1x128xf32, #tpu.memory_space<vmem>>, vector<1x128xf32>
    %c0_71 = arith.constant 0 : index
    %c0_72 = arith.constant 0 : index
    %158 = vector.load %arg20[%c0_71, %c0_72] : memref<1x128xf32, #tpu.memory_space<vmem>>, vector<1x128xf32>
    %cst_73 = arith.constant dense<0.000000e+00> : vector<8xf32>
    %159 = vector.multi_reduction <add>, %156, %cst_73 [1] : vector<8x128xf32> to vector<8xf32>
    %160 = vector.shape_cast %159 : vector<8xf32> to vector<8x1xf32>
    %cst_74 = arith.constant 1.280000e+02 : f32
    %161 = vector.broadcast %cst_74 : f32 to vector<8x1xf32>
    %162 = arith.divf %160, %161 : vector<8x1xf32>
    %163 = vector.broadcast %162 : vector<8x1xf32> to vector<8x128xf32>
    %164 = arith.subf %156, %163 : vector<8x128xf32>
    %165 = arith.mulf %164, %164 : vector<8x128xf32>
    %cst_75 = arith.constant dense<0.000000e+00> : vector<8xf32>
    %166 = vector.multi_reduction <add>, %165, %cst_75 [1] : vector<8x128xf32> to vector<8xf32>
    %167 = vector.shape_cast %166 : vector<8xf32> to vector<8x1xf32>
    %cst_76 = arith.constant 0.00787401571 : f32
    %168 = vector.broadcast %cst_76 : f32 to vector<8x1xf32>
    %169 = arith.mulf %167, %168 : vector<8x1xf32>
    %170 = math.sqrt %169 : vector<8x1xf32>
    %cst_77 = arith.constant 9.99999997E-7 : f32
    %171 = vector.broadcast %cst_77 : f32 to vector<8x1xf32>
    %172 = arith.addf %170, %171 : vector<8x1xf32>
    %173 = vector.broadcast %172 : vector<8x1xf32> to vector<8x128xf32>
    %174 = arith.divf %164, %173 : vector<8x128xf32>
    %175 = vector.broadcast %157 : vector<1x128xf32> to vector<8x128xf32>
    %176 = arith.mulf %174, %175 : vector<8x128xf32>
    %177 = vector.broadcast %158 : vector<1x128xf32> to vector<8x128xf32>
    %178 = arith.addf %176, %177 : vector<8x128xf32>
    %179 = arith.truncf %178 : vector<8x128xf32> to vector<8x128xbf16>
    %c0_78 = arith.constant 0 : index
    %c0_79 = arith.constant 0 : index
    %180 = vector.load %arg21[%c0_78, %c0_79] : memref<128x256xbf16, #tpu.memory_space<vmem>>, vector<128x256xbf16>
    %cst_80 = arith.constant dense<0.000000e+00> : vector<8x256xf32>
    %181 = tpu.matmul %179, %180, %cst_80 {dimension_numbers = #tpu.dot_dimension_numbers<[1], [0], [0], [1], [0, 0, 1, 1], [], []>} : vector<8x128xbf16>, vector<128x256xbf16>, vector<8x256xf32> -> vector<8x256xf32>
    %c0_81 = arith.constant 0 : index
    %c0_82 = arith.constant 0 : index
    %182 = vector.load %arg22[%c0_81, %c0_82] : memref<1x256xf32, #tpu.memory_space<vmem>>, vector<1x256xf32>
    %183 = vector.broadcast %182 : vector<1x256xf32> to vector<8x256xf32>
    %184 = arith.addf %181, %183 : vector<8x256xf32>
    %cst_83 = arith.constant 0.000000e+00 : f32
    %185 = vector.broadcast %cst_83 : f32 to vector<8x256xf32>
    %186 = arith.maximumf %184, %185 : vector<8x256xf32>
    %187 = arith.truncf %186 : vector<8x256xf32> to vector<8x256xbf16>
    %c0_84 = arith.constant 0 : index
    %c0_85 = arith.constant 0 : index
    %188 = vector.load %arg23[%c0_84, %c0_85] : memref<256x128xbf16, #tpu.memory_space<vmem>>, vector<256x128xbf16>
    %cst_86 = arith.constant dense<0.000000e+00> : vector<8x128xf32>
    %189 = tpu.matmul %187, %188, %cst_86 {dimension_numbers = #tpu.dot_dimension_numbers<[1], [0], [0], [1], [0, 0, 1, 1], [], []>} : vector<8x256xbf16>, vector<256x128xbf16>, vector<8x128xf32> -> vector<8x128xf32>
    %190 = arith.addf %156, %189 : vector<8x128xf32>
    %c0_87 = arith.constant 0 : index
    %c0_88 = arith.constant 0 : index
    %191 = vector.load %arg24[%c0_87, %c0_88] : memref<1x128xf32, #tpu.memory_space<vmem>>, vector<1x128xf32>
    %192 = vector.broadcast %191 : vector<1x128xf32> to vector<8x128xf32>
    %193 = arith.addf %190, %192 : vector<8x128xf32>
    %c0_89 = arith.constant 0 : index
    %c0_90 = arith.constant 0 : index
    %c0_91 = arith.constant 0 : index
    %194 = vector.load %arg27[%c0_89, %c0_90, %c0_91] : memref<1x8x128xf32, #tpu.memory_space<vmem>>, vector<1x8x128xf32>
    %195 = vector.shape_cast %194 : vector<1x8x128xf32> to vector<8x128xf32>
    %196 = vector.shape_cast %193 : vector<8x128xf32> to vector<1x8x128xf32>
    tpu.vector_store %arg27[%c0_89, %c0_90, %c0_91], %196 {strides = array<i32>} : memref<1x8x128xf32, #tpu.memory_space<vmem>>, vector<1x8x128xf32>,
    return
  }
  func.func @transform_0(%arg0: i32) -> (i32, i32, i32) {
    %c0_i32 = arith.constant 0 : i32
    %c0_i32_0 = arith.constant 0 : i32
    %c0_i32_1 = arith.constant 0 : i32
    return %arg0, %c0_i32, %c0_i32_0 : i32, i32, i32
  }
  func.func @transform_1(%arg0: i32) -> (i32, i32, i32) {
    %c0_i32 = arith.constant 0 : i32
    %c0_i32_0 = arith.constant 0 : i32
    %c0_i32_1 = arith.constant 0 : i32
    return %arg0, %c0_i32, %c0_i32_0 : i32, i32, i32
  }
  func.func @transform_2(%arg0: i32) -> (i32, i32, i32) {
    %c0_i32 = arith.constant 0 : i32
    %c0_i32_0 = arith.constant 0 : i32
    %c0_i32_1 = arith.constant 0 : i32
    return %arg0, %c0_i32, %c0_i32_0 : i32, i32, i32
  }
  func.func @transform_3(%arg0: i32) -> (i32, i32, i32) {
    %c0_i32 = arith.constant 0 : i32
    %c0_i32_0 = arith.constant 0 : i32
    %c0_i32_1 = arith.constant 0 : i32
    return %arg0, %c0_i32, %c0_i32_0 : i32, i32, i32
  }
  func.func @transform_4(%arg0: i32) -> (i32, i32) {
    %c0_i32 = arith.constant 0 : i32
    %c0_i32_0 = arith.constant 0 : i32
    %c0_i32_1 = arith.constant 0 : i32
    return %c0_i32, %c0_i32_0 : i32, i32
  }
  func.func @transform_5(%arg0: i32) -> (i32, i32) {
    %c0_i32 = arith.constant 0 : i32
    %c0_i32_0 = arith.constant 0 : i32
    %c0_i32_1 = arith.constant 0 : i32
    return %c0_i32, %c0_i32_0 : i32, i32
  }
  func.func @transform_6(%arg0: i32) -> (i32, i32) {
    %c0_i32 = arith.constant 0 : i32
    %c0_i32_0 = arith.constant 0 : i32
    %c0_i32_1 = arith.constant 0 : i32
    return %c0_i32, %c0_i32_0 : i32, i32
  }
  func.func @transform_7(%arg0: i32) -> (i32, i32) {
    %c0_i32 = arith.constant 0 : i32
    %c0_i32_0 = arith.constant 0 : i32
    %c0_i32_1 = arith.constant 0 : i32
    return %c0_i32, %c0_i32_0 : i32, i32
  }
  func.func @transform_8(%arg0: i32) -> (i32, i32) {
    %c0_i32 = arith.constant 0 : i32
    %c0_i32_0 = arith.constant 0 : i32
    %c0_i32_1 = arith.constant 0 : i32
    return %c0_i32, %c0_i32_0 : i32, i32
  }
  func.func @transform_9(%arg0: i32) -> (i32, i32) {
    %c0_i32 = arith.constant 0 : i32
    %c0_i32_0 = arith.constant 0 : i32
    %c0_i32_1 = arith.constant 0 : i32
    return %c0_i32, %c0_i32_0 : i32, i32
  }
  func.func @transform_10(%arg0: i32) -> (i32, i32) {
    %c0_i32 = arith.constant 0 : i32
    %c0_i32_0 = arith.constant 0 : i32
    %c0_i32_1 = arith.constant 0 : i32
    return %c0_i32, %c0_i32_0 : i32, i32
  }
  func.func @transform_11(%arg0: i32) -> (i32, i32) {
    %c0_i32 = arith.constant 0 : i32
    %c0_i32_0 = arith.constant 0 : i32
    %c0_i32_1 = arith.constant 0 : i32
    return %c0_i32, %c0_i32_0 : i32, i32
  }
  func.func @transform_12(%arg0: i32) -> (i32, i32) {
    %c0_i32 = arith.constant 0 : i32
    %c0_i32_0 = arith.constant 0 : i32
    %c0_i32_1 = arith.constant 0 : i32
    return %c0_i32, %c0_i32_0 : i32, i32
  }
  func.func @transform_13(%arg0: i32) -> (i32, i32) {
    %c0_i32 = arith.constant 0 : i32
    %c0_i32_0 = arith.constant 0 : i32
    %c0_i32_1 = arith.constant 0 : i32
    return %c0_i32, %c0_i32_0 : i32, i32
  }
  func.func @transform_14(%arg0: i32) -> (i32, i32) {
    %c0_i32 = arith.constant 0 : i32
    %c0_i32_0 = arith.constant 0 : i32
    %c0_i32_1 = arith.constant 0 : i32
    return %c0_i32, %c0_i32_0 : i32, i32
  }
  func.func @transform_15(%arg0: i32) -> (i32, i32) {
    %c0_i32 = arith.constant 0 : i32
    %c0_i32_0 = arith.constant 0 : i32
    %c0_i32_1 = arith.constant 0 : i32
    return %c0_i32, %c0_i32_0 : i32, i32
  }
  func.func @transform_16(%arg0: i32) -> (i32, i32) {
    %c0_i32 = arith.constant 0 : i32
    %c0_i32_0 = arith.constant 0 : i32
    %c0_i32_1 = arith.constant 0 : i32
    return %c0_i32, %c0_i32_0 : i32, i32
  }
  func.func @transform_17(%arg0: i32) -> (i32, i32) {
    %c0_i32 = arith.constant 0 : i32
    %c0_i32_0 = arith.constant 0 : i32
    %c0_i32_1 = arith.constant 0 : i32
    return %c0_i32, %c0_i32_0 : i32, i32
  }
  func.func @transform_18(%arg0: i32) -> (i32, i32) {
    %c0_i32 = arith.constant 0 : i32
    %c0_i32_0 = arith.constant 0 : i32
    %c0_i32_1 = arith.constant 0 : i32
    return %c0_i32, %c0_i32_0 : i32, i32
  }
  func.func @transform_19(%arg0: i32) -> (i32, i32) {
    %c0_i32 = arith.constant 0 : i32
    %c0_i32_0 = arith.constant 0 : i32
    %c0_i32_1 = arith.constant 0 : i32
    return %c0_i32, %c0_i32_0 : i32, i32
  }
  func.func @transform_20(%arg0: i32) -> (i32, i32) {
    %c0_i32 = arith.constant 0 : i32
    %c0_i32_0 = arith.constant 0 : i32
    %c0_i32_1 = arith.constant 0 : i32
    return %c0_i32, %c0_i32_0 : i32, i32
  }
  func.func @transform_21(%arg0: i32) -> (i32, i32) {
    %c0_i32 = arith.constant 0 : i32
    %c0_i32_0 = arith.constant 0 : i32
    %c0_i32_1 = arith.constant 0 : i32
    return %c0_i32, %c0_i32_0 : i32, i32
  }
  func.func @transform_22(%arg0: i32) -> (i32, i32) {
    %c0_i32 = arith.constant 0 : i32
    %c0_i32_0 = arith.constant 0 : i32
    %c0_i32_1 = arith.constant 0 : i32
    return %c0_i32, %c0_i32_0 : i32, i32
  }
  func.func @transform_23(%arg0: i32) -> (i32, i32) {
    %c0_i32 = arith.constant 0 : i32
    %c0_i32_0 = arith.constant 0 : i32
    %c0_i32_1 = arith.constant 0 : i32
    return %c0_i32, %c0_i32_0 : i32, i32
  }
  func.func @transform_24(%arg0: i32) -> (i32, i32) {
    %c0_i32 = arith.constant 0 : i32
    %c0_i32_0 = arith.constant 0 : i32
    %c0_i32_1 = arith.constant 0 : i32
    return %c0_i32, %c0_i32_0 : i32, i32
  }
  func.func @transform_25(%arg0: i32) -> (i32, i32) {
    %c0_i32 = arith.constant 0 : i32
    %c0_i32_0 = arith.constant 0 : i32
    %c0_i32_1 = arith.constant 0 : i32
    return %c0_i32, %c0_i32_0 : i32, i32
  }
  func.func @transform_26(%arg0: i32) -> (i32, i32, i32) {
    %c0_i32 = arith.constant 0 : i32
    %c0_i32_0 = arith.constant 0 : i32
    %c0_i32_1 = arith.constant 0 : i32
    return %arg0, %c0_i32, %c0_i32_0 : i32, i32, i32
  }
}

module attributes {stable_mosaic.version = 11 : i64} {
  func.func @_decoder_layer_kernel(%arg0: i32, %arg1: memref<1x8x128xf32, #tpu.memory_space<vmem>>, %arg2: memref<1x8x128xf32, #tpu.memory_space<vmem>>, %arg3: memref<1x8x8xf32, #tpu.memory_space<vmem>>, %arg4: memref<1x8x8xf32, #tpu.memory_space<vmem>>, %arg5: memref<1x128xf32, #tpu.memory_space<vmem>>, %arg6: memref<1x128xf32, #tpu.memory_space<vmem>>, %arg7: memref<128x384xbf16, #tpu.memory_space<vmem>>, %arg8: memref<1x384xf32, #tpu.memory_space<vmem>>, %arg9: memref<128x128xbf16, #tpu.memory_space<vmem>>, %arg10: memref<1x128xf32, #tpu.memory_space<vmem>>, %arg11: memref<1x128xf32, #tpu.memory_space<vmem>>, %arg12: memref<1x128xf32, #tpu.memory_space<vmem>>, %arg13: memref<128x128xbf16, #tpu.memory_space<vmem>>, %arg14: memref<1x128xf32, #tpu.memory_space<vmem>>, %arg15: memref<128x256xbf16, #tpu.memory_space<vmem>>, %arg16: memref<1x256xf32, #tpu.memory_space<vmem>>, %arg17: memref<128x128xbf16, #tpu.memory_space<vmem>>, %arg18: memref<1x128xf32, #tpu.memory_space<vmem>>, %arg19: memref<1x128xf32, #tpu.memory_space<vmem>>, %arg20: memref<1x128xf32, #tpu.memory_space<vmem>>, %arg21: memref<128x256xbf16, #tpu.memory_space<vmem>>, %arg22: memref<1x256xf32, #tpu.memory_space<vmem>>, %arg23: memref<256x128xbf16, #tpu.memory_space<vmem>>, %arg24: memref<1x128xf32, #tpu.memory_space<vmem>>, %arg25: memref<1x128xf32, #tpu.memory_space<vmem>>, %arg26: memref<1x128xf32, #tpu.memory_space<vmem>>, %arg27: memref<1x8x128xf32, #tpu.memory_space<vmem>>) attributes {dimension_semantics = [#tpu.dimension_semantics<parallel>], iteration_bounds = array<i64: 2>, scalar_prefetch = 0 : i64, scratch_operands = 0 : i64, tpu.core_type = #tpu.core_type<tc>, window_params = [{transform_indices = @transform_0, window_bounds = array<i64: 1, 8, 128>}, {transform_indices = @transform_1, window_bounds = array<i64: 1, 8, 128>}, {transform_indices = @transform_2, window_bounds = array<i64: 1, 8, 8>}, {transform_indices = @transform_3, window_bounds = array<i64: 1, 8, 8>}, {pipeline_mode = #tpu.pipeline_mode<synchronous>, transform_indices = @transform_4, window_bounds = array<i64: 1, 128>}, {pipeline_mode = #tpu.pipeline_mode<synchronous>, transform_indices = @transform_5, window_bounds = array<i64: 1, 128>}, {pipeline_mode = #tpu.pipeline_mode<synchronous>, transform_indices = @transform_6, window_bounds = array<i64: 128, 384>}, {pipeline_mode = #tpu.pipeline_mode<synchronous>, transform_indices = @transform_7, window_bounds = array<i64: 1, 384>}, {pipeline_mode = #tpu.pipeline_mode<synchronous>, transform_indices = @transform_8, window_bounds = array<i64: 128, 128>}, {pipeline_mode = #tpu.pipeline_mode<synchronous>, transform_indices = @transform_9, window_bounds = array<i64: 1, 128>}, {pipeline_mode = #tpu.pipeline_mode<synchronous>, transform_indices = @transform_10, window_bounds = array<i64: 1, 128>}, {pipeline_mode = #tpu.pipeline_mode<synchronous>, transform_indices = @transform_11, window_bounds = array<i64: 1, 128>}, {pipeline_mode = #tpu.pipeline_mode<synchronous>, transform_indices = @transform_12, window_bounds = array<i64: 128, 128>}, {pipeline_mode = #tpu.pipeline_mode<synchronous>, transform_indices = @transform_13, window_bounds = array<i64: 1, 128>}, {pipeline_mode = #tpu.pipeline_mode<synchronous>, transform_indices = @transform_14, window_bounds = array<i64: 128, 256>}, {pipeline_mode = #tpu.pipeline_mode<synchronous>, transform_indices = @transform_15, window_bounds = array<i64: 1, 256>}, {pipeline_mode = #tpu.pipeline_mode<synchronous>, transform_indices = @transform_16, window_bounds = array<i64: 128, 128>}, {pipeline_mode = #tpu.pipeline_mode<synchronous>, transform_indices = @transform_17, window_bounds = array<i64: 1, 128>}, {pipeline_mode = #tpu.pipeline_mode<synchronous>, transform_indices = @transform_18, window_bounds = array<i64: 1, 128>}, {pipeline_mode = #tpu.pipeline_mode<synchronous>, transform_indices = @transform_19, window_bounds = array<i64: 1, 128>}, {pipeline_mode = #tpu.pipeline_mode<synchronous>, transform_indices = @transform_20, window_bounds = array<i64: 128, 256>}, {pipeline_mode = #tpu.pipeline_mode<synchronous>, transform_indices = @transform_21, window_bounds = array<i64: 1, 256>}, {pipeline_mode = #tpu.pipeline_mode<synchronous>, transform_indices = @transform_22, window_bounds = array<i64: 256, 128>}, {pipeline_mode = #tpu.pipeline_mode<synchronous>, transform_indices = @transform_23, window_bounds = array<i64: 1, 128>}, {pipeline_mode = #tpu.pipeline_mode<synchronous>, transform_indices = @transform_24, window_bounds = array<i64: 1, 128>}, {pipeline_mode = #tpu.pipeline_mode<synchronous>, transform_indices = @transform_25, window_bounds = array<i64: 1, 128>}, {transform_indices = @transform_26, window_bounds = array<i64: 1, 8, 128>}]} {
    %c0 = arith.constant 0 : index
    %c0_0 = arith.constant 0 : index
    %c0_1 = arith.constant 0 : index
    %0 = vector.load %arg1[%c0, %c0_0, %c0_1] : memref<1x8x128xf32, #tpu.memory_space<vmem>>, vector<1x8x128xf32>
    %1 = vector.shape_cast %0 : vector<1x8x128xf32> to vector<8x128xf32>
    %c0_2 = arith.constant 0 : index
    %c0_3 = arith.constant 0 : index
    %c0_4 = arith.constant 0 : index
    %2 = vector.load %arg2[%c0_2, %c0_3, %c0_4] : memref<1x8x128xf32, #tpu.memory_space<vmem>>, vector<1x8x128xf32>
    %3 = vector.shape_cast %2 : vector<1x8x128xf32> to vector<8x128xf32>
    %4 = arith.truncf %3 : vector<8x128xf32> to vector<8x128xbf16>
    %c0_5 = arith.constant 0 : index
    %c0_6 = arith.constant 0 : index
    %c0_7 = arith.constant 0 : index
    %5 = vector.load %arg3[%c0_5, %c0_6, %c0_7] : memref<1x8x8xf32, #tpu.memory_space<vmem>>, vector<1x8x8xf32>
    %6 = vector.shape_cast %5 : vector<1x8x8xf32> to vector<8x8xf32>
    %cst = arith.constant 0.000000e+00 : f32
    %7 = vector.broadcast %cst : f32 to vector<8x8xf32>
    %8 = arith.cmpf one, %6, %7 : vector<8x8xf32>
    %cst_8 = arith.constant 0.000000e+00 : f32
    %cst_9 = arith.constant -1.000000e+09 : f32
    %9 = vector.broadcast %cst_8 : f32 to vector<8x8xf32>
    %10 = vector.broadcast %cst_9 : f32 to vector<8x8xf32>
    %11 = arith.select %8, %9, %10 : vector<8x8xi1>, vector<8x8xf32>
    %c0_10 = arith.constant 0 : index
    %c0_11 = arith.constant 0 : index
    %c0_12 = arith.constant 0 : index
    %12 = vector.load %arg4[%c0_10, %c0_11, %c0_12] : memref<1x8x8xf32, #tpu.memory_space<vmem>>, vector<1x8x8xf32>
    %13 = vector.shape_cast %12 : vector<1x8x8xf32> to vector<8x8xf32>
    %cst_13 = arith.constant 0.000000e+00 : f32
    %14 = vector.broadcast %cst_13 : f32 to vector<8x8xf32>
    %15 = arith.cmpf one, %13, %14 : vector<8x8xf32>
    %cst_14 = arith.constant 0.000000e+00 : f32
    %cst_15 = arith.constant -1.000000e+09 : f32
    %16 = vector.broadcast %cst_14 : f32 to vector<8x8xf32>
    %17 = vector.broadcast %cst_15 : f32 to vector<8x8xf32>
    %18 = arith.select %15, %16, %17 : vector<8x8xi1>, vector<8x8xf32>
    %c0_16 = arith.constant 0 : index
    %c0_17 = arith.constant 0 : index
    %19 = vector.load %arg5[%c0_16, %c0_17] : memref<1x128xf32, #tpu.memory_space<vmem>>, vector<1x128xf32>
    %c0_18 = arith.constant 0 : index
    %c0_19 = arith.constant 0 : index
    %20 = vector.load %arg6[%c0_18, %c0_19] : memref<1x128xf32, #tpu.memory_space<vmem>>, vector<1x128xf32>
    %cst_20 = arith.constant dense<0.000000e+00> : vector<8xf32>
    %21 = vector.multi_reduction <add>, %1, %cst_20 [1] : vector<8x128xf32> to vector<8xf32>
    %22 = vector.shape_cast %21 : vector<8xf32> to vector<8x1xf32>
    %cst_21 = arith.constant 1.280000e+02 : f32
    %23 = vector.broadcast %cst_21 : f32 to vector<8x1xf32>
    %24 = arith.divf %22, %23 : vector<8x1xf32>
    %25 = vector.broadcast %24 : vector<8x1xf32> to vector<8x128xf32>
    %26 = arith.subf %1, %25 : vector<8x128xf32>
    %27 = arith.mulf %26, %26 : vector<8x128xf32>
    %cst_22 = arith.constant dense<0.000000e+00> : vector<8xf32>
    %28 = vector.multi_reduction <add>, %27, %cst_22 [1] : vector<8x128xf32> to vector<8xf32>
    %29 = vector.shape_cast %28 : vector<8xf32> to vector<8x1xf32>
    %cst_23 = arith.constant 0.00787401571 : f32
    %30 = vector.broadcast %cst_23 : f32 to vector<8x1xf32>
    %31 = arith.mulf %29, %30 : vector<8x1xf32>
    %32 = math.sqrt %31 : vector<8x1xf32>
    %cst_24 = arith.constant 9.99999997E-7 : f32
    %33 = vector.broadcast %cst_24 : f32 to vector<8x1xf32>
    %34 = arith.addf %32, %33 : vector<8x1xf32>
    %35 = vector.broadcast %34 : vector<8x1xf32> to vector<8x128xf32>
    %36 = arith.divf %26, %35 : vector<8x128xf32>
    %37 = vector.broadcast %19 : vector<1x128xf32> to vector<8x128xf32>
    %38 = arith.mulf %36, %37 : vector<8x128xf32>
    %39 = vector.broadcast %20 : vector<1x128xf32> to vector<8x128xf32>
    %40 = arith.addf %38, %39 : vector<8x128xf32>
    %41 = arith.truncf %40 : vector<8x128xf32> to vector<8x128xbf16>
    %c0_25 = arith.constant 0 : index
    %c0_26 = arith.constant 0 : index
    %42 = vector.load %arg7[%c0_25, %c0_26] : memref<128x384xbf16, #tpu.memory_space<vmem>>, vector<128x384xbf16>
    %cst_27 = arith.constant dense<0.000000e+00> : vector<8x384xf32>
    %43 = tpu.matmul %41, %42, %cst_27 {dimension_numbers = #tpu.dot_dimension_numbers<[1], [0], [0], [1], [0, 0, 1, 1], [], []>} : vector<8x128xbf16>, vector<128x384xbf16>, vector<8x384xf32> -> vector<8x384xf32>
    %c0_28 = arith.constant 0 : index
    %c0_29 = arith.constant 0 : index
    %44 = vector.load %arg8[%c0_28, %c0_29] : memref<1x384xf32, #tpu.memory_space<vmem>>, vector<1x384xf32>
    %45 = vector.broadcast %44 : vector<1x384xf32> to vector<8x384xf32>
    %46 = arith.addf %43, %45 : vector<8x384xf32>
    %47 = vector.extract_strided_slice %46 {offsets = [0, 0], sizes = [8, 128], strides = [1, 1]} : vector<8x384xf32> to vector<8x128xf32>
    %48 = vector.extract_strided_slice %46 {offsets = [0, 128], sizes = [8, 128], strides = [1, 1]} : vector<8x384xf32> to vector<8x128xf32>
    %49 = vector.extract_strided_slice %46 {offsets = [0, 256], sizes = [8, 128], strides = [1, 1]} : vector<8x384xf32> to vector<8x128xf32>
    %c0_30 = arith.constant 0 : index
    %c0_31 = arith.constant 0 : index
    %50 = vector.load %arg9[%c0_30, %c0_31] : memref<128x128xbf16, #tpu.memory_space<vmem>>, vector<128x128xbf16>
    %c0_32 = arith.constant 0 : index
    %c0_33 = arith.constant 0 : index
    %51 = vector.load %arg10[%c0_32, %c0_33] : memref<1x128xf32, #tpu.memory_space<vmem>>, vector<1x128xf32>
    %52 = vector.shape_cast %47 : vector<8x128xf32> to vector<8x4x32xf32>
    %53 = tpu.transpose %52, [1, 0, 2] : vector<8x4x32xf32> -> vector<4x8x32xf32>
    %54 = arith.truncf %53 : vector<4x8x32xf32> to vector<4x8x32xbf16>
    %55 = vector.shape_cast %48 : vector<8x128xf32> to vector<8x4x32xf32>
    %56 = tpu.transpose %55, [1, 0, 2] : vector<8x4x32xf32> -> vector<4x8x32xf32>
    %57 = arith.truncf %56 : vector<4x8x32xf32> to vector<4x8x32xbf16>
    %58 = vector.shape_cast %49 : vector<8x128xf32> to vector<8x4x32xf32>
    %59 = tpu.transpose %58, [1, 0, 2] : vector<8x4x32xf32> -> vector<4x8x32xf32>
    %60 = arith.truncf %59 : vector<4x8x32xf32> to vector<4x8x32xbf16>
    "tpu.trace_start"() <{level = 10 : i32, message = "hqd,hkd->hqk"}> : () -> ()
    %cst_34 = arith.constant dense<0.000000e+00> : vector<4x8x8xf32>
    %61 = tpu.matmul %54, %57, %cst_34 {dimension_numbers = #tpu.dot_dimension_numbers<[2], [2], [1], [1], [0, 0, 0, 1, 1, 1], [0], [0]>} : vector<4x8x32xbf16>, vector<4x8x32xbf16>, vector<4x8x8xf32> -> vector<4x8x8xf32>
    "tpu.trace_stop"() : () -> ()
    %cst_35 = arith.constant 0.176776692 : f32
    %62 = vector.broadcast %cst_35 : f32 to vector<4x8x8xf32>
    %63 = arith.mulf %61, %62 : vector<4x8x8xf32>
    %64 = vector.shape_cast %11 : vector<8x8xf32> to vector<1x8x8xf32>
    %65 = vector.broadcast %64 : vector<1x8x8xf32> to vector<4x8x8xf32>
    %66 = arith.addf %63, %65 : vector<4x8x8xf32>
    %cst_36 = arith.constant dense<0xFF800000> : vector<4x8xf32>
    %67 = vector.multi_reduction <maximumf>, %66, %cst_36 [2] : vector<4x8x8xf32> to vector<4x8xf32>
    %68 = vector.shape_cast %67 : vector<4x8xf32> to vector<4x8x1xf32>
    %69 = vector.broadcast %68 : vector<4x8x1xf32> to vector<4x8x8xf32>
    %70 = arith.subf %66, %69 : vector<4x8x8xf32>
    %71 = math.exp %70 : vector<4x8x8xf32>
    %cst_37 = arith.constant dense<0.000000e+00> : vector<4x8xf32>
    %72 = vector.multi_reduction <add>, %71, %cst_37 [2] : vector<4x8x8xf32> to vector<4x8xf32>
    %73 = vector.shape_cast %72 : vector<4x8xf32> to vector<4x8x1xf32>
    %74 = tpu.reciprocal %73 {approx = true} : vector<4x8x1xf32> -> vector<4x8x1xf32>
    %75 = vector.broadcast %74 : vector<4x8x1xf32> to vector<4x8x8xf32>
    %76 = arith.mulf %71, %75 : vector<4x8x8xf32>
    %77 = arith.truncf %76 : vector<4x8x8xf32> to vector<4x8x8xbf16>
    "tpu.trace_start"() <{level = 10 : i32, message = "hqk,hkd->hqd"}> : () -> ()
    %cst_38 = arith.constant dense<0.000000e+00> : vector<4x8x32xf32>
    %78 = tpu.matmul %77, %60, %cst_38 {dimension_numbers = #tpu.dot_dimension_numbers<[2], [1], [1], [2], [0, 0, 0, 1, 1, 2], [0], [0]>} : vector<4x8x8xbf16>, vector<4x8x32xbf16>, vector<4x8x32xf32> -> vector<4x8x32xf32>
    "tpu.trace_stop"() : () -> ()
    %79 = tpu.transpose %78, [1, 0, 2] : vector<4x8x32xf32> -> vector<8x4x32xf32>
    %80 = vector.shape_cast %79 : vector<8x4x32xf32> to vector<8x128xf32>
    %81 = arith.truncf %80 : vector<8x128xf32> to vector<8x128xbf16>
    %cst_39 = arith.constant dense<0.000000e+00> : vector<8x128xf32>
    %82 = tpu.matmul %81, %50, %cst_39 {dimension_numbers = #tpu.dot_dimension_numbers<[1], [0], [0], [1], [0, 0, 1, 1], [], []>} : vector<8x128xbf16>, vector<128x128xbf16>, vector<8x128xf32> -> vector<8x128xf32>
    %83 = vector.broadcast %51 : vector<1x128xf32> to vector<8x128xf32>
    %84 = arith.addf %82, %83 : vector<8x128xf32>
    %85 = arith.addf %1, %84 : vector<8x128xf32>
    %c0_40 = arith.constant 0 : index
    %c0_41 = arith.constant 0 : index
    %86 = vector.load %arg11[%c0_40, %c0_41] : memref<1x128xf32, #tpu.memory_space<vmem>>, vector<1x128xf32>
    %c0_42 = arith.constant 0 : index
    %c0_43 = arith.constant 0 : index
    %87 = vector.load %arg12[%c0_42, %c0_43] : memref<1x128xf32, #tpu.memory_space<vmem>>, vector<1x128xf32>
    %cst_44 = arith.constant dense<0.000000e+00> : vector<8xf32>
    %88 = vector.multi_reduction <add>, %85, %cst_44 [1] : vector<8x128xf32> to vector<8xf32>
    %89 = vector.shape_cast %88 : vector<8xf32> to vector<8x1xf32>
    %cst_45 = arith.constant 1.280000e+02 : f32
    %90 = vector.broadcast %cst_45 : f32 to vector<8x1xf32>
    %91 = arith.divf %89, %90 : vector<8x1xf32>
    %92 = vector.broadcast %91 : vector<8x1xf32> to vector<8x128xf32>
    %93 = arith.subf %85, %92 : vector<8x128xf32>
    %94 = arith.mulf %93, %93 : vector<8x128xf32>
    %cst_46 = arith.constant dense<0.000000e+00> : vector<8xf32>
    %95 = vector.multi_reduction <add>, %94, %cst_46 [1] : vector<8x128xf32> to vector<8xf32>
    %96 = vector.shape_cast %95 : vector<8xf32> to vector<8x1xf32>
    %cst_47 = arith.constant 0.00787401571 : f32
    %97 = vector.broadcast %cst_47 : f32 to vector<8x1xf32>
    %98 = arith.mulf %96, %97 : vector<8x1xf32>
    %99 = math.sqrt %98 : vector<8x1xf32>
    %cst_48 = arith.constant 9.99999997E-7 : f32
    %100 = vector.broadcast %cst_48 : f32 to vector<8x1xf32>
    %101 = arith.addf %99, %100 : vector<8x1xf32>
    %102 = vector.broadcast %101 : vector<8x1xf32> to vector<8x128xf32>
    %103 = arith.divf %93, %102 : vector<8x128xf32>
    %104 = vector.broadcast %86 : vector<1x128xf32> to vector<8x128xf32>
    %105 = arith.mulf %103, %104 : vector<8x128xf32>
    %106 = vector.broadcast %87 : vector<1x128xf32> to vector<8x128xf32>
    %107 = arith.addf %105, %106 : vector<8x128xf32>
    %108 = arith.truncf %107 : vector<8x128xf32> to vector<8x128xbf16>
    %c0_49 = arith.constant 0 : index
    %c0_50 = arith.constant 0 : index
    %109 = vector.load %arg13[%c0_49, %c0_50] : memref<128x128xbf16, #tpu.memory_space<vmem>>, vector<128x128xbf16>
    %cst_51 = arith.constant dense<0.000000e+00> : vector<8x128xf32>
    %110 = tpu.matmul %108, %109, %cst_51 {dimension_numbers = #tpu.dot_dimension_numbers<[1], [0], [0], [1], [0, 0, 1, 1], [], []>} : vector<8x128xbf16>, vector<128x128xbf16>, vector<8x128xf32> -> vector<8x128xf32>
    %c0_52 = arith.constant 0 : index
    %c0_53 = arith.constant 0 : index
    %111 = vector.load %arg14[%c0_52, %c0_53] : memref<1x128xf32, #tpu.memory_space<vmem>>, vector<1x128xf32>
    %112 = vector.broadcast %111 : vector<1x128xf32> to vector<8x128xf32>
    %113 = arith.addf %110, %112 : vector<8x128xf32>
    %c0_54 = arith.constant 0 : index
    %c0_55 = arith.constant 0 : index
    %114 = vector.load %arg15[%c0_54, %c0_55] : memref<128x256xbf16, #tpu.memory_space<vmem>>, vector<128x256xbf16>
    %cst_56 = arith.constant dense<0.000000e+00> : vector<8x256xf32>
    %115 = tpu.matmul %4, %114, %cst_56 {dimension_numbers = #tpu.dot_dimension_numbers<[1], [0], [0], [1], [0, 0, 1, 1], [], []>} : vector<8x128xbf16>, vector<128x256xbf16>, vector<8x256xf32> -> vector<8x256xf32>
    %c0_57 = arith.constant 0 : index
    %c0_58 = arith.constant 0 : index
    %116 = vector.load %arg16[%c0_57, %c0_58] : memref<1x256xf32, #tpu.memory_space<vmem>>, vector<1x256xf32>
    %117 = vector.broadcast %116 : vector<1x256xf32> to vector<8x256xf32>
    %118 = arith.addf %115, %117 : vector<8x256xf32>
    %119 = vector.extract_strided_slice %118 {offsets = [0, 0], sizes = [8, 128], strides = [1, 1]} : vector<8x256xf32> to vector<8x128xf32>
    %120 = vector.extract_strided_slice %118 {offsets = [0, 128], sizes = [8, 128], strides = [1, 1]} : vector<8x256xf32> to vector<8x128xf32>
    %c0_59 = arith.constant 0 : index
    %c0_60 = arith.constant 0 : index
    %121 = vector.load %arg17[%c0_59, %c0_60] : memref<128x128xbf16, #tpu.memory_space<vmem>>, vector<128x128xbf16>
    %c0_61 = arith.constant 0 : index
    %c0_62 = arith.constant 0 : index
    %122 = vector.load %arg18[%c0_61, %c0_62] : memref<1x128xf32, #tpu.memory_space<vmem>>, vector<1x128xf32>
    %123 = vector.shape_cast %113 : vector<8x128xf32> to vector<8x4x32xf32>
    %124 = tpu.transpose %123, [1, 0, 2] : vector<8x4x32xf32> -> vector<4x8x32xf32>
    %125 = arith.truncf %124 : vector<4x8x32xf32> to vector<4x8x32xbf16>
    %126 = vector.shape_cast %119 : vector<8x128xf32> to vector<8x4x32xf32>
    %127 = tpu.transpose %126, [1, 0, 2] : vector<8x4x32xf32> -> vector<4x8x32xf32>
    %128 = arith.truncf %127 : vector<4x8x32xf32> to vector<4x8x32xbf16>
    %129 = vector.shape_cast %120 : vector<8x128xf32> to vector<8x4x32xf32>
    %130 = tpu.transpose %129, [1, 0, 2] : vector<8x4x32xf32> -> vector<4x8x32xf32>
    %131 = arith.truncf %130 : vector<4x8x32xf32> to vector<4x8x32xbf16>
    "tpu.trace_start"() <{level = 10 : i32, message = "hqd,hkd->hqk"}> : () -> ()
    %cst_63 = arith.constant dense<0.000000e+00> : vector<4x8x8xf32>
    %132 = tpu.matmul %125, %128, %cst_63 {dimension_numbers = #tpu.dot_dimension_numbers<[2], [2], [1], [1], [0, 0, 0, 1, 1, 1], [0], [0]>} : vector<4x8x32xbf16>, vector<4x8x32xbf16>, vector<4x8x8xf32> -> vector<4x8x8xf32>
    "tpu.trace_stop"() : () -> ()
    %cst_64 = arith.constant 0.176776692 : f32
    %133 = vector.broadcast %cst_64 : f32 to vector<4x8x8xf32>
    %134 = arith.mulf %132, %133 : vector<4x8x8xf32>
    %135 = vector.shape_cast %18 : vector<8x8xf32> to vector<1x8x8xf32>
    %136 = vector.broadcast %135 : vector<1x8x8xf32> to vector<4x8x8xf32>
    %137 = arith.addf %134, %136 : vector<4x8x8xf32>
    %cst_65 = arith.constant dense<0xFF800000> : vector<4x8xf32>
    %138 = vector.multi_reduction <maximumf>, %137, %cst_65 [2] : vector<4x8x8xf32> to vector<4x8xf32>
    %139 = vector.shape_cast %138 : vector<4x8xf32> to vector<4x8x1xf32>
    %140 = vector.broadcast %139 : vector<4x8x1xf32> to vector<4x8x8xf32>
    %141 = arith.subf %137, %140 : vector<4x8x8xf32>
    %142 = math.exp %141 : vector<4x8x8xf32>
    %cst_66 = arith.constant dense<0.000000e+00> : vector<4x8xf32>
    %143 = vector.multi_reduction <add>, %142, %cst_66 [2] : vector<4x8x8xf32> to vector<4x8xf32>
    %144 = vector.shape_cast %143 : vector<4x8xf32> to vector<4x8x1xf32>
    %145 = tpu.reciprocal %144 {approx = true} : vector<4x8x1xf32> -> vector<4x8x1xf32>
    %146 = vector.broadcast %145 : vector<4x8x1xf32> to vector<4x8x8xf32>
    %147 = arith.mulf %142, %146 : vector<4x8x8xf32>
    %148 = arith.truncf %147 : vector<4x8x8xf32> to vector<4x8x8xbf16>
    "tpu.trace_start"() <{level = 10 : i32, message = "hqk,hkd->hqd"}> : () -> ()
    %cst_67 = arith.constant dense<0.000000e+00> : vector<4x8x32xf32>
    %149 = tpu.matmul %148, %131, %cst_67 {dimension_numbers = #tpu.dot_dimension_numbers<[2], [1], [1], [2], [0, 0, 0, 1, 1, 2], [0], [0]>} : vector<4x8x8xbf16>, vector<4x8x32xbf16>, vector<4x8x32xf32> -> vector<4x8x32xf32>
    "tpu.trace_stop"() : () -> ()
    %150 = tpu.transpose %149, [1, 0, 2] : vector<4x8x32xf32> -> vector<8x4x32xf32>
    %151 = vector.shape_cast %150 : vector<8x4x32xf32> to vector<8x128xf32>
    %152 = arith.truncf %151 : vector<8x128xf32> to vector<8x128xbf16>
    %cst_68 = arith.constant dense<0.000000e+00> : vector<8x128xf32>
    %153 = tpu.matmul %152, %121, %cst_68 {dimension_numbers = #tpu.dot_dimension_numbers<[1], [0], [0], [1], [0, 0, 1, 1], [], []>} : vector<8x128xbf16>, vector<128x128xbf16>, vector<8x128xf32> -> vector<8x128xf32>
    %154 = vector.broadcast %122 : vector<1x128xf32> to vector<8x128xf32>
    %155 = arith.addf %153, %154 : vector<8x128xf32>
    %156 = arith.addf %85, %155 : vector<8x128xf32>
    %c0_69 = arith.constant 0 : index
    %c0_70 = arith.constant 0 : index
    %157 = vector.load %arg19[%c0_69, %c0_70] : memref<1x128xf32, #tpu.memory_space<vmem>>, vector<1x128xf32>
    %c0_71 = arith.constant 0 : index
    %c0_72 = arith.constant 0 : index
    %158 = vector.load %arg20[%c0_71, %c0_72] : memref<1x128xf32, #tpu.memory_space<vmem>>, vector<1x128xf32>
    %cst_73 = arith.constant dense<0.000000e+00> : vector<8xf32>
    %159 = vector.multi_reduction <add>, %156, %cst_73 [1] : vector<8x128xf32> to vector<8xf32>
    %160 = vector.shape_cast %159 : vector<8xf32> to vector<8x1xf32>
    %cst_74 = arith.constant 1.280000e+02 : f32
    %161 = vector.broadcast %cst_74 : f32 to vector<8x1xf32>
    %162 = arith.divf %160, %161 : vector<8x1xf32>
    %163 = vector.broadcast %162 : vector<8x1xf32> to vector<8x128xf32>
    %164 = arith.subf %156, %163 : vector<8x128xf32>
    %165 = arith.mulf %164, %164 : vector<8x128xf32>
    %cst_75 = arith.constant dense<0.000000e+00> : vector<8xf32>
    %166 = vector.multi_reduction <add>, %165, %cst_75 [1] : vector<8x128xf32> to vector<8xf32>
    %167 = vector.shape_cast %166 : vector<8xf32> to vector<8x1xf32>
    %cst_76 = arith.constant 0.00787401571 : f32
    %168 = vector.broadcast %cst_76 : f32 to vector<8x1xf32>
    %169 = arith.mulf %167, %168 : vector<8x1xf32>
    %170 = math.sqrt %169 : vector<8x1xf32>
    %cst_77 = arith.constant 9.99999997E-7 : f32
    %171 = vector.broadcast %cst_77 : f32 to vector<8x1xf32>
    %172 = arith.addf %170, %171 : vector<8x1xf32>
    %173 = vector.broadcast %172 : vector<8x1xf32> to vector<8x128xf32>
    %174 = arith.divf %164, %173 : vector<8x128xf32>
    %175 = vector.broadcast %157 : vector<1x128xf32> to vector<8x128xf32>
    %176 = arith.mulf %174, %175 : vector<8x128xf32>
    %177 = vector.broadcast %158 : vector<1x128xf32> to vector<8x128xf32>
    %178 = arith.addf %176, %177 : vector<8x128xf32>
    %179 = arith.truncf %178 : vector<8x128xf32> to vector<8x128xbf16>
    %c0_78 = arith.constant 0 : index
    %c0_79 = arith.constant 0 : index
    %180 = vector.load %arg21[%c0_78, %c0_79] : memref<128x256xbf16, #tpu.memory_space<vmem>>, vector<128x256xbf16>
    %cst_80 = arith.constant dense<0.000000e+00> : vector<8x256xf32>
    %181 = tpu.matmul %179, %180, %cst_80 {dimension_numbers = #tpu.dot_dimension_numbers<[1], [0], [0], [1], [0, 0, 1, 1], [], []>} : vector<8x128xbf16>, vector<128x256xbf16>, vector<8x256xf32> -> vector<8x256xf32>
    %c0_81 = arith.constant 0 : index
    %c0_82 = arith.constant 0 : index
    %182 = vector.load %arg22[%c0_81, %c0_82] : memref<1x256xf32, #tpu.memory_space<vmem>>, vector<1x256xf32>
    %183 = vector.broadcast %182 : vector<1x256xf32> to vector<8x256xf32>
    %184 = arith.addf %181, %183 : vector<8x256xf32>
    %cst_83 = arith.constant 0.000000e+00 : f32
    %185 = vector.broadcast %cst_83 : f32 to vector<8x256xf32>
    %186 = arith.maximumf %184, %185 : vector<8x256xf32>
    %187 = arith.truncf %186 : vector<8x256xf32> to vector<8x256xbf16>
    %c0_84 = arith.constant 0 : index
    %c0_85 = arith.constant 0 : index
    %188 = vector.load %arg23[%c0_84, %c0_85] : memref<256x128xbf16, #tpu.memory_space<vmem>>, vector<256x128xbf16>
    %cst_86 = arith.constant dense<0.000000e+00> : vector<8x128xf32>
    %189 = tpu.matmul %187, %188, %cst_86 {dimension_numbers = #tpu.dot_dimension_numbers<[1], [0], [0], [1], [0, 0, 1, 1], [], []>} : vector<8x256xbf16>, vector<256x128xbf16>, vector<8x128xf32> -> vector<8x128xf32>
    %190 = arith.addf %156, %189 : vector<8x128xf32>
    %c0_87 = arith.constant 0 : index
    %c0_88 = arith.constant 0 : index
    %191 = vector.load %arg24[%c0_87, %c0_88] : memref<1x128xf32, #tpu.memory_space<vmem>>, vector<1x128xf32>
    %192 = vector.broadcast %191 : vector<1x128xf32> to vector<8x128xf32>
    %193 = arith.addf %190, %192 : vector<8x128xf32>
    %c0_89 = arith.constant 0 : index
    %c0_90 = arith.constant 0 : index
    %194 = vector.load %arg25[%c0_89, %c0_90] : memref<1x128xf32, #tpu.memory_space<vmem>>, vector<1x128xf32>
    %c0_91 = arith.constant 0 : index
    %c0_92 = arith.constant 0 : index
    %195 = vector.load %arg26[%c0_91, %c0_92] : memref<1x128xf32, #tpu.memory_space<vmem>>, vector<1x128xf32>
    %cst_93 = arith.constant dense<0.000000e+00> : vector<8xf32>
    %196 = vector.multi_reduction <add>, %193, %cst_93 [1] : vector<8x128xf32> to vector<8xf32>
    %197 = vector.shape_cast %196 : vector<8xf32> to vector<8x1xf32>
    %cst_94 = arith.constant 1.280000e+02 : f32
    %198 = vector.broadcast %cst_94 : f32 to vector<8x1xf32>
    %199 = arith.divf %197, %198 : vector<8x1xf32>
    %200 = vector.broadcast %199 : vector<8x1xf32> to vector<8x128xf32>
    %201 = arith.subf %193, %200 : vector<8x128xf32>
    %202 = arith.mulf %201, %201 : vector<8x128xf32>
    %cst_95 = arith.constant dense<0.000000e+00> : vector<8xf32>
    %203 = vector.multi_reduction <add>, %202, %cst_95 [1] : vector<8x128xf32> to vector<8xf32>
    %204 = vector.shape_cast %203 : vector<8xf32> to vector<8x1xf32>
    %cst_96 = arith.constant 0.00787401571 : f32
    %205 = vector.broadcast %cst_96 : f32 to vector<8x1xf32>
    %206 = arith.mulf %204, %205 : vector<8x1xf32>
    %207 = math.sqrt %206 : vector<8x1xf32>
    %cst_97 = arith.constant 9.99999997E-7 : f32
    %208 = vector.broadcast %cst_97 : f32 to vector<8x1xf32>
    %209 = arith.addf %207, %208 : vector<8x1xf32>
    %210 = vector.broadcast %209 : vector<8x1xf32> to vector<8x128xf32>
    %211 = arith.divf %201, %210 : vector<8x128xf32>
    %212 = vector.broadcast %194 : vector<1x128xf32> to vector<8x128xf32>
    %213 = arith.mulf %211, %212 : vector<8x128xf32>
    %214 = vector.broadcast %195 : vector<1x128xf32> to vector<8x128xf32>
    %215 = arith.addf %213, %214 : vector<8x128xf32>
    %c0_98 = arith.constant 0 : index
    %c0_99 = arith.constant 0 : index
    %c0_100 = arith.constant 0 : index
    %216 = vector.load %arg27[%c0_98, %c0_99, %c0_100] : memref<1x8x128xf32, #tpu.memory_space<vmem>>, vector<1x8x128xf32>
    %217 = vector.shape_cast %216 : vector<1x8x128xf32> to vector<8x128xf32>
    %218 = vector.shape_cast %215 : vector<8x128xf32> to vector<1x8x128xf32>
    tpu.vector_store %arg27[%c0_98, %c0_99, %c0_100], %218 {strides = array<i32>} : memref<1x8x128xf32, #tpu.memory_space<vmem>>, vector<1x8x128xf32>,
    return
  }
  func.func @transform_0(%arg0: i32) -> (i32, i32, i32) {
    %c0_i32 = arith.constant 0 : i32
    %c0_i32_0 = arith.constant 0 : i32
    %c0_i32_1 = arith.constant 0 : i32
    return %arg0, %c0_i32, %c0_i32_0 : i32, i32, i32
  }
  func.func @transform_1(%arg0: i32) -> (i32, i32, i32) {
    %c0_i32 = arith.constant 0 : i32
    %c0_i32_0 = arith.constant 0 : i32
    %c0_i32_1 = arith.constant 0 : i32
    return %arg0, %c0_i32, %c0_i32_0 : i32, i32, i32
  }
  func.func @transform_2(%arg0: i32) -> (i32, i32, i32) {
    %c0_i32 = arith.constant 0 : i32
    %c0_i32_0 = arith.constant 0 : i32
    %c0_i32_1 = arith.constant 0 : i32
    return %arg0, %c0_i32, %c0_i32_0 : i32, i32, i32
  }
  func.func @transform_3(%arg0: i32) -> (i32, i32, i32) {
    %c0_i32 = arith.constant 0 : i32
    %c0_i32_0 = arith.constant 0 : i32
    %c0_i32_1 = arith.constant 0 : i32
    return %arg0, %c0_i32, %c0_i32_0 : i32, i32, i32
  }
  func.func @transform_4(%arg0: i32) -> (i32, i32) {
    %c0_i32 = arith.constant 0 : i32
    %c0_i32_0 = arith.constant 0 : i32
    %c0_i32_1 = arith.constant 0 : i32
    return %c0_i32, %c0_i32_0 : i32, i32
  }
  func.func @transform_5(%arg0: i32) -> (i32, i32) {
    %c0_i32 = arith.constant 0 : i32
    %c0_i32_0 = arith.constant 0 : i32
    %c0_i32_1 = arith.constant 0 : i32
    return %c0_i32, %c0_i32_0 : i32, i32
  }
  func.func @transform_6(%arg0: i32) -> (i32, i32) {
    %c0_i32 = arith.constant 0 : i32
    %c0_i32_0 = arith.constant 0 : i32
    %c0_i32_1 = arith.constant 0 : i32
    return %c0_i32, %c0_i32_0 : i32, i32
  }
  func.func @transform_7(%arg0: i32) -> (i32, i32) {
    %c0_i32 = arith.constant 0 : i32
    %c0_i32_0 = arith.constant 0 : i32
    %c0_i32_1 = arith.constant 0 : i32
    return %c0_i32, %c0_i32_0 : i32, i32
  }
  func.func @transform_8(%arg0: i32) -> (i32, i32) {
    %c0_i32 = arith.constant 0 : i32
    %c0_i32_0 = arith.constant 0 : i32
    %c0_i32_1 = arith.constant 0 : i32
    return %c0_i32, %c0_i32_0 : i32, i32
  }
  func.func @transform_9(%arg0: i32) -> (i32, i32) {
    %c0_i32 = arith.constant 0 : i32
    %c0_i32_0 = arith.constant 0 : i32
    %c0_i32_1 = arith.constant 0 : i32
    return %c0_i32, %c0_i32_0 : i32, i32
  }
  func.func @transform_10(%arg0: i32) -> (i32, i32) {
    %c0_i32 = arith.constant 0 : i32
    %c0_i32_0 = arith.constant 0 : i32
    %c0_i32_1 = arith.constant 0 : i32
    return %c0_i32, %c0_i32_0 : i32, i32
  }
  func.func @transform_11(%arg0: i32) -> (i32, i32) {
    %c0_i32 = arith.constant 0 : i32
    %c0_i32_0 = arith.constant 0 : i32
    %c0_i32_1 = arith.constant 0 : i32
    return %c0_i32, %c0_i32_0 : i32, i32
  }
  func.func @transform_12(%arg0: i32) -> (i32, i32) {
    %c0_i32 = arith.constant 0 : i32
    %c0_i32_0 = arith.constant 0 : i32
    %c0_i32_1 = arith.constant 0 : i32
    return %c0_i32, %c0_i32_0 : i32, i32
  }
  func.func @transform_13(%arg0: i32) -> (i32, i32) {
    %c0_i32 = arith.constant 0 : i32
    %c0_i32_0 = arith.constant 0 : i32
    %c0_i32_1 = arith.constant 0 : i32
    return %c0_i32, %c0_i32_0 : i32, i32
  }
  func.func @transform_14(%arg0: i32) -> (i32, i32) {
    %c0_i32 = arith.constant 0 : i32
    %c0_i32_0 = arith.constant 0 : i32
    %c0_i32_1 = arith.constant 0 : i32
    return %c0_i32, %c0_i32_0 : i32, i32
  }
  func.func @transform_15(%arg0: i32) -> (i32, i32) {
    %c0_i32 = arith.constant 0 : i32
    %c0_i32_0 = arith.constant 0 : i32
    %c0_i32_1 = arith.constant 0 : i32
    return %c0_i32, %c0_i32_0 : i32, i32
  }
  func.func @transform_16(%arg0: i32) -> (i32, i32) {
    %c0_i32 = arith.constant 0 : i32
    %c0_i32_0 = arith.constant 0 : i32
    %c0_i32_1 = arith.constant 0 : i32
    return %c0_i32, %c0_i32_0 : i32, i32
  }
  func.func @transform_17(%arg0: i32) -> (i32, i32) {
    %c0_i32 = arith.constant 0 : i32
    %c0_i32_0 = arith.constant 0 : i32
    %c0_i32_1 = arith.constant 0 : i32
    return %c0_i32, %c0_i32_0 : i32, i32
  }
  func.func @transform_18(%arg0: i32) -> (i32, i32) {
    %c0_i32 = arith.constant 0 : i32
    %c0_i32_0 = arith.constant 0 : i32
    %c0_i32_1 = arith.constant 0 : i32
    return %c0_i32, %c0_i32_0 : i32, i32
  }
  func.func @transform_19(%arg0: i32) -> (i32, i32) {
    %c0_i32 = arith.constant 0 : i32
    %c0_i32_0 = arith.constant 0 : i32
    %c0_i32_1 = arith.constant 0 : i32
    return %c0_i32, %c0_i32_0 : i32, i32
  }
  func.func @transform_20(%arg0: i32) -> (i32, i32) {
    %c0_i32 = arith.constant 0 : i32
    %c0_i32_0 = arith.constant 0 : i32
    %c0_i32_1 = arith.constant 0 : i32
    return %c0_i32, %c0_i32_0 : i32, i32
  }
  func.func @transform_21(%arg0: i32) -> (i32, i32) {
    %c0_i32 = arith.constant 0 : i32
    %c0_i32_0 = arith.constant 0 : i32
    %c0_i32_1 = arith.constant 0 : i32
    return %c0_i32, %c0_i32_0 : i32, i32
  }
  func.func @transform_22(%arg0: i32) -> (i32, i32) {
    %c0_i32 = arith.constant 0 : i32
    %c0_i32_0 = arith.constant 0 : i32
    %c0_i32_1 = arith.constant 0 : i32
    return %c0_i32, %c0_i32_0 : i32, i32
  }
  func.func @transform_23(%arg0: i32) -> (i32, i32) {
    %c0_i32 = arith.constant 0 : i32
    %c0_i32_0 = arith.constant 0 : i32
    %c0_i32_1 = arith.constant 0 : i32
    return %c0_i32, %c0_i32_0 : i32, i32
  }
  func.func @transform_24(%arg0: i32) -> (i32, i32) {
    %c0_i32 = arith.constant 0 : i32
    %c0_i32_0 = arith.constant 0 : i32
    %c0_i32_1 = arith.constant 0 : i32
    return %c0_i32, %c0_i32_0 : i32, i32
  }
  func.func @transform_25(%arg0: i32) -> (i32, i32) {
    %c0_i32 = arith.constant 0 : i32
    %c0_i32_0 = arith.constant 0 : i32
    %c0_i32_1 = arith.constant 0 : i32
    return %c0_i32, %c0_i32_0 : i32, i32
  }
  func.func @transform_26(%arg0: i32) -> (i32, i32, i32) {
    %c0_i32 = arith.constant 0 : i32
    %c0_i32_0 = arith.constant 0 : i32
    %c0_i32_1 = arith.constant 0 : i32
    return %arg0, %c0_i32, %c0_i32_0 : i32, i32, i32
  }
}

</mosaic_0001>

<bundles_post_ra>
// kernel: decoder_forward.2
= control target key start
LH: loop header
LB: loop body
LE: loop exit
PB: predicated region body
PF: predicated region fallthrough
CT: control target
= control target key end

     0   :  { %s7233_s0 = inlined_call_operand.hbm [shape: f32[2,8,128], index: 0, kind: input, shape index: {}]   ;;  %s7234_s1 = inlined_call_operand.vmem [shape: f32[2,8,128], index: 1, kind: input, shape index: {}]   ;;  %s7235_s2 = inlined_call_operand.vmem [shape: f32[2,8,8], index: 2, kind: input, shape index: {}]   ;;  %s7236_s3 = inlined_call_operand.vmem [shape: f32[2,8,8], index: 3, kind: input, shape index: {}]   ;;  %s7237_s4 = inlined_call_operand.hbm [shape: f32[1,128], index: 4, kind: input, shape index: {}]   ;;  %s7238_s5 = inlined_call_operand.hbm [shape: f32[1,128], index: 5, kind: input, shape index: {}]   ;;  %s7239_s6 = inlined_call_operand.hbm [shape: bf16[128,384], index: 6, kind: input, shape index: {}]   ;;  %s7240_s7 = inlined_call_operand.hbm [shape: f32[1,384], index: 7, kind: input, shape index: {}]   ;;  %s7241_s8 = inlined_call_operand.hbm [shape: bf16[128,128], index: 8, kind: input, shape index: {}]   ;;  %s7242_s9 = inlined_call_operand.hbm [shape: f32[1,128], index: 9, kind: input, shape index: {}]   ;;  %s7243_s10 = inlined_call_operand.hbm [shape: f32[1,128], index: 10, kind: input, shape index: {}]   ;;  %s7244_s11 = inlined_call_operand.hbm [shape: f32[1,128], index: 11, kind: input, shape index: {}]   ;;  %s7245_s12 = inlined_call_operand.hbm [shape: bf16[128,128], index: 12, kind: input, shape index: {}]   ;;  %s7246_s13 = inlined_call_operand.hbm [shape: f32[1,128], index: 13, kind: input, shape index: {}]   ;;  %s7247_s14 = inlined_call_operand.hbm [shape: bf16[128,256], index: 14, kind: input, shape index: {}]   ;;  %s7248_s15 = inlined_call_operand.hbm [shape: f32[1,256], index: 15, kind: input, shape index: {}]   ;;  %s7249_s16 = inlined_call_operand.hbm [shape: bf16[128,128], index: 16, kind: input, shape index: {}]   ;;  %s7250_s17 = inlined_call_operand.hbm [shape: f32[1,128], index: 17, kind: input, shape index: {}]   ;;  %s7251_s18 = inlined_call_operand.vmem [shape: f32[1,128], index: 18, kind: input, shape index: {}]   ;;  %s7252_s19 = inlined_call_operand.vmem [shape: f32[1,128], index: 19, kind: input, shape index: {}]   ;;  %s7253_s20 = inlined_call_operand.hbm [shape: bf16[128,256], index: 20, kind: input, shape index: {}]   ;;  %s7254_s21 = inlined_call_operand.hbm [shape: f32[1,256], index: 21, kind: input, shape index: {}]   ;;  %s7255_s22 = inlined_call_operand.hbm [shape: bf16[256,128], index: 22, kind: input, shape index: {}]   ;;  %s7256_s23 = inlined_call_operand.hbm [shape: f32[1,128], index: 23, kind: input, shape index: {}]   ;;  %s7257_s24 = inlined_call_operand.vmem [shape: f32[1,128], index: 24, kind: input, shape index: {}]   ;;  %s7258_s25 = inlined_call_operand.vmem [shape: f32[1,128], index: 25, kind: input, shape index: {}]   ;;  %s7259_s26 = inlined_call_operand.vmem [shape: f32[2,8,128], index: 26, kind: output, shape index: {}]  }
   0x1   :  { %7281 = sst [smem:[#allocation47_spill]] %s7233_s0 }
   0x2   :  { %7282 = sst [smem:[#allocation48_spill]] %s7234_s1 }
   0x3   :  { %7283 = sst [smem:[#allocation49_spill]] %s7235_s2 }
   0x4   :  { %7284 = sst [smem:[#allocation50_spill]] %s7236_s3 }
   0x5   :  { %7285 = sst [smem:[#allocation51_spill]] %s7237_s4 }
   0x6   :  { %7286 = sst [smem:[#allocation52_spill]] %s7238_s5 }
   0x7   :  { %7287 = sst [smem:[#allocation53_spill]] %s7239_s6 }
   0x8   :  { %7288 = sst [smem:[#allocation54_spill]] %s7240_s7 }
   0x9   :  { %7289 = sst [smem:[#allocation55_spill]] %s7241_s8 }
   0xa   :  { %7290 = sst [smem:[#allocation56_spill]] %s7242_s9 }
   0xb   :  { %7291 = sst [smem:[#allocation57_spill]] %s7243_s10 }
   0xc   :  { %7292 = sst [smem:[#allocation58_spill]] %s7251_s18 }
   0xd   :  { %7293 = sst [smem:[#allocation59_spill]] %s7252_s19 }
   0xe   :  { %7294 = sst [smem:[#allocation60_spill]] %s7259_s26 }
   0xf   :  { %31 = vsyncpa [#allocation3], 0 }
  0x10   :  { %33 = vsyncpa [#allocation3 + $0x1], 0 }
  0x11   :  { %34 = vsyncpa [#allocation5], 0 }
  0x12   :  { %35 = vsyncpa [#allocation8], 0 }
  0x13   :  { %36 = vsyncpa [#allocation11], 0 }
  0x14   :  { %37 = vsyncpa [#allocation14], 0 }
  0x15   :  { %38 = vsyncpa [#allocation17], 0 }
  0x16   :  { %39 = vsyncpa [#allocation20], 0 }
  0x17   :  { %40 = vsyncpa [#allocation23], 0 }
  0x18   :  { %41 = vsyncpa [#allocation26], 0 }
  0x19   :  { %42 = vsyncpa [#allocation29], 0  ;;  %s6243_s27 = smov 0   ;;  %s6245_s24 = smov 0  }
  0x1a   :  { %s6247_s3 = smov 0   ;;  %s6249_s25 = smov 0  }
  0x1b LB: > { %7295 = sst [smem:[#allocation41_spill]] %s6060_s27  ;;  %s6074_s7 = smov [#allocation4]   ;;  %s6072_s25 = sphi %s6249_s25, %s6691_s25   ;;  %s6068_s3 = sphi %s6247_s3, %s7350_s3   ;;  %s6064_s24 = sphi %s6245_s24, %s7349_s24   ;;  %s6060_s27 = sphi %s6243_s27, %s7348_s27  }
  0x1c   : > { %7296 = sst [smem:[#allocation42_spill]] %s6064_s24  ;;  %s658_s28 = sshll.u32 %s6074_s7, 4  ;;  %s659_s28 = int_to_ptr.vmem [resolvable:$true] %s658_s28 }
  0x1d   : > { %7297 = sst [smem:[#allocation43_spill]] %s6068_s3  ;;  %s6264_s8 = sadd.s32 4294967295, %s6072_s25  }
  0x1e   : > { %7298 = sst [smem:[#allocation44_spill]] %s6072_s25  ;;  %p4616_p0 = scmp.ge.s32.totalorder %s6072_s25, 1 }
  0x1f   : > { %7299 = sst [smem:[#allocation45_spill]] %s6264_s8  ;;  %p7268_p1 = scmp.eq.s32.totalorder %s6264_s8, 0 }
  0x20   : > { %p645_p2 = scmp.lt.s32.totalorder %s6072_s25, 3  ;;  %s6075_s29 = smov [#allocation7]  }
  0x21   : > { %s679_s0 = sshll.u32 %s6075_s29, 4  ;;  %s6076_s30 = smov [#allocation10]   ;;  %s6275_s0 = int_to_ptr.vmem [resolvable:$true] %s679_s0 }
  0x22   : > { %p6269_p3 = pnand %p4616_p0, %p645_p2  ;;  %s703_s2 = sshll.u32 %s6076_s30, 4  ;;  %s6283_s2 = int_to_ptr.vmem [resolvable:$true] %s703_s2 }
  0x23   : > { %s7303_s6 = sld [smem:[#allocation51_spill]] }
  0x24   : > { %s7300_s4 = scalar_select %p6269_p3, 1, 0 }
  0x25   : > { %p5142_p4 = pneg %p6269_p3 }
  0x26   : > { %7301 = sst [smem:[#allocation46_spill]] %s7300_s4 }
  0x27   : > { %p6279_p5 = pnand %p5142_p4, %p7268_p1 }
  0x29   : > { %s5468_s1 = scalar_lea.hbm %s7303_s6, 16  ;;  %p6293_p7 = pneg %p6279_p5 }
  0x2a   : > { %p5469_p6 = scmp.ne.s32.totalorder %s7303_s6, %s5468_s1  ;;  %p5475_p10 = scmp.lt.u32.totalorder %s5468_s1, %s7303_s6 }
  0x2c   : > { %p5471_p8 = pnand %p6293_p7, %p5469_p6 }
  0x2e   : > { %p5472_p9 = pneg %p5471_p8 }
  0x30   : > { %p5477_p11 = pnand %p5475_p10, %p5472_p9 }
  0x32   : > { %5480 = shalt.err (!%p5477_p11)
}
  0x33   : > { %s5481_s5 = scalar_lea.vmem %s659_s28, 16  ;;  %s5488_s26 = scalar_lea.vmem %s659_s28, 32 }
  0x34   : > { %p5482_p12 = scmp.ne.s32.totalorder %s659_s28, %s5481_s5  ;;  %p5489_p2 = scmp.lt.s32.totalorder %s659_s28, %s659_s28 }
  0x35   : > { %p5490_p4 = scmp.lt.s32.totalorder %s5488_s26, %s5481_s5 }
  0x36   : > { %p5484_p13 = pnand %p5482_p12, %p6293_p7 }
  0x37   : > { %p5491_p1 = por %p5490_p4, %p5489_p2 }
  0x38   : > { %p5485_p0 = pneg %p5484_p13 }
  0x3a   : > { %p5492_p3 = pnand %p5491_p1, %p5485_p0 }
  0x3c   : > { %5495 = shalt.err (!%p5492_p3)
}
  0x3d   : > { %5145 = dma.hbm_to_vmem [thread:$0]  (!%p6279_p5), %s7303_s6, 16, %s659_s28, [#allocation5]  }
  0x3e   : > { %s7305_s30 = sld [smem:[#allocation53_spill]] }
  0x44   : > { %s5496_s18 = scalar_lea.hbm %s7305_s30, 3072 }
  0x45   : > { %p5497_p6 = scmp.ne.s32.totalorder %s7305_s30, %s5496_s18  ;;  %p5503_p1 = scmp.lt.u32.totalorder %s5496_s18, %s7305_s30 }
  0x47   : > { %p5499_p8 = pnand %p5497_p6, %p6293_p7 }
  0x49   : > { %p5500_p9 = pneg %p5499_p8 }
  0x4b   : > { %p5505_p3 = pnand %p5503_p1, %p5500_p9 }
  0x4d   : > { %5508 = shalt.err (!%p5505_p3)
}
  0x4e   : > { %s5509_s28 = scalar_lea.vmem %s6275_s0, 3072  ;;  %p5517_p13 = scmp.lt.s32.totalorder %s6275_s0, %s6275_s0 }
  0x4f   : > { %p5510_p10 = scmp.ne.s32.totalorder %s6275_s0, %s5509_s28  ;;  %p5518_p0 = scmp.lt.s32.totalorder %s5509_s28, %s5509_s28 }
  0x51   : > { %p5512_p11 = pnand %p5510_p10, %p6293_p7  ;;  %p5519_p2 = por %p5518_p0, %p5517_p13 }
  0x53   : > { %p5513_p12 = pneg %p5512_p11 }
  0x55   : > { %p5520_p4 = pnand %p5519_p2, %p5513_p12 }
  0x57   : > { %5523 = shalt.err (!%p5520_p4)
}
  0x58   : > { %s6077_s8 = smov 192   ;;  %s6078_s18 = smov 12  }
  0x59   : > { %5151 = dma.hbm_to_vmem [thread:$0]  (!%p6279_p5), %s7305_s30, 3072, %s6275_s0, [#allocation8], %s6077_s8, %s6077_s8, %s6078_s18  }
  0x5a   : > { %s7306_s1 = sld [smem:[#allocation55_spill]] }
  0x60   : > { %s5524_s5 = scalar_lea.hbm %s7306_s1, 1024 }
  0x61   : > { %p5525_p6 = scmp.ne.s32.totalorder %s7306_s1, %s5524_s5  ;;  %p5531_p1 = scmp.lt.u32.totalorder %s5524_s5, %s7306_s1 }
  0x63   : > { %p5527_p8 = pnand %p5525_p6, %p6293_p7 }
  0x65   : > { %p5528_p9 = pneg %p5527_p8 }
  0x67   : > { %p5533_p3 = pnand %p5531_p1, %p5528_p9 }
  0x69   : > { %5536 = shalt.err (!%p5533_p3)
}
  0x6a   : > { %s5537_s0 = scalar_lea.vmem %s6283_s2, 1024  ;;  %p5545_p13 = scmp.lt.s32.totalorder %s6283_s2, %s6283_s2 }
  0x6b   : > { %p5538_p10 = scmp.ne.s32.totalorder %s6283_s2, %s5537_s0  ;;  %p5546_p0 = scmp.lt.s32.totalorder %s5537_s0, %s5537_s0 }
  0x6d   : > { %p5540_p11 = pnand %p5538_p10, %p6293_p7  ;;  %p5547_p2 = por %p5546_p0, %p5545_p13 }
  0x6f   : > { %p5541_p12 = pneg %p5540_p11 }
  0x71   : > { %p5548_p4 = pnand %p5547_p2, %p5541_p12 }
  0x73   : > { %5551 = shalt.err (!%p5548_p4)
}
  0x74   : > { %s6079_s6 = smov 64   ;;  %s6080_s27 = smov 4  }
  0x75   : > { %5157 = dma.hbm_to_vmem [thread:$0]  (!%p6279_p5), %s7306_s1, 1024, %s6283_s2, [#allocation11], %s6079_s6, %s6079_s6, %s6080_s27  }
  0x76   : > { %s6081_s4 = smov [#allocation13]   ;;  %s6082_s7 = smov [#allocation16]  }
  0x77   : > { %s728_s10 = sshll.u32 %s6081_s4, 4  ;;  %s749_s19 = sshll.u32 %s6082_s7, 4  ;;  %s729_s10 = int_to_ptr.vmem [resolvable:$true] %s728_s10  ;;  %s750_s19 = int_to_ptr.vmem [resolvable:$true] %s749_s19 }
  0x78   : > { %s7307_s28 = sld [smem:[#allocation57_spill]] }
  0x7e   : > { %s5552_s0 = scalar_lea.hbm %s7307_s28, 16 }
  0x7f   : > { %p5553_p6 = scmp.ne.s32.totalorder %s7307_s28, %s5552_s0  ;;  %p5559_p1 = scmp.lt.u32.totalorder %s5552_s0, %s7307_s28 }
  0x81   : > { %p5555_p8 = pnand %p5553_p6, %p6293_p7 }
  0x83   : > { %p5556_p9 = pneg %p5555_p8 }
  0x85   : > { %p5561_p3 = pnand %p5559_p1, %p5556_p9 }
  0x87   : > { %5564 = shalt.err (!%p5561_p3)
}
  0x88   : > { %s5565_s2 = scalar_lea.vmem %s729_s10, 16  ;;  %s5572_s8 = scalar_lea.vmem %s729_s10, 32 }
  0x89   : > { %p5566_p10 = scmp.ne.s32.totalorder %s729_s10, %s5565_s2  ;;  %p5573_p13 = scmp.lt.s32.totalorder %s729_s10, %s729_s10 }
  0x8a   : > { %p5574_p0 = scmp.lt.s32.totalorder %s5572_s8, %s5565_s2 }
  0x8b   : > { %p5568_p11 = pnand %p5566_p10, %p6293_p7 }
  0x8c   : > { %p5575_p2 = por %p5574_p0, %p5573_p13 }
  0x8d   : > { %p5569_p12 = pneg %p5568_p11 }
  0x8f   : > { %p5576_p4 = pnand %p5575_p2, %p5569_p12 }
  0x91   : > { %5579 = shalt.err (!%p5576_p4)
}
  0x92   : > { %5163 = dma.hbm_to_vmem [thread:$0]  (!%p6279_p5), %s7307_s28, 16, %s729_s10, [#allocation14]  }
  0x93   : > { %s5580_s18 = scalar_lea.hbm %s7245_s12, 1024 }
  0x94   : > { %p5581_p6 = scmp.ne.s32.totalorder %s7245_s12, %s5580_s18  ;;  %p5587_p1 = scmp.lt.u32.totalorder %s5580_s18, %s7245_s12 }
  0x96   : > { %p5583_p8 = pnand %p5581_p6, %p6293_p7 }
  0x98   : > { %p5584_p9 = pneg %p5583_p8 }
  0x9a   : > { %p5589_p3 = pnand %p5587_p1, %p5584_p9 }
  0x9c   : > { %5592 = shalt.err (!%p5589_p3)
}
  0x9d   : > { %s5593_s0 = scalar_lea.vmem %s750_s19, 1024  ;;  %p5601_p13 = scmp.lt.s32.totalorder %s750_s19, %s750_s19 }
  0x9e   : > { %p5594_p10 = scmp.ne.s32.totalorder %s750_s19, %s5593_s0  ;;  %p5602_p0 = scmp.lt.s32.totalorder %s5593_s0, %s5593_s0 }
  0xa0   : > { %p5596_p11 = pnand %p5594_p10, %p6293_p7  ;;  %p5603_p2 = por %p5602_p0, %p5601_p13 }
  0xa2   : > { %p5597_p12 = pneg %p5596_p11 }
  0xa4   : > { %p5604_p4 = pnand %p5603_p2, %p5597_p12 }
  0xa6   : > { %5607 = shalt.err (!%p5604_p4)
}
  0xa7   : > { %5169 = dma.hbm_to_vmem [thread:$0]  (!%p6279_p5), %s7245_s12, 1024, %s750_s19, [#allocation17], %s6079_s6, %s6079_s6, %s6080_s27  }
  0xa8   : > { %s6083_s8 = smov [#allocation19]   ;;  %s5608_s25 = scalar_lea.hbm %s7247_s14, 2048 }
  0xa9   : > { %s773_s24 = sshll.u32 %s6083_s8, 4  ;;  %p5609_p6 = scmp.ne.s32.totalorder %s7247_s14, %s5608_s25  ;;  %s774_s24 = int_to_ptr.vmem [resolvable:$true] %s773_s24 }
  0xaa   : > { %p5615_p1 = scmp.lt.u32.totalorder %s5608_s25, %s7247_s14 }
  0xab   : > { %p5611_p8 = pnand %p5609_p6, %p6293_p7 }
  0xad   : > { %p5612_p9 = pneg %p5611_p8 }
  0xaf   : > { %p5617_p3 = pnand %p5615_p1, %p5612_p9 }
  0xb1   : > { %5620 = shalt.err (!%p5617_p3)
}
  0xb2   : > { %s5621_s19 = scalar_lea.vmem %s774_s24, 2048  ;;  %p5629_p13 = scmp.lt.s32.totalorder %s774_s24, %s774_s24 }
  0xb3   : > { %p5622_p10 = scmp.ne.s32.totalorder %s774_s24, %s5621_s19  ;;  %p5630_p0 = scmp.lt.s32.totalorder %s5621_s19, %s5621_s19 }
  0xb5   : > { %p5624_p11 = pnand %p5622_p10, %p6293_p7  ;;  %p5631_p2 = por %p5630_p0, %p5629_p13 }
  0xb7   : > { %p5625_p12 = pneg %p5624_p11 }
  0xb9   : > { %p5632_p4 = pnand %p5631_p2, %p5625_p12 }
  0xbb   : > { %5635 = shalt.err (!%p5632_p4)
}
  0xbc   : > { %s6084_s26 = smov 128   ;;  %s6085_s0 = smov 8  }
  0xbd   : > { %5175 = dma.hbm_to_vmem [thread:$0]  (!%p6279_p5), %s7247_s14, 2048, %s774_s24, [#allocation20], %s6084_s26, %s6084_s26, %s6085_s0  }
  0xbe   : > { %s6086_s8 = smov [#allocation22]   ;;  %s6087_s3 = smov [#allocation25]  }
  0xbf   : > { %s797_s30 = sshll.u32 %s6086_s8, 4  ;;  %s827_s25 = sshll.u32 %s6087_s3, 4  ;;  %s798_s30 = int_to_ptr.vmem [resolvable:$true] %s797_s30  ;;  %s6418_s25 = int_to_ptr.vmem [resolvable:$true] %s827_s25 }
  0xc0   : > { %s5636_s7 = scalar_lea.hbm %s7249_s16, 1024 }
  0xc1   : > { %p5637_p6 = scmp.ne.s32.totalorder %s7249_s16, %s5636_s7  ;;  %p5643_p1 = scmp.lt.u32.totalorder %s5636_s7, %s7249_s16 }
  0xc3   : > { %p5639_p8 = pnand %p5637_p6, %p6293_p7 }
  0xc5   : > { %p5640_p9 = pneg %p5639_p8 }
  0xc7   : > { %p5645_p3 = pnand %p5643_p1, %p5640_p9 }
  0xc9   : > { %5648 = shalt.err (!%p5645_p3)
}
  0xca   : > { %s5649_s2 = scalar_lea.vmem %s798_s30, 1024  ;;  %p5657_p13 = scmp.lt.s32.totalorder %s798_s30, %s798_s30 }
  0xcb   : > { %p5650_p10 = scmp.ne.s32.totalorder %s798_s30, %s5649_s2  ;;  %p5658_p0 = scmp.lt.s32.totalorder %s5649_s2, %s5649_s2 }
  0xcd   : > { %p5652_p11 = pnand %p5650_p10, %p6293_p7  ;;  %p5659_p2 = por %p5658_p0, %p5657_p13 }
  0xcf   : > { %p5653_p12 = pneg %p5652_p11 }
  0xd1   : > { %p5660_p4 = pnand %p5659_p2, %p5653_p12 }
  0xd3   : > { %5663 = shalt.err (!%p5660_p4)
}
  0xd4   : > { %5181 = dma.hbm_to_vmem [thread:$0]  (!%p6279_p5), %s7249_s16, 1024, %s798_s30, [#allocation23], %s6079_s6, %s6079_s6, %s6080_s27  }
  0xd5   : > { %s5664_s7 = scalar_lea.hbm %s7253_s20, 2048 }
  0xd6   : > { %p5665_p6 = scmp.ne.s32.totalorder %s7253_s20, %s5664_s7  ;;  %p5671_p1 = scmp.lt.u32.totalorder %s5664_s7, %s7253_s20 }
  0xd8   : > { %p5667_p8 = pnand %p5665_p6, %p6293_p7 }
  0xda   : > { %p5668_p9 = pneg %p5667_p8 }
  0xdc   : > { %p5673_p3 = pnand %p5671_p1, %p5668_p9 }
  0xde   : > { %5676 = shalt.err (!%p5673_p3)
}
  0xdf   : > { %s5677_s30 = scalar_lea.vmem %s6418_s25, 2048  ;;  %p5685_p13 = scmp.lt.s32.totalorder %s6418_s25, %s6418_s25 }
  0xe0   : > { %p5678_p10 = scmp.ne.s32.totalorder %s6418_s25, %s5677_s30  ;;  %p5686_p0 = scmp.lt.s32.totalorder %s5677_s30, %s5677_s30 }
  0xe2   : > { %p5680_p11 = pnand %p5678_p10, %p6293_p7  ;;  %p5687_p2 = por %p5686_p0, %p5685_p13 }
  0xe4   : > { %p5681_p12 = pneg %p5680_p11 }
  0xe6   : > { %p5688_p4 = pnand %p5687_p2, %p5681_p12 }
  0xe8   : > { %5691 = shalt.err (!%p5688_p4)
}
  0xe9   : > { %5187 = dma.hbm_to_vmem [thread:$0]  (!%p6279_p5), %s7253_s20, 2048, %s6418_s25, [#allocation26], %s6084_s26, %s6084_s26, %s6085_s0  }
  0xea   : > { %s6088_s3 = smov [#allocation28]   ;;  %s6089_s4 = smov [#allocation6]  }
  0xeb   : > { %s851_s18 = sshll.u32 %s6088_s3, 4  ;;  %s669_s7 = sshll.u32 %s6089_s4, 4  ;;  %s852_s18 = int_to_ptr.vmem [resolvable:$true] %s851_s18  ;;  %s6467_s7 = int_to_ptr.vmem [resolvable:$true] %s669_s7 }
  0xec   : > { %s5692_s10 = scalar_lea.hbm %s7255_s22, 2048 }
  0xed   : > { %p5693_p6 = scmp.ne.s32.totalorder %s7255_s22, %s5692_s10  ;;  %p5699_p1 = scmp.lt.u32.totalorder %s5692_s10, %s7255_s22 }
  0xef   : > { %p5695_p8 = pnand %p5693_p6, %p6293_p7 }
  0xf1   : > { %p5696_p9 = pneg %p5695_p8 }
  0xf3   : > { %p5701_p3 = pnand %p5699_p1, %p5696_p9 }
  0xf5   : > { %5704 = shalt.err (!%p5701_p3)
}
  0xf6   : > { %s5705_s0 = scalar_lea.vmem %s852_s18, 2048  ;;  %p5713_p13 = scmp.lt.s32.totalorder %s852_s18, %s852_s18 }
  0xf7   : > { %p5706_p10 = scmp.ne.s32.totalorder %s852_s18, %s5705_s0  ;;  %p5714_p0 = scmp.lt.s32.totalorder %s5705_s0, %s5705_s0 }
  0xf9   : > { %p5708_p11 = pnand %p5706_p10, %p6293_p7  ;;  %p5715_p2 = por %p5714_p0, %p5713_p13 }
  0xfb   : > { %p5709_p12 = pneg %p5708_p11 }
  0xfd   : > { %p5716_p4 = pnand %p5715_p2, %p5709_p12 }
  0xff   : > { %5719 = shalt.err (!%p5716_p4)
}
 0x100   : > { %5193 = dma.hbm_to_vmem [thread:$0]  (!%p6279_p5), %s7255_s22, 2048, %s852_s18, [#allocation29], %s6079_s6, %s6079_s6, %s6080_s27  }
 0x101   : > { %s7308_s5 = sld [smem:[#allocation52_spill]] }
 0x107   : > { %s5720_s19 = scalar_lea.hbm %s7308_s5, 16 }
 0x108   : > { %p5721_p6 = scmp.ne.s32.totalorder %s7308_s5, %s5720_s19  ;;  %p5727_p1 = scmp.lt.u32.totalorder %s5720_s19, %s7308_s5 }
 0x10a   : > { %p5723_p8 = pnand %p5721_p6, %p6293_p7 }
 0x10c   : > { %p5724_p9 = pneg %p5723_p8 }
 0x10e   : > { %p5729_p3 = pnand %p5727_p1, %p5724_p9 }
 0x110   : > { %5732 = shalt.err (!%p5729_p3)
}
 0x111   : > { %s5733_s6 = scalar_lea.vmem %s6467_s7, 16  ;;  %s5740_s27 = scalar_lea.vmem %s6467_s7, 32 }
 0x112   : > { %p5734_p10 = scmp.ne.s32.totalorder %s6467_s7, %s5733_s6  ;;  %p5741_p13 = scmp.lt.s32.totalorder %s6467_s7, %s6467_s7 }
 0x113   : > { %p5742_p0 = scmp.lt.s32.totalorder %s5740_s27, %s5733_s6 }
 0x114   : > { %p5736_p11 = pnand %p5734_p10, %p6293_p7 }
 0x115   : > { %p5743_p2 = por %p5742_p0, %p5741_p13 }
 0x116   : > { %p5737_p12 = pneg %p5736_p11 }
 0x118   : > { %p5744_p4 = pnand %p5743_p2, %p5737_p12 }
 0x11a   : > { %5747 = shalt.err (!%p5744_p4)
}
 0x11b   : > { %5148 = dma.hbm_to_vmem [thread:$0]  (!%p6279_p5), %s7308_s5, 16, %s6467_s7, [#allocation5]  }
 0x11c   : > { %s6090_s0 = smov [#allocation9]   ;;  %s6091_s8 = smov [#allocation12]  }
 0x11d   : > { %s693_s25 = sshll.u32 %s6090_s0, 4  ;;  %s717_s3 = sshll.u32 %s6091_s8, 4  ;;  %s694_s25 = int_to_ptr.vmem [resolvable:$true] %s693_s25  ;;  %s6514_s3 = int_to_ptr.vmem [resolvable:$true] %s717_s3 }
 0x11e   : > { %s7309_s10 = sld [smem:[#allocation54_spill]] }
 0x124   : > { %s5748_s24 = scalar_lea.hbm %s7309_s10, 48 }
 0x125   : > { %p5749_p6 = scmp.ne.s32.totalorder %s7309_s10, %s5748_s24  ;;  %p5755_p1 = scmp.lt.u32.totalorder %s5748_s24, %s7309_s10 }
 0x127   : > { %p5751_p8 = pnand %p5749_p6, %p6293_p7 }
 0x129   : > { %p5752_p9 = pneg %p5751_p8 }
 0x12b   : > { %p5757_p3 = pnand %p5755_p1, %p5752_p9 }
 0x12d   : > { %5760 = shalt.err (!%p5757_p3)
}
 0x12e   : > { %s5761_s27 = scalar_lea.vmem %s694_s25, 48  ;;  %s5768_s18 = scalar_lea.vmem %s694_s25, 64 }
 0x12f   : > { %p5762_p10 = scmp.ne.s32.totalorder %s694_s25, %s5761_s27  ;;  %p5769_p13 = scmp.lt.s32.totalorder %s694_s25, %s694_s25 }
 0x130   : > { %p5770_p0 = scmp.lt.s32.totalorder %s5768_s18, %s5761_s27 }
 0x131   : > { %p5764_p11 = pnand %p5762_p10, %p6293_p7 }
 0x132   : > { %p5771_p2 = por %p5770_p0, %p5769_p13 }
 0x133   : > { %p5765_p12 = pneg %p5764_p11 }
 0x135   : > { %p5772_p4 = pnand %p5771_p2, %p5765_p12 }
 0x137   : > { %5775 = shalt.err (!%p5772_p4)
}
 0x138   : > { %5154 = dma.hbm_to_vmem [thread:$0]  (!%p6279_p5), %s7309_s10, 48, %s694_s25, [#allocation8]  }
 0x139   : > { %s7310_s19 = sld [smem:[#allocation56_spill]] }
 0x13f   : > { %s5776_s24 = scalar_lea.hbm %s7310_s19, 16 }
 0x140   : > { %p5777_p6 = scmp.ne.s32.totalorder %s7310_s19, %s5776_s24  ;;  %p5783_p1 = scmp.lt.u32.totalorder %s5776_s24, %s7310_s19 }
 0x142   : > { %p5779_p8 = pnand %p5777_p6, %p6293_p7 }
 0x144   : > { %p5780_p9 = pneg %p5779_p8 }
 0x146   : > { %p5785_p3 = pnand %p5783_p1, %p5780_p9 }
 0x148   : > { %5788 = shalt.err (!%p5785_p3)
}
 0x149   : > { %s5789_s25 = scalar_lea.vmem %s6514_s3, 16  ;;  %s5796_s27 = scalar_lea.vmem %s6514_s3, 32 }
 0x14a   : > { %p5790_p10 = scmp.ne.s32.totalorder %s6514_s3, %s5789_s25  ;;  %p5797_p13 = scmp.lt.s32.totalorder %s6514_s3, %s6514_s3 }
 0x14b   : > { %p5798_p0 = scmp.lt.s32.totalorder %s5796_s27, %s5789_s25 }
 0x14c   : > { %p5792_p11 = pnand %p5790_p10, %p6293_p7 }
 0x14d   : > { %p5799_p2 = por %p5798_p0, %p5797_p13 }
 0x14e   : > { %p5793_p12 = pneg %p5792_p11 }
 0x150   : > { %p5800_p4 = pnand %p5799_p2, %p5793_p12 }
 0x152   : > { %5803 = shalt.err (!%p5800_p4)
}
 0x153   : > { %5160 = dma.hbm_to_vmem [thread:$0]  (!%p6279_p5), %s7310_s19, 16, %s6514_s3, [#allocation11]  }
 0x154   : > { %s6092_s0 = smov [#allocation15]   ;;  %s6093_s4 = smov [#allocation18]  }
 0x155   : > { %s739_s8 = sshll.u32 %s6092_s0, 4  ;;  %s763_s24 = sshll.u32 %s6093_s4, 4  ;;  %s740_s8 = int_to_ptr.vmem [resolvable:$true] %s739_s8  ;;  %s6558_s24 = int_to_ptr.vmem [resolvable:$true] %s763_s24 }
 0x156   : > { %s5804_s6 = scalar_lea.hbm %s7244_s11, 16 }
 0x157   : > { %p5805_p6 = scmp.ne.s32.totalorder %s7244_s11, %s5804_s6  ;;  %p5811_p1 = scmp.lt.u32.totalorder %s5804_s6, %s7244_s11 }
 0x159   : > { %p5807_p8 = pnand %p5805_p6, %p6293_p7 }
 0x15b   : > { %p5808_p9 = pneg %p5807_p8 }
 0x15d   : > { %p5813_p3 = pnand %p5811_p1, %p5808_p9 }
 0x15f   : > { %5816 = shalt.err (!%p5813_p3)
}
 0x160   : > { %s5817_s18 = scalar_lea.vmem %s740_s8, 16  ;;  %s5824_s26 = scalar_lea.vmem %s740_s8, 32 }
 0x161   : > { %p5818_p10 = scmp.ne.s32.totalorder %s740_s8, %s5817_s18  ;;  %p5825_p13 = scmp.lt.s32.totalorder %s740_s8, %s740_s8 }
 0x162   : > { %p5826_p0 = scmp.lt.s32.totalorder %s5824_s26, %s5817_s18 }
 0x163   : > { %p5820_p11 = pnand %p5818_p10, %p6293_p7 }
 0x164   : > { %p5827_p2 = por %p5826_p0, %p5825_p13 }
 0x165   : > { %p5821_p12 = pneg %p5820_p11 }
 0x167   : > { %p5828_p4 = pnand %p5827_p2, %p5821_p12 }
 0x169   : > { %5831 = shalt.err (!%p5828_p4)
}
 0x16a   : > { %5166 = dma.hbm_to_vmem [thread:$0]  (!%p6279_p5), %s7244_s11, 16, %s740_s8, [#allocation14]  }
 0x16b   : > { %s5832_s6 = scalar_lea.hbm %s7246_s13, 16 }
 0x16c   : > { %p5833_p6 = scmp.ne.s32.totalorder %s7246_s13, %s5832_s6  ;;  %p5839_p1 = scmp.lt.u32.totalorder %s5832_s6, %s7246_s13 }
 0x16e   : > { %p5835_p8 = pnand %p5833_p6, %p6293_p7 }
 0x170   : > { %p5836_p9 = pneg %p5835_p8 }
 0x172   : > { %p5841_p3 = pnand %p5839_p1, %p5836_p9 }
 0x174   : > { %5844 = shalt.err (!%p5841_p3)
}
 0x175   : > { %s5845_s8 = scalar_lea.vmem %s6558_s24, 16  ;;  %s5852_s18 = scalar_lea.vmem %s6558_s24, 32 }
 0x176   : > { %p5846_p10 = scmp.ne.s32.totalorder %s6558_s24, %s5845_s8  ;;  %p5853_p13 = scmp.lt.s32.totalorder %s6558_s24, %s6558_s24 }
 0x177   : > { %p5854_p0 = scmp.lt.s32.totalorder %s5852_s18, %s5845_s8 }
 0x178   : > { %p5848_p11 = pnand %p5846_p10, %p6293_p7 }
 0x179   : > { %p5855_p2 = por %p5854_p0, %p5853_p13 }
 0x17a   : > { %p5849_p12 = pneg %p5848_p11 }
 0x17c   : > { %p5856_p4 = pnand %p5855_p2, %p5849_p12 }
 0x17e   : > { %5859 = shalt.err (!%p5856_p4)
}
 0x17f   : > { %5172 = dma.hbm_to_vmem [thread:$0]  (!%p6279_p5), %s7246_s13, 16, %s6558_s24, [#allocation17]  }
 0x180   : > { %s6094_s4 = smov [#allocation21]   ;;  %s6095_s2 = smov [#allocation24]  }
 0x181   : > { %s787_s30 = sshll.u32 %s6094_s4, 4  ;;  %s811_s6 = sshll.u32 %s6095_s2, 4  ;;  %s788_s30 = int_to_ptr.vmem [resolvable:$true] %s787_s30  ;;  %s6602_s6 = int_to_ptr.vmem [resolvable:$true] %s811_s6 }
 0x182   : > { %s5860_s27 = scalar_lea.hbm %s7248_s15, 32 }
 0x183   : > { %p5861_p6 = scmp.ne.s32.totalorder %s7248_s15, %s5860_s27  ;;  %p5867_p1 = scmp.lt.u32.totalorder %s5860_s27, %s7248_s15 }
 0x185   : > { %p5863_p8 = pnand %p5861_p6, %p6293_p7 }
 0x187   : > { %p5864_p9 = pneg %p5863_p8 }
 0x189   : > { %p5869_p3 = pnand %p5867_p1, %p5864_p9 }
 0x18b   : > { %5872 = shalt.err (!%p5869_p3)
}
 0x18c   : > { %s5873_s26 = scalar_lea.vmem %s788_s30, 32  ;;  %p5881_p13 = scmp.lt.s32.totalorder %s788_s30, %s788_s30 }
 0x18d   : > { %p5874_p10 = scmp.ne.s32.totalorder %s788_s30, %s5873_s26  ;;  %p5882_p0 = scmp.lt.s32.totalorder %s5873_s26, %s5873_s26 }
 0x18f   : > { %p5876_p11 = pnand %p5874_p10, %p6293_p7  ;;  %p5883_p2 = por %p5882_p0, %p5881_p13 }
 0x191   : > { %p5877_p12 = pneg %p5876_p11 }
 0x193   : > { %p5884_p4 = pnand %p5883_p2, %p5877_p12 }
 0x195   : > { %5887 = shalt.err (!%p5884_p4)
}
 0x196   : > { %5178 = dma.hbm_to_vmem [thread:$0]  (!%p6279_p5), %s7248_s15, 32, %s788_s30, [#allocation20]  }
 0x197   : > { %s5888_s25 = scalar_lea.hbm %s7250_s17, 16 }
 0x198   : > { %p5889_p6 = scmp.ne.s32.totalorder %s7250_s17, %s5888_s25  ;;  %p5895_p1 = scmp.lt.u32.totalorder %s5888_s25, %s7250_s17 }
 0x19a   : > { %p5891_p8 = pnand %p5889_p6, %p6293_p7 }
 0x19c   : > { %p5892_p9 = pneg %p5891_p8 }
 0x19e   : > { %p5897_p3 = pnand %p5895_p1, %p5892_p9 }
 0x1a0   : > { %5900 = shalt.err (!%p5897_p3)
}
 0x1a1   : > { %s5901_s30 = scalar_lea.vmem %s6602_s6, 16  ;;  %s5908_s24 = scalar_lea.vmem %s6602_s6, 32 }
 0x1a2   : > { %p5902_p10 = scmp.ne.s32.totalorder %s6602_s6, %s5901_s30  ;;  %p5909_p13 = scmp.lt.s32.totalorder %s6602_s6, %s6602_s6 }
 0x1a3   : > { %p5910_p0 = scmp.lt.s32.totalorder %s5908_s24, %s5901_s30 }
 0x1a4   : > { %p5904_p11 = pnand %p5902_p10, %p6293_p7 }
 0x1a5   : > { %p5911_p2 = por %p5910_p0, %p5909_p13 }
 0x1a6   : > { %p5905_p12 = pneg %p5904_p11 }
 0x1a8   : > { %p5912_p4 = pnand %p5911_p2, %p5905_p12 }
 0x1aa   : > { %5915 = shalt.err (!%p5912_p4)
}
 0x1ab   : > { %5184 = dma.hbm_to_vmem [thread:$0]  (!%p6279_p5), %s7250_s17, 16, %s6602_s6, [#allocation23]  }
 0x1ac   : > { %s6096_s4 = smov [#allocation27]   ;;  %s6097_s7 = smov [#allocation30]  }
 0x1ad   : > { %s841_s2 = sshll.u32 %s6096_s4, 4  ;;  %s865_s25 = sshll.u32 %s6097_s7, 4  ;;  %s842_s2 = int_to_ptr.vmem [resolvable:$true] %s841_s2  ;;  %s6646_s25 = int_to_ptr.vmem [resolvable:$true] %s865_s25 }
 0x1ae   : > { %s5916_s8 = scalar_lea.hbm %s7254_s21, 32 }
 0x1af   : > { %p5917_p6 = scmp.ne.s32.totalorder %s7254_s21, %s5916_s8  ;;  %p5923_p1 = scmp.lt.u32.totalorder %s5916_s8, %s7254_s21 }
 0x1b1   : > { %p5919_p8 = pnand %p5917_p6, %p6293_p7 }
 0x1b3   : > { %p5920_p9 = pneg %p5919_p8 }
 0x1b5   : > { %p5925_p3 = pnand %p5923_p1, %p5920_p9 }
 0x1b7   : > { %5928 = shalt.err (!%p5925_p3)
}
 0x1b8   : > { %s5929_s26 = scalar_lea.vmem %s842_s2, 32  ;;  %p5937_p13 = scmp.lt.s32.totalorder %s842_s2, %s842_s2 }
 0x1b9   : > { %p5930_p10 = scmp.ne.s32.totalorder %s842_s2, %s5929_s26  ;;  %p5938_p0 = scmp.lt.s32.totalorder %s5929_s26, %s5929_s26 }
 0x1bb   : > { %p5932_p11 = pnand %p5930_p10, %p6293_p7  ;;  %p5939_p2 = por %p5938_p0, %p5937_p13 }
 0x1bd   : > { %p5933_p12 = pneg %p5932_p11 }
 0x1bf   : > { %p5940_p4 = pnand %p5939_p2, %p5933_p12 }
 0x1c1   : > { %5943 = shalt.err (!%p5940_p4)
}
 0x1c2   : > { %5190 = dma.hbm_to_vmem [thread:$0]  (!%p6279_p5), %s7254_s21, 32, %s842_s2, [#allocation26]  }
 0x1c3   : > { %s5944_s3 = scalar_lea.hbm %s7256_s23, 16 }
 0x1c4   : > { %p5945_p6 = scmp.ne.s32.totalorder %s7256_s23, %s5944_s3  ;;  %p5951_p1 = scmp.lt.u32.totalorder %s5944_s3, %s7256_s23 }
 0x1c6   : > { %p5947_p8 = pnand %p5945_p6, %p6293_p7 }
 0x1c8   : > { %p5948_p9 = pneg %p5947_p8 }
 0x1ca   : > { %p5953_p3 = pnand %p5951_p1, %p5948_p9 }
 0x1cc   : > { %5956 = shalt.err (!%p5953_p3)
}
 0x1cd   : > { %s5957_s2 = scalar_lea.vmem %s6646_s25, 16  ;;  %s5964_s6 = scalar_lea.vmem %s6646_s25, 32 }
 0x1ce   : > { %p5958_p10 = scmp.ne.s32.totalorder %s6646_s25, %s5957_s2  ;;  %p5965_p13 = scmp.lt.s32.totalorder %s6646_s25, %s6646_s25 }
 0x1cf   : > { %p5966_p0 = scmp.lt.s32.totalorder %s5964_s6, %s5957_s2 }
 0x1d0   : > { %p5960_p11 = pnand %p5958_p10, %p6293_p7 }
 0x1d1   : > { %p5967_p2 = por %p5966_p0, %p5965_p13 }
 0x1d2   : > { %p5961_p12 = pneg %p5960_p11 }
 0x1d4   : > { %p5968_p4 = pnand %p5967_p2, %p5961_p12 }
 0x1d6   : > { %5971 = shalt.err (!%p5968_p4)
}
 0x1d7   : > { %s7311_s4 = sld [smem:[#allocation44_spill]]  ;;  %s7312_s7 = sld [smem:[#allocation43_spill]] }
 0x1d8   : > { %s7313_s27 = sld [smem:[#allocation42_spill]]  ;;  %s7314_s29 = sld [smem:[#allocation41_spill]] }
 0x1d9   : > { %s7315_s3 = sld [smem:[#allocation45_spill]]  ;;  %s7318_s1 = sld [smem:[#allocation47_spill]] }
 0x1da   : > { %5196 = dma.hbm_to_vmem [thread:$0]  (!%p6279_p5), %s7256_s23, 16, %s6646_s25, [#allocation29]  }
 0x1dd   : > { %s6691_s25 = sadd.s32 1, %s7311_s4   ;;  %s55_s9 = sadd.s32 1, %s7312_s7 }
 0x1de   : > { %s52_s8 = ssub.s32 %s7311_s4, %s6691_s25  ;;  %p62_p7 = scmp.ne.s32.totalorder %s7312_s7, %s7313_s27 }
 0x1df   : > { %p53_p6 = scmp.eq.s32.totalorder %s52_s8, 0  ;;  %p63_p8 = scmp.eq.s32.totalorder %s7311_s4, 0 }
 0x1e0   : > { %p68_p9 = scmp.ne.s32.totalorder %s7313_s27, %s7314_s29  ;;  %p5219_p1 = scmp.lt.s32.totalorder %s7311_s4, 2 }
 0x1e1   : > { %s6703_s18 = scalar_select %p53_p6, %s7312_s7, %s55_s9  }
 0x1e2   : > { %p64_p3 = por %p63_p8, %p62_p7  ;;  %p7316_p10 = scmp.eq.s32.totalorder %s7315_s3, 0 }
 0x1e3   : > { %s882_s24 = sand.u32 1, %s7312_s7   ;;  %s4637_s2 = sshll.u32 %s7311_s4, 7 }
 0x1e4   : > { %p6707_p11 = por %p7316_p10, %p68_p9  ;;  %s4636_s6 = sshll.u32 %s882_s24, 3 }
 0x1e5   : > { %s6716_s5 = scalar_lea.hbm %s7318_s1, %s4637_s2  ;;  %s886_s27 = scalar_lea.vmem [#allocation2], %s4636_s6 }
 0x1e6   : > { %s893_s29 = sshll.u32 %s886_s27, 4  ;;  %p6718_p5 = pnand %p5219_p1, %p64_p3  ;;  %s6722_s29 = int_to_ptr.vmem [resolvable:$true] %s893_s29 }
 0x1e7   : > { %s883_s4 = scalar_lea.sflag [#allocation3], %s882_s24  ;;  %s5972_s7 = scalar_lea.hbm %s6716_s5, 128 }
 0x1e8   : > { %p5973_p12 = scmp.ne.s32.totalorder %s6716_s5, %s5972_s7  ;;  %p5974_p13 = pneg %p6718_p5 }
 0x1e9   : > { %s5977_s2 = scalar_lea.hbm %s7318_s1, 256  ;;  %p5978_p4 = scmp.lt.u32.totalorder %s6716_s5, %s7318_s1 }
 0x1ea   : > { %p5975_p0 = pnand %p5974_p13, %p5973_p12  ;;  %p5979_p7 = scmp.lt.u32.totalorder %s5977_s2, %s5972_s7 }
 0x1eb   : > { %p5981_p8 = scmp.lt.u32.totalorder %s5972_s7, %s6716_s5 }
 0x1ec   : > { %p5976_p2 = pneg %p5975_p0  ;;  %p5980_p6 = por %p5979_p7, %p5978_p4 }
 0x1ee   : > { %p5982_p9 = por %p5981_p8, %p5980_p6 }
 0x1f0   : > { %p5983_p1 = pnand %p5982_p9, %p5976_p2 }
 0x1f2   : > { %5986 = shalt.err (!%p5983_p1)
}
 0x1f3   : > { %s5987_s24 = scalar_lea.vmem %s6722_s29, 128  ;;  %s6098_s0 = smov [#allocation2]  }
 0x1f4   : > { %p5988_p3 = scmp.ne.s32.totalorder %s6722_s29, %s5987_s24  ;;  %s5992_s27 = sshll.u32 %s6098_s0, 4  ;;  %s5993_s27 = int_to_ptr.vmem [resolvable:$false] %s5992_s27 }
 0x1f5   : > { %s5994_s9 = scalar_lea.vmem %s5993_s27, 256  ;;  %p5995_p0 = scmp.lt.s32.totalorder %s6722_s29, %s5993_s27 }
 0x1f6   : > { %p5990_p10 = pnand %p5988_p3, %p5974_p13  ;;  %p5996_p4 = scmp.lt.s32.totalorder %s5994_s9, %s5987_s24 }
 0x1f8   : > { %p5991_p12 = pneg %p5990_p10  ;;  %p5997_p7 = por %p5996_p4, %p5995_p0 }
 0x1fa   : > { %p5998_p6 = pnand %p5997_p7, %p5991_p12 }
 0x1fc   : > { %6001 = shalt.err (!%p5998_p6)
}
 0x1fd   : > { %5200 = dma.hbm_to_vmem [thread:$0]  (!%p6718_p5), %s6716_s5, 128, %s6722_s29, %s883_s4  }
 0x1fe   : > { %s7320_s7 = sld [smem:[#allocation46_spill]] }
 0x204   : > { %p7321_p2 = scmp.ne.s32.totalorder %s7320_s7, 0 }
 0x205   : > { %s7322_s8 = sld [smem:[#allocation42_spill]] (!%p7321_p2) }
 0x206   : > { %923 = sbr.rel (%p7321_p2) target bundleno = 5028 (0x13a4), region = 124 }
 0x20b   : > { %s925_s2 = sand.u32 (!%p7321_p2), 1, %s7322_s8  }
 0x20c   : > { %s6752_s6 = sshll.u32 (!%p7321_p2), %s925_s2, 3  ;;  %s926_s26 = scalar_lea.sflag (!%p7321_p2), [#allocation3], %s925_s2 }
 0x20d   : > { %s929_s0 = scalar_lea.vmem [#allocation2], %s6752_s6 }
 0x20e   : > { %6019 = dma.done.wait (%p6707_p11), %s926_s26, 128  }
 0x20f   : > { %6021 = vsyncadd (%p6707_p11), %s926_s26, 4294967168  ;;  %s7323_s3 = sld [smem:[#allocation45_spill]] }
 0x215   : > { %p7324_p13 = scmp.eq.s32.totalorder %s7323_s3, 0 }
 0x217   : > { %6023 = dma.done.wait (%p7324_p13), [#allocation5], 32   ;;  %p7325_p5 = pmov %p7324_p13 }
 0x219   : > { %6025 = vsyncadd (%p7325_p5), [#allocation5], 4294967264  ;;  %p7326_p8 = pmov %p7325_p5 }
 0x21a   : > { %p7327_p9 = pmov %p7325_p5 }
 0x21b   : > { %6027 = dma.done.wait (%p7326_p8), [#allocation8], 3120  }
 0x21c   : > { %6029 = vsyncadd (%p7327_p9), [#allocation8], 4294964176  ;;  %p7328_p1 = pmov %p7325_p5 }
 0x21e   : > { %6031 = dma.done.wait (%p7328_p1), [#allocation11], 1040   ;;  %p7329_p3 = pmov %p7328_p1 }
 0x21f   : > { %p7330_p11 = pmov %p7328_p1 }
 0x220   : > { %6033 = vsyncadd (%p7329_p3), [#allocation11], 4294966256 }
 0x221   : > { %6035 = dma.done.wait (%p7330_p11), [#allocation14], 32   ;;  %p7331_p10 = pmov %p7328_p1 }
 0x222   : > { %p7332_p12 = pmov %p7328_p1 }
 0x223   : > { %6037 = vsyncadd (%p7331_p10), [#allocation14], 4294967264 }
 0x224   : > { %6039 = dma.done.wait (%p7332_p12), [#allocation17], 1040   ;;  %p7333_p0 = pmov %p7328_p1 }
 0x226   : > { %6041 = vsyncadd (%p7333_p0), [#allocation17], 4294966256  ;;  %p7334_p4 = pmov %p7333_p0 }
 0x227   : > { %p7335_p7 = pmov %p7333_p0 }
 0x228   : > { %6043 = dma.done.wait (%p7334_p4), [#allocation20], 2080  }
 0x229   : > { %6045 = vsyncadd (%p7335_p7), [#allocation20], 4294965216  ;;  %p7336_p6 = pmov %p7333_p0 }
 0x22a   : > { %p7337_p2 = pmov %p7333_p0 }
 0x22b   : > { %6047 = dma.done.wait (%p7336_p6), [#allocation23], 1040  }
 0x22c   : > { %6049 = vsyncadd (%p7337_p2), [#allocation23], 4294966256  ;;  %p7338_p13 = pmov %p7333_p0 }
 0x22d   : > { %p7339_p5 = pmov %p7333_p0 }
 0x22e   : > { %6051 = dma.done.wait (%p7338_p13), [#allocation26], 2080  }
 0x22f   : > { %6053 = vsyncadd (%p7339_p5), [#allocation26], 4294965216  ;;  %p7340_p8 = pmov %p7333_p0 }
 0x230   : > { %p7341_p9 = pmov %p7333_p0 }
 0x231   : > { %6055 = dma.done.wait (%p7340_p8), [#allocation29], 2064  }
 0x232   : > { %6057 = vsyncadd (%p7341_p9), [#allocation29], 4294965232  ;;  %v1098_v0 = vld [vmem:[%s929_s0] sm:$0xff]  ;;  %v6099_v8 = vmov 0.0   ;;  %v5307_v9 = vld [vmem:[#allocation7 + $0x1c] ss:$12 sps:$4 sm:$0xff]   ;;  %v1177_v46 = vlaneseq }
 0x233   : > { %1109 = vadd.xlane.f32.xlu0 %v1098_v0  ;;  %v5303_v5 = vld [vmem:[#allocation7 + $0x4] ss:$12 sps:$4 sm:$0xff]   ;;  %v5305_v6 = vld [vmem:[#allocation7] ss:$12 sps:$4 sm:$0xff]   ;;  %v5306_v7 = vld [vmem:[#allocation7 + $0x8] ss:$12 sps:$4 sm:$0xff]   ;;  %4892 = vmatprep.subr.bf16.mxu1 %v6099_v8 }
 0x234   : > { %1320 = vmatprep.subr.bf16.mxu0 %v5303_v5  ;;  %4893 = vmatpush3.bf16.msra.mxu1 %v5306_v7  ;;  %v5309_v10 = vld [vmem:[#allocation7 + $0x18] ss:$12 sps:$4 sm:$0xff]   ;;  %v5310_v11 = vld [vmem:[#allocation7 + $0x20] ss:$12 sps:$4 sm:$0xff]   ;;  %v5313_v13 = vld [vmem:[#allocation7 + $0x30] ss:$12 sps:$4 sm:$0xff]  }
 0x235   : > { %1321 = vmatpush1.bf16.msra.mxu0 %v5305_v6  ;;  %4894 = vmatprep.subr.bf16.mxu1 %v6099_v8  ;;  %v5311_v12 = vld [vmem:[#allocation7 + $0x34] ss:$12 sps:$4 sm:$0xff]   ;;  %v5314_v14 = vld [vmem:[#allocation7 + $0x38] ss:$12 sps:$4 sm:$0xff]   ;;  %v5318_v17 = vld [vmem:[#allocation7 + $0x50] ss:$12 sps:$4 sm:$0xff]  }
 0x236   : > { %1322 = vmatprep.subr.bf16.mxu0 %v5307_v9  ;;  %v5315_v15 = vld [vmem:[#allocation7 + $0x4c] ss:$12 sps:$4 sm:$0xff]   ;;  %v5317_v16 = vld [vmem:[#allocation7 + $0x48] ss:$12 sps:$4 sm:$0xff]   ;;  %v5319_v18 = vld [vmem:[#allocation7 + $0x64] ss:$12 sps:$4 sm:$0xff]  }
 0x237   : > { %v5321_v19 = vld [vmem:[#allocation7 + $0x60] ss:$12 sps:$4 sm:$0xff]   ;;  %v5322_v20 = vld [vmem:[#allocation7 + $0x68] ss:$12 sps:$4 sm:$0xff]   ;;  %v6100_v22 = vmov 0   ;;  %vm6101_vm0 = vmmov 0  }
 0x238   : > { %4895 = vmatpush3.bf16.msra.mxu1 %v5310_v11  ;;  %v5323_v21 = vld [vmem:[#allocation7 + $0x7c] ss:$12 sps:$4 sm:$0xff]   ;;  %1352 = vmatprep.mubr.bf16.mxu0 %v6100_v22  ;;  %v5325_v23 = vld [vmem:[#allocation7 + $0x78] ss:$12 sps:$4 sm:$0xff]   ;;  %v5326_v24 = vld [vmem:[#allocation7 + $0x80] ss:$12 sps:$4 sm:$0xff]  }
 0x239   : > { %1323 = vmatpush1.bf16.msra.mxu0 %v5309_v10  ;;  %4896 = vmatprep.subr.bf16.mxu1 %v6099_v8  ;;  %v5327_v25 = vld [vmem:[#allocation7 + $0x94] ss:$12 sps:$4 sm:$0xff]   ;;  %v5329_v26 = vld [vmem:[#allocation7 + $0x90] ss:$12 sps:$4 sm:$0xff]   ;;  %v5330_v27 = vld [vmem:[#allocation7 + $0x98] ss:$12 sps:$4 sm:$0xff]  }
 0x23a   : > { %1324 = vmatprep.subr.bf16.mxu0 %v5311_v12  ;;  %4908 = vmatprep.mubr.msk.bf16.mxu1 %vm6101_vm0, %v6099_v8  ;;  %v5331_v28 = vld [vmem:[#allocation7 + $0xac] ss:$12 sps:$4 sm:$0xff]   ;;  %v5333_v29 = vld [vmem:[#allocation7 + $0xa8] ss:$12 sps:$4 sm:$0xff]   ;;  %v5334_v30 = vld [vmem:[#allocation7 + $0xb0] ss:$12 sps:$4 sm:$0xff]  }
 0x23b   : > { %v4662_v40 = vld [vmem:[#allocation4] ss:$0 sm:$0xff]  ;;  %v4663_v42 = vld [vmem:[#allocation6] ss:$0 sm:$0xff]  ;;  %v6819_v47 = vshrl.u32 %v1177_v46, 7  ;;  %s6102_s5 = smov 32  }
 0x23c   : > { %4897 = vmatpush3.bf16.msra.mxu1 %v5314_v14  ;;  %v6824_v49 = vld [vmem:[#allocation9] sm:$0x7]  ;;  %s6103_s30 = smov 96   ;;  %s6104_s29 = smov 64   ;;  %v6105_v63 = vmov 1983009808  }
 0x23d   : > { %1325 = vmatpush1.bf16.msra.mxu0 %v5313_v13  ;;  %4898 = vmatprep.subr.bf16.mxu1 %v6099_v8  ;;  %v6822_v48 = vsub.s32 1, %v6819_v47  ;;  %v6831_v55 = vsub.s32 0, %v6819_v47  ;;  %vm1868_vm3 = vcmask 261120   ;;  %p1081_p1 = scmp.lt.s32.totalorder %s7323_s3, 1  ;;  %s7342_s9 = sld [smem:[#allocation49_spill]]  ;;  %vm2061_vm5 = vcmask 64512  }
 0x23e   : > { %1326 = vmatprep.subr.bf16.mxu0 %v5315_v15  ;;  %vm2113_vm6 = vcmask 1043456   ;;  %vm2444_vm7 = vcmask 523264   ;;  %vm2446_vm8 = vcmask 785408   ;;  %s7343_s6 = sld [smem:[#allocation48_spill]]  ;;  %s7344_s24 = sld [smem:[#allocation50_spill]] }
 0x23f   : > { %v1184_v50 = vrot.slane %v6824_v49, %v6822_v48  ;;  %v1180_v61 = vrot.slane %v6824_v49, %v6831_v55  ;;  %s7352_s3 = smov (!%p1081_p1, %s7323_s3), 1  ;;  %s7346_s8 = sld [smem:[#allocation59_spill]] }
 0x240   : > { %4899 = vmatpush3.bf16.msra.mxu1 %v5318_v17  ;;  %s6901_s4 = sshll.u32 %s7352_s3, 3 }
 0x241   : > { %1327 = vmatpush1.bf16.msra.mxu0 %v5317_v16  ;;  %4900 = vmatprep.subr.bf16.mxu1 %v6099_v8 }
 0x242   : > { %1328 = vmatprep.subr.bf16.mxu0 %v5319_v18 }
 0x243   : > { %s1088_s7 = scalar_lea.vmem %s7342_s9, %s6901_s4 }
 0x244   : > { %4901 = vmatpush3.bf16.msra.mxu1 %v5322_v20  ;;  %s1084_s26 = scalar_lea.vmem %s7343_s6, %s6901_s4  ;;  %s1092_s27 = scalar_lea.vmem %s7344_s24, %s6901_s4 }
 0x245   : > { %1329 = vmatpush1.bf16.msra.mxu0 %v5321_v19  ;;  %4902 = vmatprep.subr.bf16.mxu1 %v6099_v8 }
 0x246   : > { %1330 = vmatprep.subr.bf16.mxu0 %v5323_v21 }
 0x248   : > { %4903 = vmatpush3.bf16.msra.mxu1 %v5326_v24 }
 0x249   : > { %1331 = vmatpush1.bf16.msra.mxu0 %v5325_v23  ;;  %4904 = vmatprep.subr.bf16.mxu1 %v6099_v8 }
 0x24a   : > { %1332 = vmatprep.subr.bf16.mxu0 %v5327_v25 }
 0x24c   : > { %4905 = vmatpush3.bf16.msra.mxu1 %v5330_v27 }
 0x24d   : > { %1333 = vmatpush1.bf16.msra.mxu0 %v5329_v26  ;;  %4906 = vmatprep.subr.bf16.mxu1 %v6099_v8 }
 0x24e   : > { %1334 = vmatprep.subr.bf16.mxu0 %v5331_v28 }
 0x250   : > { %4907 = vmatpush3.bf16.msra.mxu1 %v5334_v30 }
 0x251   : > { %1335 = vmatpush1.bf16.msra.mxu0 %v5333_v29  ;;  %4912 = vmatprep.subr.bf16.mxu1 %v6099_v8 }
 0x252   : > { %4936 = vmatprep.subr.bf16.mxu0 %v6099_v8 }
 0x2c0   : > { %v1110_v1 = vpop.xlane.xlu0 %1109 }
 0x2c1   : > { %v1112_v2 = vmul.f32 0.0078125, %v1110_v1  ;;  %v6106_v1 = vmov 1934713408  }
 0x2c3   : > { %v6797_v3 = vsub.f32 %v1098_v0, %v1112_v2  ;;  %v1431_v0 = vunpack.c.l.s4 %v6105_v63  ;;  %v1463_v2 = vunpack.c.l.s4 %v6106_v1 }
 0x2c5   : > { %v1114_v4 = vmul.f32 %v6797_v3, %v6797_v3  ;;  %v1464_v6 = vunpack.c.0.s8 %v1463_v2 }
 0x2c7   : > { %1115 = vadd.xlane.f32.xlu0 %v1114_v4  ;;  %v6845_v14 = vsub.s32 %v1464_v6, %v6819_v47 }
 0x354   : > { %v1116_v31 = vpop.xlane.xlu0 %1115 }
 0x355   : > { %v1117_v32 = vmul.f32 0.007874016, %v1116_v31 }
 0x357   : > { %5423 = vrsqrt.f32 %v1117_v32  ;;  %vm1120_vm1 = vcmp.eq.f32.partialorder %v1117_v32, inf  ;;  %v1123_v35 = vand.u32 2147483648, %v1117_v32  ;;  %vm1122_vm2 = vcmp.eq.f32.partialorder %v1117_v32, 0.0 }
 0x361   : > { %v5424_v33 = vpop.eup %5423 }
 0x362   : > { %v1119_v34 = vmul.f32 %v5424_v33, %v1117_v32 }
 0x364   : > { %v1121_v36 = vsel %vm1120_vm1, %v1117_v32, %v1119_v34 }
 0x365   : > { %v1124_v37 = vsel %vm1122_vm2, %v1123_v35, %v1121_v36 }
 0x366   : > { %v1125_v38 = vadd.f32 1e-06, %v1124_v37 }
 0x368   : > { %5425 = vrcp.f32 %v1125_v38 }
 0x372   : > { %v5426_v39 = vpop.eup %5425 }
 0x373   : > { %v1127_v41 = vmul.f32 %v5426_v39, %v6797_v3  ;;  %v1432_v3 = vunpack.c.0.s8 %v1431_v0 }
 0x375   : > { %v1134_v43 = vmul.f32 %v4662_v40, %v1127_v41  ;;  %v6842_v7 = vsub.s32 %v1432_v3, %v6819_v47 }
 0x377   : > { %v1141_v44 = vadd.f32 %v4663_v42, %v1134_v43 }
 0x379   : > { %v1142_v45 = vpack.c.bf16 %v1141_v44, %v1141_v44 }
 0x37b   : > { %1353 = vmatmul.mubr.bf16.vlgmr.msra.gmra.mrb[0].mxu0 %v1142_v45  ;;  %4909 = vmatmul.mubr.bf16.vlgmr.msra.gmra.mrb[0].mxu1 %v1142_v45 }
 0x37c   : > { %4914 = vmatprep.mubr.msk.bf16.mxu1 %vm6101_vm0, %v6099_v8  ;;  %4938 = vmatprep.mubr.msk.bf16.mxu0 %vm6101_vm0, %v6099_v8 }
 0x44e   : > { %v1354_v51 = vpop.f32.mrb[0].mxu0  ;;  %v6828_v52 = vpop.f32.mrb[0].mxu1 }
 0x44f   : > { %v1356_v53 = vpop.f32.mrb[1].mxu0  ;;  %v4910_v54 = vpop.f32.mrb[1].mxu1  ;;  %v1355_v62 = vadd.f32 %v1354_v51, %v1180_v61 }
 0x450   : > { %v1357_v56 = vadd.f32 %v1356_v53, %v1184_v50  ;;  %v1358_v57 = vpop.f32.mrb[2].mxu0  ;;  %v1398_v58 = vpop.f32.mrb[2].mxu1 }
 0x451   : > { %v1359_v59 = vpop.f32.mrb[3].mxu0  ;;  %v4911_v60 = vpop.f32.mrb[3].mxu1 }
 0x452   : > { %1575 = vrot.lane.b32.xlu0 %v1357_v56, %s6102_s5  ;;  %1569 = vrot.lane.b32.xlu1 %v1357_v56, %s6103_s30 }
 0x456   : > { %1572 = vrot.lane.b32.xlu1 %v1357_v56, %s6104_s29 }
 0x45a   : > { %1419 = vrot.lane.b32.xlu1 %v1355_v62, %s6103_s30 }
 0x45e   : > { %1422 = vrot.lane.b32.xlu1 %v1355_v62, %s6104_s29 }
 0x462   : > { %1425 = vrot.lane.b32.xlu1 %v1355_v62, %s6102_s5 }
 0x4c4   : > { %v1576_v4 = vpop.permute.xlu0 %1575  ;;  %v1570_v5 = vpop.permute.xlu1 %1569 }
 0x4c5   : > { %v1594_v9 = vcombine.low %v1570_v5, %v1576_v4  ;;  %v1595_v10 = vcombine.high %v1570_v5, %v1576_v4 }
 0x4c7   : > { %v1602_v15 = vrot.slane %v1594_v9, %v6842_v7  ;;  %v1609_v16 = vrot.slane %v1595_v10, %v6842_v7 }
 0x4c8   : > { %v1573_v11 = vpop.permute.xlu1 %1572 }
 0x4c9   : > { %v1578_v12 = vcombine.low %v1357_v56, %v1573_v11  ;;  %v1579_v13 = vcombine.high %v1357_v56, %v1573_v11 }
 0x4cb   : > { %v1586_v17 = vrot.slane %v1578_v12, %v6842_v7  ;;  %v1593_v18 = vrot.slane %v1579_v13, %v6842_v7 }
 0x4cc   : > { %v1420_v19 = vpop.permute.xlu1 %1419 }
 0x4cd   : > { %v1610_v20 = vcombine.low %v1586_v17, %v1602_v15  ;;  %v1611_v21 = vcombine.high %v1586_v17, %v1602_v15  ;;  %v1626_v23 = vcombine.low %v1593_v18, %v1609_v16  ;;  %v1627_v24 = vcombine.high %v1593_v18, %v1609_v16 }
 0x4cf   : > { %v1618_v25 = vrot.slane %v1610_v20, %v6845_v14  ;;  %v1625_v26 = vrot.slane %v1611_v21, %v6845_v14  ;;  %v1634_v27 = vrot.slane %v1626_v23, %v6845_v14  ;;  %v1641_v28 = vrot.slane %v1627_v24, %v6845_v14 }
 0x4d0   : > { %v1423_v29 = vpop.permute.xlu1 %1422 }
 0x4d1   : > { %v1646_v30 = vcombine.low %v1618_v25, %v1625_v26  ;;  %v4690_v31 = vcombine.high %v1618_v25, %v1625_v26  ;;  %v1662_v32 = vcombine.low %v1634_v27, %v1641_v28  ;;  %v4691_v33 = vcombine.high %v1634_v27, %v1641_v28 }
 0x4d2   : > { %v1428_v34 = vcombine.low %v1355_v62, %v1423_v29  ;;  %v1429_v35 = vcombine.high %v1355_v62, %v1423_v29 }
 0x4d3   : > { %v1653_v36 = vrot.slane %v1646_v30, %v6842_v7  ;;  %v1661_v37 = vrot.slane %v4690_v31, %v6842_v7  ;;  %v1669_v38 = vrot.slane %v1662_v32, %v6842_v7  ;;  %v1677_v39 = vrot.slane %v4691_v33, %v6842_v7 }
 0x4d4   : > { %v1426_v40 = vpop.permute.xlu1 %1425  ;;  %v1436_v45 = vrot.slane %v1428_v34, %v6842_v7  ;;  %v1443_v46 = vrot.slane %v1429_v35, %v6842_v7 }
 0x4d5   : > { %v1444_v41 = vcombine.low %v1420_v19, %v1426_v40  ;;  %v1445_v42 = vcombine.high %v1420_v19, %v1426_v40  ;;  %v1678_v43 = vcombine.low %v1653_v36, %v1661_v37  ;;  %v1694_v44 = vcombine.low %v1669_v38, %v1677_v39 }
 0x4d6   : > { %v1679_v13 = vcombine.high %v1653_v36, %v1661_v37  ;;  %v1695_v18 = vcombine.high %v1669_v38, %v1677_v39 }
 0x4d7   : > { %v1452_v50 = vrot.slane %v1444_v41, %v6842_v7  ;;  %v1459_v51 = vrot.slane %v1445_v42, %v6842_v7  ;;  %v1686_v53 = vrot.slane %v1678_v43, %v6845_v14  ;;  %v1702_v54 = vrot.slane %v1694_v44, %v6845_v14  ;;  %v1101_v44 = vld [vmem:[%s1088_s7] sm:$0xff] }
 0x4d8   : > { %v1693_v24 = vrot.slane %v1679_v13, %v6845_v14  ;;  %v1709_v25 = vrot.slane %v1695_v18, %v6845_v14  ;;  %vm1102_vm4 = vcmp.ne.f32.partialorder %v1101_v44, 0.0 }
 0x4d9   : > { %v1460_v56 = vcombine.low %v1436_v45, %v1452_v50  ;;  %v1461_v57 = vcombine.high %v1436_v45, %v1452_v50  ;;  %v1476_v58 = vcombine.low %v1443_v46, %v1459_v51  ;;  %v1477_v59 = vcombine.high %v1443_v46, %v1459_v51 }
 0x4da   : > { %v1710_v60 = vcombine.low %v1686_v53, %v1702_v54  ;;  %v1711_v17 = vcombine.high %v1686_v53, %v1702_v54  ;;  %v1712_v28 = vcombine.low %v1693_v24, %v1709_v25  ;;  %v1713_v37 = vcombine.high %v1693_v24, %v1709_v25 }
 0x4db   : > { %v1468_v61 = vrot.slane %v1460_v56, %v6845_v14  ;;  %v1475_v62 = vrot.slane %v1461_v57, %v6845_v14  ;;  %v1484_v63 = vrot.slane %v1476_v58, %v6845_v14  ;;  %v1491_v0 = vrot.slane %v1477_v59, %v6845_v14 }
 0x4dc   : > { %v1714_v1 = vpack.c.bf16 %v1710_v60, %v1710_v60  ;;  %v1715_v23 = vpack.c.bf16 %v1711_v17, %v1711_v17  ;;  %v1716_v32 = vpack.c.bf16 %v1712_v28, %v1712_v28  ;;  %v1717_v39 = vpack.c.bf16 %v1713_v37, %v1713_v37 }
 0x4dd   : > { %v1496_v2 = vcombine.low %v1468_v61, %v1475_v62  ;;  %v4688_v3 = vcombine.high %v1468_v61, %v1475_v62  ;;  %v1512_v4 = vcombine.low %v1484_v63, %v1491_v0  ;;  %v4689_v5 = vcombine.high %v1484_v63, %v1491_v0 }
 0x4de   : > { %v1873_v6 = vsel %vm1868_vm3, %v1714_v1, 0  ;;  %v1919_v27 = vsel %vm1868_vm3, %v1715_v23, 0  ;;  %v1965_v36 = vsel %vm1868_vm3, %v1716_v32, 0  ;;  %v2011_v41 = vsel %vm1868_vm3, %v1717_v39, 0 }
 0x4df   : > { %v1503_v9 = vrot.slane %v1496_v2, %v6842_v7  ;;  %v1511_v10 = vrot.slane %v4688_v3, %v6842_v7  ;;  %v1519_v11 = vrot.slane %v1512_v4, %v6842_v7  ;;  %v1527_v12 = vrot.slane %v4689_v5, %v6842_v7  ;;  %4913 = vmatpush3.bf16.xpose.msra.mxu1 %v1873_v6 }
 0x4e0   : > { %4918 = vmatprep.subr.bf16.mxu1 %v6099_v8  ;;  %v6107_v46 = vmov -1e+09  }
 0x4e1   : > { %v1528_v15 = vcombine.low %v1503_v9, %v1511_v10  ;;  %v1544_v16 = vcombine.low %v1519_v11, %v1527_v12  ;;  %v1529_v29 = vcombine.high %v1503_v9, %v1511_v10  ;;  %v1545_v30 = vcombine.high %v1519_v11, %v1527_v12 }
 0x4e2   : > { %v1103_v50 = vsel %vm1102_vm4, 0.0, %v6107_v46 }
 0x4e3   : > { %v1536_v19 = vrot.slane %v1528_v15, %v6845_v14  ;;  %v1552_v20 = vrot.slane %v1544_v16, %v6845_v14  ;;  %v1543_v34 = vrot.slane %v1529_v29, %v6845_v14  ;;  %v1559_v35 = vrot.slane %v1545_v30, %v6845_v14 }
 0x4e5   : > { %v1560_v21 = vcombine.low %v1536_v19, %v1552_v20  ;;  %v1561_v31 = vcombine.high %v1536_v19, %v1552_v20  ;;  %v1562_v38 = vcombine.low %v1543_v34, %v1559_v35  ;;  %v1563_v42 = vcombine.high %v1543_v34, %v1559_v35 }
 0x4e6   : > { %v1187_v19 = vsub.s32 2, %v6819_v47 }
 0x4e7   : > { %v1564_v26 = vpack.c.bf16 %v1560_v21, %v1560_v21  ;;  %v1565_v33 = vpack.c.bf16 %v1561_v31, %v1561_v31  ;;  %v1566_v40 = vpack.c.bf16 %v1562_v38, %v1562_v38  ;;  %v1567_v43 = vpack.c.bf16 %v1563_v42, %v1563_v42 }
 0x4e8   : > { %v1188_v20 = vrot.slane %v6824_v49, %v1187_v19 }
 0x4e9   : > { %4915 = vmatmul.mubr.msk.bf16.vlgmr.msra.gmra.mrb[4].mxu1 %vm1868_vm3, %v1564_v26 }
 0x4ea   : > { %4919 = vmatpush3.bf16.xpose.msra.mxu1 %v1919_v27  ;;  %4920 = vmatprep.mubr.msk.bf16.mxu1 %vm6101_vm0, %v6099_v8  ;;  %v1396_v21 = vadd.f32 %v6828_v52, %v1188_v20 }
 0x4eb   : > { %4924 = vmatprep.subr.bf16.mxu1 %v6099_v8 }
 0x4f1   : > { %4921 = vmatmul.mubr.msk.bf16.vlgmr.msra.gmra.mrb[8].mxu1 %vm1868_vm3, %v1565_v33 }
 0x4f2   : > { %4925 = vmatpush3.bf16.xpose.msra.mxu1 %v1965_v36  ;;  %4926 = vmatprep.mubr.msk.bf16.mxu1 %vm6101_vm0, %v6099_v8 }
 0x4f3   : > { %4930 = vmatprep.subr.bf16.mxu1 %v6099_v8 }
 0x4f9   : > { %4927 = vmatmul.mubr.msk.bf16.vlgmr.msra.gmra.mrb[12].mxu1 %vm1868_vm3, %v1566_v40 }
 0x4fa   : > { %4931 = vmatpush3.bf16.xpose.msra.mxu1 %v2011_v41  ;;  %4932 = vmatprep.mubr.msk.bf16.mxu1 %vm6101_vm0, %v6099_v8 }
 0x4fb   : > { %4942 = vmatprep.subr.bf16.mxu1 %v6099_v8 }
 0x501   : > { %4933 = vmatmul.mubr.msk.bf16.vlgmr.msra.gmra.mrb[16].mxu1 %vm1868_vm3, %v1567_v43 }
 0x502   : > { %4944 = vmatprep.mubr.msk.bf16.mxu1 %vm6101_vm0, %v6099_v8 }
 0x5bc   : > { %v1909_v45 = vpop.f32.mrb[4].mxu1 }
 0x5bd   : > { %v2053_v51 = vmul.f32 0.17677669, %v1909_v45  ;;  %v4916_v53 = vpop.f32.mrb[5].mxu1 }
 0x5be   : > { %v1912_v54 = vpop.f32.mrb[6].mxu1 }
 0x5bf   : > { %v4917_v56 = vpop.f32.mrb[7].mxu1  ;;  %v2057_v57 = vadd.f32 %v2053_v51, %v1103_v50 }
 0x5c1   : > { %v2062_v58 = vsel %vm2061_vm5, %v2057_v57, -inf }
 0x5c2   : > { %2063 = vmax.xlane.f32.xlu1 %v2062_v58 }
 0x5c4   : > { %v1955_v59 = vpop.f32.mrb[8].mxu1 }
 0x5c5   : > { %v2054_v60 = vmul.f32 0.17677669, %v1955_v59  ;;  %v4922_v61 = vpop.f32.mrb[9].mxu1 }
 0x5c6   : > { %v1958_v62 = vpop.f32.mrb[10].mxu1 }
 0x5c7   : > { %v4923_v63 = vpop.f32.mrb[11].mxu1  ;;  %v2058_v0 = vadd.f32 %v2054_v60, %v1103_v50 }
 0x5c9   : > { %v2065_v1 = vsel %vm2061_vm5, %v2058_v0, -inf }
 0x5ca   : > { %2066 = vmax.xlane.f32.xlu0 %v2065_v1 }
 0x5cc   : > { %v2001_v2 = vpop.f32.mrb[12].mxu1 }
 0x5cd   : > { %v2055_v3 = vmul.f32 0.17677669, %v2001_v2  ;;  %v4928_v4 = vpop.f32.mrb[13].mxu1 }
 0x5ce   : > { %v2004_v5 = vpop.f32.mrb[14].mxu1 }
 0x5cf   : > { %v4929_v6 = vpop.f32.mrb[15].mxu1  ;;  %v2059_v9 = vadd.f32 %v2055_v3, %v1103_v50 }
 0x5d1   : > { %v2068_v10 = vsel %vm2061_vm5, %v2059_v9, -inf }
 0x5d2   : > { %2069 = vmax.xlane.f32.xlu1 %v2068_v10 }
 0x5d4   : > { %v2047_v11 = vpop.f32.mrb[16].mxu1 }
 0x5d5   : > { %v2056_v12 = vmul.f32 0.17677669, %v2047_v11  ;;  %v4934_v13 = vpop.f32.mrb[17].mxu1 }
 0x5d6   : > { %v2050_v15 = vpop.f32.mrb[18].mxu1 }
 0x5d7   : > { %v4935_v16 = vpop.f32.mrb[19].mxu1  ;;  %v2060_v17 = vadd.f32 %v2056_v12, %v1103_v50 }
 0x5d9   : > { %v2071_v18 = vsel %vm2061_vm5, %v2060_v17, -inf }
 0x5da   : > { %2072 = vmax.xlane.f32.xlu1 %v2071_v18 }
 0x5eb   : > { %1722 = vrot.lane.b32.xlu1 %v1396_v21, %s6104_s29 }
 0x64f   : > { %v2064_v23 = vpop.xlane.xlu1 %2063 }
 0x650   : > { %v2074_v24 = vsub.f32 %v2057_v57, %v2064_v23 }
 0x652   : > { %v2078_v25 = vmul.f32 1.442695, %v2074_v24 }
 0x654   : > { %5427 = vpow2.f32 %v2078_v25 }
 0x657   : > { %v2067_v26 = vpop.xlane.xlu0 %2066 }
 0x658   : > { %v2075_v27 = vsub.f32 %v2058_v0, %v2067_v26 }
 0x65a   : > { %v2080_v28 = vmul.f32 1.442695, %v2075_v27 }
 0x65c   : > { %5429 = vpow2.f32 %v2080_v28 }
 0x65e   : > { %v6916_v29 = vpop.eup %5427 }
 0x65f   : > { %v2086_v30 = vsel %vm2061_vm5, %v6916_v29, 0.0  ;;  %v2070_v52 = vpop.xlane.xlu1 %2069 }
 0x660   : > { %2087 = vadd.xlane.f32.xlu0 %v2086_v30  ;;  %v2076_v31 = vsub.f32 %v2059_v9, %v2070_v52 }
 0x662   : > { %v2082_v32 = vmul.f32 1.442695, %v2076_v31 }
 0x664   : > { %5431 = vpow2.f32 %v2082_v32 }
 0x666   : > { %v6920_v47 = vpop.eup %5429 }
 0x667   : > { %v2089_v49 = vsel %vm2061_vm5, %v6920_v47, 0.0  ;;  %v2073_v33 = vpop.xlane.xlu1 %2072 }
 0x668   : > { %2090 = vadd.xlane.f32.xlu1 %v2089_v49  ;;  %v2077_v34 = vsub.f32 %v2060_v17, %v2073_v33 }
 0x66a   : > { %v2084_v35 = vmul.f32 1.442695, %v2077_v34 }
 0x66b   : > { %v1723_v40 = vpop.permute.xlu1 %1722 }
 0x66c   : > { %5433 = vpow2.f32 %v2084_v35  ;;  %v1728_v43 = vcombine.low %v1396_v21, %v1723_v40  ;;  %v1729_v44 = vcombine.high %v1396_v21, %v1723_v40 }
 0x66e   : > { %v6926_v36 = vpop.eup %5431  ;;  %v1736_v54 = vrot.slane %v1728_v43, %v6842_v7  ;;  %v1743_v56 = vrot.slane %v1729_v44, %v6842_v7 }
 0x66f   : > { %v2092_v37 = vsel %vm2061_vm5, %v6926_v36, 0.0 }
 0x676   : > { %1719 = vrot.lane.b32.xlu0 %v1396_v21, %s6103_s30  ;;  %v6930_v38 = vpop.eup %5433 }
 0x677   : > { %v2095_v39 = vsel %vm2061_vm5, %v6930_v38, 0.0 }
 0x679   : > { %1725 = vrot.lane.b32.xlu1 %v1396_v21, %s6102_s5 }
 0x695   : > { %2093 = vadd.xlane.f32.xlu0 %v2092_v37 }
 0x69d   : > { %2096 = vadd.xlane.f32.xlu1 %v2095_v39 }
 0x6ed   : > { %v2088_v41 = vpop.xlane.xlu0 %2087 }
 0x6ee   : > { %5435 = vrcp.f32 %v2088_v41 }
 0x6f1   : > { %v1720_v45 = vpop.permute.xlu0 %1719 }
 0x6f5   : > { %v2091_v42 = vpop.xlane.xlu1 %2090 }
 0x6f6   : > { %5437 = vrcp.f32 %v2091_v42 }
 0x6f8   : > { %v5436_v18 = vpop.eup %5435 }
 0x6f9   : > { %v1726_v50 = vpop.permute.xlu1 %1725  ;;  %v2102_v30 = vmul.f32 %v5436_v18, %v6916_v29 }
 0x6fa   : > { %v1744_v51 = vcombine.low %v1720_v45, %v1726_v50  ;;  %v1745_v53 = vcombine.high %v1720_v45, %v1726_v50 }
 0x6fb   : > { %v2106_v37 = vpack.c.bf16 %v2102_v30, %v2102_v30 }
 0x6fc   : > { %v1752_v57 = vrot.slane %v1744_v51, %v6842_v7  ;;  %v1759_v58 = vrot.slane %v1745_v53, %v6842_v7  ;;  %v5335_v53 = vld [vmem:[#allocation10] sm:$0xff]  }
 0x6fe   : > { %v1760_v59 = vcombine.low %v1736_v54, %v1752_v57  ;;  %v1761_v60 = vcombine.high %v1736_v54, %v1752_v57  ;;  %v1776_v61 = vcombine.low %v1743_v56, %v1759_v58  ;;  %v1777_v62 = vcombine.high %v1743_v56, %v1759_v58  ;;  %v5336_v54 = vld [vmem:[#allocation10 + $0x8] sm:$0xff]   ;;  %v5338_v56 = vld [vmem:[#allocation10 + $0x18] sm:$0xff]  }
 0x6ff   : > { %v5340_v57 = vld [vmem:[#allocation10 + $0x28] sm:$0xff]  }
 0x700   : > { %v1768_v63 = vrot.slane %v1760_v59, %v6845_v14  ;;  %v1775_v0 = vrot.slane %v1761_v60, %v6845_v14  ;;  %v1784_v1 = vrot.slane %v1776_v61, %v6845_v14  ;;  %v1791_v2 = vrot.slane %v1777_v62, %v6845_v14  ;;  %v5438_v24 = vpop.eup %5437 }
 0x701   : > { %v2103_v49 = vmul.f32 %v5438_v24, %v6920_v47 }
 0x702   : > { %v1796_v3 = vcombine.low %v1768_v63, %v1775_v0  ;;  %v4692_v4 = vcombine.high %v1768_v63, %v1775_v0  ;;  %v1812_v5 = vcombine.low %v1784_v1, %v1791_v2  ;;  %v4693_v6 = vcombine.high %v1784_v1, %v1791_v2 }
 0x703   : > { %v2107_v39 = vpack.c.bf16 %v2103_v49, %v2103_v49 }
 0x704   : > { %v1803_v9 = vrot.slane %v1796_v3, %v6842_v7  ;;  %v1811_v10 = vrot.slane %v4692_v4, %v6842_v7  ;;  %v1819_v11 = vrot.slane %v1812_v5, %v6842_v7  ;;  %v1827_v12 = vrot.slane %v4693_v6, %v6842_v7 }
 0x706   : > { %v1828_v13 = vcombine.low %v1803_v9, %v1811_v10  ;;  %v1844_v15 = vcombine.low %v1819_v11, %v1827_v12  ;;  %v1829_v16 = vcombine.high %v1803_v9, %v1811_v10  ;;  %v1845_v17 = vcombine.high %v1819_v11, %v1827_v12 }
 0x708   : > { %v1836_v19 = vrot.slane %v1828_v13, %v6845_v14  ;;  %v1852_v20 = vrot.slane %v1844_v15, %v6845_v14  ;;  %v1843_v21 = vrot.slane %v1829_v16, %v6845_v14  ;;  %v1859_v23 = vrot.slane %v1845_v17, %v6845_v14 }
 0x70a   : > { %v1860_v25 = vcombine.low %v1836_v19, %v1852_v20  ;;  %v1861_v26 = vcombine.high %v1836_v19, %v1852_v20  ;;  %v1862_v27 = vcombine.low %v1843_v21, %v1859_v23  ;;  %v1863_v28 = vcombine.high %v1843_v21, %v1859_v23 }
 0x70c   : > { %v1864_v52 = vpack.c.bf16 %v1860_v25, %v1860_v25  ;;  %v1865_v31 = vpack.c.bf16 %v1861_v26, %v1861_v26  ;;  %v1866_v34 = vpack.c.bf16 %v1862_v27, %v1862_v27  ;;  %v1867_v35 = vpack.c.bf16 %v1863_v28, %v1863_v28  ;;  %v5341_v26 = vld [vmem:[#allocation10 + $0x30] sm:$0xff]  }
 0x70e   : > { %v2115_v32 = vsel %vm2113_vm6, %v1864_v52, 0  ;;  %v2161_v33 = vsel %vm2113_vm6, %v1865_v31, 0  ;;  %v2207_v29 = vsel %vm2113_vm6, %v1866_v34, 0  ;;  %v2253_v47 = vsel %vm2113_vm6, %v1867_v35, 0  ;;  %v5342_v34 = vld [vmem:[#allocation10 + $0x38] sm:$0xff]  }
 0x70f   : > { %4937 = vmatpush3.bf16.msra.mxu0 %v2115_v32  ;;  %4943 = vmatpush3.bf16.msra.mxu1 %v2161_v33 }
 0x710   : > { %4948 = vmatprep.subr.bf16.mxu0 %v6099_v8  ;;  %4954 = vmatprep.subr.bf16.mxu1 %v6099_v8 }
 0x712   : > { %4939 = vmatmul.mubr.msk.bf16.vlgmr.msra.gmra.mrb[4].mxu0 %vm2061_vm5, %v2106_v37  ;;  %4945 = vmatmul.mubr.msk.bf16.vlgmr.msra.gmra.mrb[20].mxu1 %vm2061_vm5, %v2107_v39 }
 0x713   : > { %4949 = vmatpush3.bf16.msra.mxu0 %v2207_v29  ;;  %4955 = vmatpush3.bf16.msra.mxu1 %v2253_v47 }
 0x714   : > { %4950 = vmatprep.mubr.msk.bf16.mxu0 %vm6101_vm0, %v6099_v8  ;;  %4956 = vmatprep.mubr.msk.bf16.mxu1 %vm6101_vm0, %v6099_v8 }
 0x715   : > { %4960 = vmatprep.subr.bf16.mxu0 %v6099_v8  ;;  %4980 = vmatprep.subr.bf16.mxu1 %v6099_v8 }
 0x722   : > { %v2094_v40 = vpop.xlane.xlu0 %2093 }
 0x723   : > { %5439 = vrcp.f32 %v2094_v40 }
 0x72a   : > { %v2097_v41 = vpop.xlane.xlu1 %2096 }
 0x72b   : > { %5441 = vrcp.f32 %v2097_v41 }
 0x72d   : > { %v5440_v42 = vpop.eup %5439 }
 0x72e   : > { %v2104_v43 = vmul.f32 %v5440_v42, %v6926_v36  ;;  %v5337_v36 = vld [vmem:[#allocation10 + $0x10] sm:$0xff]  }
 0x730   : > { %v2108_v44 = vpack.c.bf16 %v2104_v43, %v2104_v43 }
 0x732   : > { %4951 = vmatmul.mubr.msk.bf16.vlgmr.msra.gmra.mrb[8].mxu0 %vm2061_vm5, %v2108_v44 }
 0x733   : > { %4976 = vmatprep.mubr.msk.bf16.mxu0 %vm6101_vm0, %v6099_v8  ;;  %4961 = vmatpush3.bf16.msra.mxu0 %v5335_v53 }
 0x734   : > { %4962 = vmatprep.subr.bf16.mxu0 %v6099_v8 }
 0x735   : > { %v5442_v45 = vpop.eup %5441 }
 0x736   : > { %v2105_v50 = vmul.f32 %v5442_v45, %v6930_v38  ;;  %v5339_v38 = vld [vmem:[#allocation10 + $0x20] sm:$0xff]  }
 0x737   : > { %4963 = vmatpush3.bf16.msra.mxu0 %v5336_v54 }
 0x738   : > { %v2109_v51 = vpack.c.bf16 %v2105_v50, %v2105_v50  ;;  %4964 = vmatprep.subr.bf16.mxu0 %v6099_v8 }
 0x73a   : > { %4957 = vmatmul.mubr.msk.bf16.vlgmr.msra.gmra.mrb[24].mxu1 %vm2061_vm5, %v2109_v51 }
 0x73b   : > { %4996 = vmatprep.mubr.msk.bf16.mxu1 %vm6101_vm0, %v6099_v8  ;;  %4965 = vmatpush3.bf16.msra.mxu0 %v5337_v36 }
 0x73c   : > { %4966 = vmatprep.subr.bf16.mxu0 %v6099_v8 }
 0x73f   : > { %4967 = vmatpush3.bf16.msra.mxu0 %v5338_v56 }
 0x740   : > { %4968 = vmatprep.subr.bf16.mxu0 %v6099_v8 }
 0x743   : > { %4969 = vmatpush3.bf16.msra.mxu0 %v5339_v38 }
 0x744   : > { %4970 = vmatprep.subr.bf16.mxu0 %v6099_v8 }
 0x747   : > { %4971 = vmatpush3.bf16.msra.mxu0 %v5340_v57 }
 0x748   : > { %4972 = vmatprep.subr.bf16.mxu0 %v6099_v8 }
 0x74b   : > { %4973 = vmatpush3.bf16.msra.mxu0 %v5341_v26  ;;  %v1099_v26 = vld [vmem:[%s1084_s26] sm:$0xff]  ;;  %s7347_s26 = sld [smem:[#allocation60_spill]] }
 0x74c   : > { %4974 = vmatprep.subr.bf16.mxu0 %v6099_v8 }
 0x74f   : > { %4975 = vmatpush3.bf16.msra.mxu0 %v5342_v34  ;;  %v5370_v34 = vld [vmem:[#allocation16 + $0x18] sm:$0xff]  }
 0x7e5   : > { %v2151_v58 = vpop.f32.mrb[4].mxu0  ;;  %v2197_v59 = vpop.f32.mrb[20].mxu1 }
 0x7e6   : > { %v4940_v60 = vpop.f32.mrb[5].mxu0  ;;  %v4946_v61 = vpop.f32.mrb[21].mxu1 }
 0x7e7   : > { %v2154_v62 = vpop.f32.mrb[6].mxu0  ;;  %v2200_v63 = vpop.f32.mrb[22].mxu1 }
 0x7e8   : > { %v4941_v0 = vpop.f32.mrb[7].mxu0  ;;  %v4947_v1 = vpop.f32.mrb[23].mxu1  ;;  %v4704_v62 = vld [vmem:[#allocation12] ss:$0 sm:$0xff] }
 0x805   : > { %v2243_v2 = vpop.f32.mrb[8].mxu0 }
 0x806   : > { %v2295_v3 = vcombine.low %v2151_v58, %v2243_v2  ;;  %v2296_v4 = vcombine.high %v2151_v58, %v2243_v2  ;;  %v4952_v5 = vpop.f32.mrb[9].mxu0 }
 0x807   : > { %v2246_v6 = vpop.f32.mrb[10].mxu0 }
 0x808   : > { %v4953_v9 = vpop.f32.mrb[11].mxu0  ;;  %v2303_v16 = vrot.slane %v2295_v3, %v6842_v7  ;;  %v2310_v17 = vrot.slane %v2296_v4, %v6842_v7  ;;  %v5467_v3 = vld [vmem:[%s929_s0] sm:$0xff]  ;;  %s1096_s0 = scalar_lea.vmem %s7347_s26, %s6901_s4 }
 0x809   : > { %v5343_v6 = vld [vmem:[#allocation19] ss:$8 sps:$4 sm:$0xff]   ;;  %v5345_v9 = vld [vmem:[#allocation19 + $0x4] ss:$8 sps:$4 sm:$0xff]  }
 0x80a   : > { %2798 = vmatprep.subr.bf16.mxu0 %v5345_v9 }
 0x80d   : > { %v2289_v10 = vpop.f32.mrb[24].mxu1 }
 0x80e   : > { %v2311_v11 = vcombine.low %v2197_v59, %v2289_v10  ;;  %v2312_v12 = vcombine.high %v2197_v59, %v2289_v10  ;;  %v4958_v13 = vpop.f32.mrb[25].mxu1  ;;  %v5348_v10 = vld [vmem:[#allocation19 + $0x14] ss:$8 sps:$4 sm:$0xff]  }
 0x80f   : > { %v2292_v15 = vpop.f32.mrb[26].mxu1  ;;  %v5349_v13 = vld [vmem:[#allocation19 + $0x20] ss:$8 sps:$4 sm:$0xff]  }
 0x810   : > { %v2319_v18 = vrot.slane %v2311_v11, %v6842_v7  ;;  %v2326_v19 = vrot.slane %v2312_v12, %v6842_v7  ;;  %v4959_v20 = vpop.f32.mrb[27].mxu1  ;;  %v5346_v11 = vld [vmem:[#allocation19 + $0x10] ss:$8 sps:$4 sm:$0xff]   ;;  %v5351_v12 = vld [vmem:[#allocation19 + $0x24] ss:$8 sps:$4 sm:$0xff]  }
 0x811   : > { %v5354_v15 = vld [vmem:[#allocation19 + $0x34] ss:$8 sps:$4 sm:$0xff]   ;;  %v5358_v20 = vld [vmem:[#allocation19 + $0x50] ss:$8 sps:$4 sm:$0xff]  }
 0x812   : > { %v2327_v21 = vcombine.low %v2303_v16, %v2319_v18  ;;  %v2328_v23 = vcombine.high %v2303_v16, %v2319_v18  ;;  %v2343_v24 = vcombine.low %v2310_v17, %v2326_v19  ;;  %v2344_v25 = vcombine.high %v2310_v17, %v2326_v19  ;;  %v5352_v16 = vld [vmem:[#allocation19 + $0x30] ss:$8 sps:$4 sm:$0xff]   ;;  %v5357_v17 = vld [vmem:[#allocation19 + $0x44] ss:$8 sps:$4 sm:$0xff]   ;;  %v5355_v18 = vld [vmem:[#allocation19 + $0x40] ss:$8 sps:$4 sm:$0xff]  }
 0x813   : > { %v5360_v19 = vld [vmem:[#allocation19 + $0x54] ss:$8 sps:$4 sm:$0xff]  }
 0x814   : > { %v2335_v27 = vrot.slane %v2327_v21, %v6845_v14  ;;  %v2342_v28 = vrot.slane %v2328_v23, %v6845_v14  ;;  %v2351_v30 = vrot.slane %v2343_v24, %v6845_v14  ;;  %v2358_v49 = vrot.slane %v2344_v25, %v6845_v14  ;;  %v5363_v21 = vld [vmem:[#allocation19 + $0x64] ss:$8 sps:$4 sm:$0xff]   ;;  %v5361_v23 = vld [vmem:[#allocation19 + $0x60] ss:$8 sps:$4 sm:$0xff]   ;;  %v5366_v24 = vld [vmem:[#allocation19 + $0x74] ss:$8 sps:$4 sm:$0xff]  }
 0x815   : > { %v5364_v25 = vld [vmem:[#allocation19 + $0x70] ss:$8 sps:$4 sm:$0xff]  }
 0x816   : > { %v2363_v52 = vcombine.low %v2335_v27, %v2342_v28  ;;  %v4702_v31 = vcombine.high %v2335_v27, %v2342_v28  ;;  %v2379_v32 = vcombine.low %v2351_v30, %v2358_v49  ;;  %v4703_v33 = vcombine.high %v2351_v30, %v2358_v49 }
 0x817   : > { %v1100_v27 = vpack.c.bf16 %v1099_v26, %v1099_v26 }
 0x818   : > { %v2370_v35 = vrot.slane %v2363_v52, %v6842_v7  ;;  %v2378_v37 = vrot.slane %v4702_v31, %v6842_v7  ;;  %v2386_v39 = vrot.slane %v2379_v32, %v6842_v7  ;;  %v2394_v29 = vrot.slane %v4703_v33, %v6842_v7  ;;  %v5367_v31 = vld [vmem:[#allocation16] sm:$0xff]   ;;  %v5368_v32 = vld [vmem:[#allocation16 + $0x8] sm:$0xff]   ;;  %v5369_v33 = vld [vmem:[#allocation16 + $0x10] sm:$0xff]  }
 0x819   : > { %4981 = vmatpush3.bf16.msra.mxu1 %v5367_v31 }
 0x81a   : > { %v2396_v47 = vcombine.high %v2370_v35, %v2378_v37  ;;  %v2412_v40 = vcombine.high %v2386_v39, %v2394_v29  ;;  %v2395_v41 = vcombine.low %v2370_v35, %v2378_v37  ;;  %v2411_v42 = vcombine.low %v2386_v39, %v2394_v29  ;;  %4982 = vmatprep.subr.bf16.mxu1 %v6099_v8  ;;  %v5371_v35 = vld [vmem:[#allocation16 + $0x20] sm:$0xff]   ;;  %v5372_v37 = vld [vmem:[#allocation16 + $0x28] sm:$0xff]   ;;  %v5373_v39 = vld [vmem:[#allocation16 + $0x30] sm:$0xff]  }
 0x81b   : > { %v5374_v29 = vld [vmem:[#allocation16 + $0x38] sm:$0xff]  }
 0x81c   : > { %v2410_v43 = vrot.slane %v2396_v47, %v6845_v14  ;;  %v2426_v44 = vrot.slane %v2412_v40, %v6845_v14  ;;  %v2403_v45 = vrot.slane %v2395_v41, %v6845_v14  ;;  %v2419_v50 = vrot.slane %v2411_v42, %v6845_v14  ;;  %v2706_v47 = vld [vmem:[#allocation21] sm:$0x3] }
 0x81d   : > { %4983 = vmatpush3.bf16.msra.mxu1 %v5368_v32  ;;  %v2711_v40 = vrot.slane %v2706_v47, %v6831_v55  ;;  %v2715_v41 = vrot.slane %v2706_v47, %v6822_v48 }
 0x81e   : > { %v2429_v51 = vcombine.low %v2410_v43, %v2426_v44  ;;  %v2428_v53 = vcombine.high %v2403_v45, %v2419_v50  ;;  %v2430_v54 = vcombine.high %v2410_v43, %v2426_v44  ;;  %v2427_v36 = vcombine.low %v2403_v45, %v2419_v50  ;;  %4984 = vmatprep.subr.bf16.mxu1 %v6099_v8 }
 0x820   : > { %2436 = vrot.lane.b32.xlu1 %v2429_v51, %s6104_s29  ;;  %2432 = vrot.lane.b32.xlu0 %v2428_v53, %s6102_s5 }
 0x821   : > { %4985 = vmatpush3.bf16.msra.mxu1 %v5369_v33 }
 0x822   : > { %4986 = vmatprep.subr.bf16.mxu1 %v6099_v8 }
 0x824   : > { %2440 = vrot.lane.b32.xlu0 %v2430_v54, %s6103_s30 }
 0x825   : > { %4987 = vmatpush3.bf16.msra.mxu1 %v5370_v34 }
 0x826   : > { %4988 = vmatprep.subr.bf16.mxu1 %v6099_v8 }
 0x829   : > { %4989 = vmatpush3.bf16.msra.mxu1 %v5371_v35 }
 0x82a   : > { %4990 = vmatprep.subr.bf16.mxu1 %v6099_v8 }
 0x82d   : > { %4991 = vmatpush3.bf16.msra.mxu1 %v5372_v37 }
 0x82e   : > { %4992 = vmatprep.subr.bf16.mxu1 %v6099_v8 }
 0x831   : > { %4993 = vmatpush3.bf16.msra.mxu1 %v5373_v39 }
 0x832   : > { %4994 = vmatprep.subr.bf16.mxu1 %v6099_v8 }
 0x835   : > { %4995 = vmatpush3.bf16.msra.mxu1 %v5374_v29 }
 0x836   : > { %5000 = vmatprep.subr.bf16.mxu1 %v6099_v8 }
 0x892   : > { %v2433_v56 = vpop.permute.xlu0 %2432  ;;  %v2437_v38 = vpop.permute.xlu1 %2436 }
 0x893   : > { %v2443_v57 = vsel %vm1868_vm3, %v2427_v36, %v2433_v56 }
 0x894   : > { %v2445_v59 = vsel %vm2444_vm7, %v2443_v57, %v2437_v38 }
 0x896   : > { %v2441_v58 = vpop.permute.xlu0 %2440 }
 0x897   : > { %v2447_v60 = vsel %vm2446_vm8, %v2445_v59, %v2441_v58 }
 0x898   : > { %v2448_v61 = vpack.c.bf16 %v2447_v60, %v2447_v60 }
 0x89a   : > { %4977 = vmatmul.mubr.bf16.vlgmr.msra.gmra.mrb[12].mxu0 %v2448_v61  ;;  %v4713_v61 = vld [vmem:[#allocation13] ss:$0 sm:$0xff] }
 0x89b   : > { %2830 = vmatprep.mubr.bf16.mxu0 %v6100_v22  ;;  %2799 = vmatpush1.bf16.msra.mxu0 %v5343_v6 }
 0x89c   : > { %2800 = vmatprep.subr.bf16.mxu0 %v5348_v10 }
 0x89f   : > { %2801 = vmatpush1.bf16.msra.mxu0 %v5346_v11 }
 0x8a0   : > { %2802 = vmatprep.subr.bf16.mxu0 %v5351_v12 }
 0x8a3   : > { %2803 = vmatpush1.bf16.msra.mxu0 %v5349_v13 }
 0x8a4   : > { %2804 = vmatprep.subr.bf16.mxu0 %v5354_v15 }
 0x8a7   : > { %2805 = vmatpush1.bf16.msra.mxu0 %v5352_v16 }
 0x8a8   : > { %2806 = vmatprep.subr.bf16.mxu0 %v5357_v17 }
 0x8ab   : > { %2807 = vmatpush1.bf16.msra.mxu0 %v5355_v18 }
 0x8ac   : > { %2808 = vmatprep.subr.bf16.mxu0 %v5360_v19 }
 0x8af   : > { %2809 = vmatpush1.bf16.msra.mxu0 %v5358_v20 }
 0x8b0   : > { %2810 = vmatprep.subr.bf16.mxu0 %v5363_v21 }
 0x8b3   : > { %2811 = vmatpush1.bf16.msra.mxu0 %v5361_v23 }
 0x8b4   : > { %2812 = vmatprep.subr.bf16.mxu0 %v5366_v24 }
 0x8b7   : > { %2813 = vmatpush1.bf16.msra.mxu0 %v5364_v25 }
 0x8b8   : > { %5024 = vmatprep.subr.bf16.mxu0 %v6099_v8 }
 0x8ba   : > { %2831 = vmatmul.mubr.bf16.vlgmr.msra.gmra.mrb[16].mxu0 %v1100_v27 }
 0x8bb   : > { %5026 = vmatprep.mubr.msk.bf16.mxu0 %vm6101_vm0, %v6099_v8 }
 0x96d   : > { %v2537_v63 = vpop.f32.mrb[12].mxu0 }
 0x96e   : > { %v2538_v0 = vadd.f32 %v4704_v62, %v2537_v63  ;;  %v4978_v1 = vpop.f32.mrb[13].mxu0  ;;  %v4714_v63 = vld [vmem:[#allocation15] ss:$0 sm:$0xff] }
 0x96f   : > { %v2540_v2 = vpop.f32.mrb[14].mxu0 }
 0x970   : > { %v7006_v4 = vadd.f32 %v5467_v3, %v2538_v0  ;;  %v4979_v5 = vpop.f32.mrb[15].mxu0 }
 0x972   : > { %2546 = vadd.xlane.f32.xlu1 %v7006_v4 }
 0x98d   : > { %v2832_v42 = vpop.f32.mrb[16].mxu0 }
 0x98e   : > { %v2833_v43 = vadd.f32 %v2832_v42, %v2711_v40  ;;  %v2834_v44 = vpop.f32.mrb[17].mxu0 }
 0x98f   : > { %v7027_v45 = vadd.f32 %v2834_v44, %v2715_v41  ;;  %v2836_v50 = vpop.f32.mrb[18].mxu0 }
 0x990   : > { %3010 = vrot.lane.b32.xlu1 %v2833_v43, %s6104_s29  ;;  %v2837_v51 = vpop.f32.mrb[19].mxu0 }
 0x994   : > { %3013 = vrot.lane.b32.xlu1 %v2833_v43, %s6102_s5 }
 0x9ff   : > { %v2547_v28 = vpop.xlane.xlu1 %2546 }
 0xa00   : > { %v2548_v30 = vmul.f32 0.0078125, %v2547_v28 }
 0xa02   : > { %v2549_v49 = vsub.f32 %v7006_v4, %v2548_v30 }
 0xa03   : > { %v3011_v3 = vpop.permute.xlu1 %3010 }
 0xa04   : > { %v2550_v52 = vmul.f32 %v2549_v49, %v2549_v49  ;;  %v3016_v9 = vcombine.low %v2833_v43, %v3011_v3  ;;  %v3017_v10 = vcombine.high %v2833_v43, %v3011_v3 }
 0xa06   : > { %2551 = vadd.xlane.f32.xlu0 %v2550_v52  ;;  %v3024_v13 = vrot.slane %v3016_v9, %v6842_v7  ;;  %v3031_v15 = vrot.slane %v3017_v10, %v6842_v7 }
 0xa07   : > { %v3014_v5 = vpop.permute.xlu1 %3013 }
 0xa1c   : > { %3007 = vrot.lane.b32.xlu0 %v2833_v43, %s6103_s30 }
 0xa93   : > { %v2552_v53 = vpop.xlane.xlu0 %2551 }
 0xa94   : > { %v2553_v54 = vmul.f32 0.007874016, %v2552_v53 }
 0xa96   : > { %5443 = vrsqrt.f32 %v2553_v54  ;;  %vm2556_vm9 = vcmp.eq.f32.partialorder %v2553_v54, inf  ;;  %v2559_v38 = vand.u32 2147483648, %v2553_v54  ;;  %vm2558_vm10 = vcmp.eq.f32.partialorder %v2553_v54, 0.0 }
 0xa97   : > { %v3008_v6 = vpop.permute.xlu0 %3007 }
 0xa98   : > { %v3032_v11 = vcombine.low %v3008_v6, %v3014_v5  ;;  %v3033_v12 = vcombine.high %v3008_v6, %v3014_v5 }
 0xa9a   : > { %v3040_v16 = vrot.slane %v3032_v11, %v6842_v7  ;;  %v3047_v17 = vrot.slane %v3033_v12, %v6842_v7 }
 0xa9c   : > { %v3048_v18 = vcombine.low %v3024_v13, %v3040_v16  ;;  %v3049_v19 = vcombine.high %v3024_v13, %v3040_v16  ;;  %v3064_v20 = vcombine.low %v3031_v15, %v3047_v17  ;;  %v3065_v21 = vcombine.high %v3031_v15, %v3047_v17 }
 0xa9e   : > { %v3056_v23 = vrot.slane %v3048_v18, %v6845_v14  ;;  %v3063_v24 = vrot.slane %v3049_v19, %v6845_v14  ;;  %v3072_v25 = vrot.slane %v3064_v20, %v6845_v14  ;;  %v3079_v26 = vrot.slane %v3065_v21, %v6845_v14 }
 0xaa0   : > { %v5444_v36 = vpop.eup %5443  ;;  %v3084_v27 = vcombine.low %v3056_v23, %v3063_v24  ;;  %v4742_v28 = vcombine.high %v3056_v23, %v3063_v24  ;;  %v3100_v30 = vcombine.low %v3072_v25, %v3079_v26 }
 0xaa1   : > { %v2555_v56 = vmul.f32 %v5444_v36, %v2553_v54 }
 0xaa2   : > { %v3091_v52 = vrot.slane %v3084_v27, %v6842_v7  ;;  %v3099_v31 = vrot.slane %v4742_v28, %v6842_v7  ;;  %v3107_v32 = vrot.slane %v3100_v30, %v6842_v7 }
 0xaa3   : > { %v2557_v57 = vsel %vm2556_vm9, %v2553_v54, %v2555_v56  ;;  %v4715_v54 = vld [vmem:[#allocation18] ss:$0 sm:$0xff] }
 0xaa4   : > { %v2560_v58 = vsel %vm2558_vm10, %v2559_v38, %v2557_v57  ;;  %v3116_v34 = vcombine.low %v3091_v52, %v3099_v31  ;;  %v3117_v37 = vcombine.high %v3091_v52, %v3099_v31 }
 0xaa5   : > { %v2561_v59 = vadd.f32 1e-06, %v2560_v58 }
 0xaa6   : > { %v3124_v29 = vrot.slane %v3116_v34, %v6845_v14  ;;  %v3131_v40 = vrot.slane %v3117_v37, %v6845_v14 }
 0xaa7   : > { %5445 = vrcp.f32 %v2561_v59 }
 0xab1   : > { %v5446_v60 = vpop.eup %5445 }
 0xab2   : > { %v2563_v62 = vmul.f32 %v5446_v60, %v2549_v49  ;;  %v4743_v49 = vcombine.high %v3072_v25, %v3079_v26 }
 0xab4   : > { %v2570_v0 = vmul.f32 %v4713_v61, %v2563_v62  ;;  %v3115_v33 = vrot.slane %v4743_v49, %v6842_v7 }
 0xab6   : > { %v2577_v1 = vadd.f32 %v4714_v63, %v2570_v0  ;;  %v3132_v35 = vcombine.low %v3107_v32, %v3115_v33  ;;  %v3133_v39 = vcombine.high %v3107_v32, %v3115_v33 }
 0xab8   : > { %v2578_v2 = vpack.c.bf16 %v2577_v1, %v2577_v1  ;;  %v3140_v47 = vrot.slane %v3132_v35, %v6845_v14  ;;  %v3147_v41 = vrot.slane %v3133_v39, %v6845_v14 }
 0xaba   : > { %4997 = vmatmul.mubr.bf16.vlgmr.msra.gmra.mrb[28].mxu1 %v2578_v2  ;;  %v3148_v42 = vcombine.low %v3124_v29, %v3140_v47  ;;  %v3149_v43 = vcombine.high %v3124_v29, %v3140_v47  ;;  %v7050_v44 = vcombine.low %v3131_v40, %v3147_v41  ;;  %v7052_v50 = vcombine.high %v3131_v40, %v3147_v41 }
 0xabb   : > { %5002 = vmatprep.mubr.msk.bf16.mxu1 %vm6101_vm0, %v6099_v8 }
 0xabc   : > { %v3152_v51 = vpack.c.bf16 %v3148_v42, %v3148_v42  ;;  %v3153_v31 = vpack.c.bf16 %v3149_v43, %v3149_v43  ;;  %v3154_v39 = vpack.c.bf16 %v7050_v44, %v7050_v44  ;;  %v3155_v43 = vpack.c.bf16 %v7052_v50, %v7052_v50  ;;  %v1104_v50 = vld [vmem:[%s1092_s27] sm:$0xff] }
 0xabd   : > { %vm1105_vm11 = vcmp.ne.f32.partialorder %v1104_v50, 0.0 }
 0xabe   : > { %v3310_v53 = vsel %vm1868_vm3, %v3152_v51, 0  ;;  %v3356_v33 = vsel %vm1868_vm3, %v3153_v31, 0  ;;  %v3402_v41 = vsel %vm1868_vm3, %v3154_v39, 0  ;;  %v3448_v51 = vsel %vm1868_vm3, %v3155_v43, 0 }
 0xabf   : > { %5001 = vmatpush3.bf16.xpose.msra.mxu1 %v3310_v53 }
 0xac0   : > { %5006 = vmatprep.subr.bf16.mxu1 %v6099_v8 }
 0xb8d   : > { %v2684_v36 = vpop.f32.mrb[28].mxu1 }
 0xb8e   : > { %v2685_v56 = vadd.f32 %v4715_v54, %v2684_v36  ;;  %v4998_v38 = vpop.f32.mrb[29].mxu1 }
 0xb8f   : > { %v2687_v57 = vpop.f32.mrb[30].mxu1 }
 0xb90   : > { %2860 = vrot.lane.b32.xlu1 %v2685_v56, %s6104_s29  ;;  %2857 = vrot.lane.b32.xlu0 %v2685_v56, %s6103_s30  ;;  %v4999_v58 = vpop.f32.mrb[31].mxu1 }
 0xb94   : > { %2863 = vrot.lane.b32.xlu0 %v2685_v56, %s6102_s5 }
 0xc02   : > { %v2861_v59 = vpop.permute.xlu1 %2860  ;;  %v2858_v60 = vpop.permute.xlu0 %2857 }
 0xc03   : > { %v2866_v61 = vcombine.low %v2685_v56, %v2861_v59  ;;  %v2867_v62 = vcombine.high %v2685_v56, %v2861_v59  ;;  %v1106_v56 = vsel %vm1105_vm11, 0.0, %v6107_v46 }
 0xc05   : > { %v2874_v2 = vrot.slane %v2866_v61, %v6842_v7  ;;  %v2881_v3 = vrot.slane %v2867_v62, %v6842_v7 }
 0xc06   : > { %v2864_v63 = vpop.permute.xlu0 %2863 }
 0xc07   : > { %v2882_v0 = vcombine.low %v2858_v60, %v2864_v63  ;;  %v2883_v1 = vcombine.high %v2858_v60, %v2864_v63 }
 0xc09   : > { %v2890_v5 = vrot.slane %v2882_v0, %v6842_v7  ;;  %v2897_v6 = vrot.slane %v2883_v1, %v6842_v7 }
 0xc0b   : > { %v2898_v9 = vcombine.low %v2874_v2, %v2890_v5  ;;  %v2899_v10 = vcombine.high %v2874_v2, %v2890_v5  ;;  %v2914_v11 = vcombine.low %v2881_v3, %v2897_v6  ;;  %v2915_v12 = vcombine.high %v2881_v3, %v2897_v6 }
 0xc0d   : > { %v2906_v13 = vrot.slane %v2898_v9, %v6845_v14  ;;  %v2913_v15 = vrot.slane %v2899_v10, %v6845_v14  ;;  %v2922_v16 = vrot.slane %v2914_v11, %v6845_v14  ;;  %v2929_v17 = vrot.slane %v2915_v12, %v6845_v14 }
 0xc0f   : > { %v2934_v18 = vcombine.low %v2906_v13, %v2913_v15  ;;  %v4740_v19 = vcombine.high %v2906_v13, %v2913_v15  ;;  %v2950_v20 = vcombine.low %v2922_v16, %v2929_v17  ;;  %v4741_v21 = vcombine.high %v2922_v16, %v2929_v17 }
 0xc11   : > { %v2941_v23 = vrot.slane %v2934_v18, %v6842_v7  ;;  %v2949_v24 = vrot.slane %v4740_v19, %v6842_v7  ;;  %v2957_v25 = vrot.slane %v2950_v20, %v6842_v7  ;;  %v2965_v26 = vrot.slane %v4741_v21, %v6842_v7 }
 0xc13   : > { %v2966_v27 = vcombine.low %v2941_v23, %v2949_v24  ;;  %v2982_v28 = vcombine.low %v2957_v25, %v2965_v26  ;;  %v2967_v34 = vcombine.high %v2941_v23, %v2949_v24  ;;  %v2983_v35 = vcombine.high %v2957_v25, %v2965_v26 }
 0xc15   : > { %v2974_v30 = vrot.slane %v2966_v27, %v6845_v14  ;;  %v2990_v49 = vrot.slane %v2982_v28, %v6845_v14  ;;  %v2981_v47 = vrot.slane %v2967_v34, %v6845_v14  ;;  %v2997_v40 = vrot.slane %v2983_v35, %v6845_v14 }
 0xc17   : > { %v2998_v52 = vcombine.low %v2974_v30, %v2990_v49  ;;  %v2999_v37 = vcombine.high %v2974_v30, %v2990_v49  ;;  %v3000_v42 = vcombine.low %v2981_v47, %v2997_v40  ;;  %v3001_v53 = vcombine.high %v2981_v47, %v2997_v40 }
 0xc19   : > { %v3002_v32 = vpack.c.bf16 %v2998_v52, %v2998_v52  ;;  %v3003_v29 = vpack.c.bf16 %v2999_v37, %v2999_v37  ;;  %v3004_v44 = vpack.c.bf16 %v3000_v42, %v3000_v42  ;;  %v3005_v54 = vpack.c.bf16 %v3001_v53, %v3001_v53 }
 0xc1b   : > { %5003 = vmatmul.mubr.msk.bf16.vlgmr.msra.gmra.mrb[32].mxu1 %vm1868_vm3, %v3002_v32 }
 0xc1c   : > { %5007 = vmatpush3.bf16.xpose.msra.mxu1 %v3356_v33  ;;  %5008 = vmatprep.mubr.msk.bf16.mxu1 %vm6101_vm0, %v6099_v8 }
 0xc1d   : > { %5012 = vmatprep.subr.bf16.mxu1 %v6099_v8 }
 0xc23   : > { %5009 = vmatmul.mubr.msk.bf16.vlgmr.msra.gmra.mrb[36].mxu1 %vm1868_vm3, %v3003_v29 }
 0xc24   : > { %5013 = vmatpush3.bf16.xpose.msra.mxu1 %v3402_v41  ;;  %5014 = vmatprep.mubr.msk.bf16.mxu1 %vm6101_vm0, %v6099_v8 }
 0xc25   : > { %5018 = vmatprep.subr.bf16.mxu1 %v6099_v8 }
 0xc2b   : > { %5015 = vmatmul.mubr.msk.bf16.vlgmr.msra.gmra.mrb[40].mxu1 %vm1868_vm3, %v3004_v44 }
 0xc2c   : > { %5019 = vmatpush3.bf16.xpose.msra.mxu1 %v3448_v51  ;;  %5020 = vmatprep.mubr.msk.bf16.mxu1 %vm6101_vm0, %v6099_v8 }
 0xc2d   : > { %5030 = vmatprep.subr.bf16.mxu1 %v6099_v8 }
 0xc33   : > { %5021 = vmatmul.mubr.msk.bf16.vlgmr.msra.gmra.mrb[44].mxu1 %vm1868_vm3, %v3005_v54 }
 0xc34   : > { %5032 = vmatprep.mubr.msk.bf16.mxu1 %vm6101_vm0, %v6099_v8 }
 0xcee   : > { %v3346_v36 = vpop.f32.mrb[32].mxu1 }
 0xcef   : > { %v3490_v38 = vmul.f32 0.17677669, %v3346_v36  ;;  %v5004_v57 = vpop.f32.mrb[33].mxu1 }
 0xcf0   : > { %v3349_v58 = vpop.f32.mrb[34].mxu1 }
 0xcf1   : > { %v5005_v59 = vpop.f32.mrb[35].mxu1  ;;  %v3494_v60 = vadd.f32 %v3490_v38, %v1106_v56 }
 0xcf3   : > { %v3498_v61 = vsel %vm2061_vm5, %v3494_v60, -inf }
 0xcf4   : > { %3499 = vmax.xlane.f32.xlu1 %v3498_v61 }
 0xcf6   : > { %v3392_v62 = vpop.f32.mrb[36].mxu1 }
 0xcf7   : > { %v3491_v63 = vmul.f32 0.17677669, %v3392_v62  ;;  %v5010_v0 = vpop.f32.mrb[37].mxu1 }
 0xcf8   : > { %v3395_v1 = vpop.f32.mrb[38].mxu1 }
 0xcf9   : > { %v5011_v2 = vpop.f32.mrb[39].mxu1  ;;  %v3495_v3 = vadd.f32 %v3491_v63, %v1106_v56 }
 0xcfb   : > { %v3501_v5 = vsel %vm2061_vm5, %v3495_v3, -inf }
 0xcfc   : > { %3502 = vmax.xlane.f32.xlu0 %v3501_v5 }
 0xcfe   : > { %v3438_v6 = vpop.f32.mrb[40].mxu1 }
 0xcff   : > { %v3492_v9 = vmul.f32 0.17677669, %v3438_v6  ;;  %v5016_v46 = vpop.f32.mrb[41].mxu1 }
 0xd00   : > { %v3441_v10 = vpop.f32.mrb[42].mxu1 }
 0xd01   : > { %v5017_v11 = vpop.f32.mrb[43].mxu1  ;;  %v3496_v12 = vadd.f32 %v3492_v9, %v1106_v56 }
 0xd03   : > { %v3504_v13 = vsel %vm2061_vm5, %v3496_v12, -inf }
 0xd04   : > { %3505 = vmax.xlane.f32.xlu0 %v3504_v13 }
 0xd06   : > { %v3484_v15 = vpop.f32.mrb[44].mxu1 }
 0xd07   : > { %v3493_v16 = vmul.f32 0.17677669, %v3484_v15  ;;  %v5022_v17 = vpop.f32.mrb[45].mxu1 }
 0xd08   : > { %v3487_v18 = vpop.f32.mrb[46].mxu1 }
 0xd09   : > { %v5023_v19 = vpop.f32.mrb[47].mxu1  ;;  %v3497_v20 = vadd.f32 %v3493_v16, %v1106_v56 }
 0xd0b   : > { %v3507_v21 = vsel %vm2061_vm5, %v3497_v20, -inf }
 0xd0c   : > { %3508 = vmax.xlane.f32.xlu1 %v3507_v21 }
 0xd1d   : > { %3160 = vrot.lane.b32.xlu1 %v7027_v45, %s6104_s29 }
 0xd81   : > { %v3500_v23 = vpop.xlane.xlu1 %3499 }
 0xd82   : > { %v3510_v24 = vsub.f32 %v3494_v60, %v3500_v23 }
 0xd84   : > { %v3514_v25 = vmul.f32 1.442695, %v3510_v24 }
 0xd86   : > { %5447 = vpow2.f32 %v3514_v25 }
 0xd89   : > { %v3503_v26 = vpop.xlane.xlu0 %3502 }
 0xd8a   : > { %v3511_v27 = vsub.f32 %v3495_v3, %v3503_v26 }
 0xd8c   : > { %v3516_v28 = vmul.f32 1.442695, %v3511_v27 }
 0xd8e   : > { %5449 = vpow2.f32 %v3516_v28 }
 0xd90   : > { %v7108_v30 = vpop.eup %5447 }
 0xd91   : > { %v3522_v49 = vsel %vm2061_vm5, %v7108_v30, 0.0  ;;  %v3506_v32 = vpop.xlane.xlu0 %3505 }
 0xd92   : > { %3523 = vadd.xlane.f32.xlu0 %v3522_v49  ;;  %v3512_v33 = vsub.f32 %v3496_v12, %v3506_v32 }
 0xd94   : > { %v3518_v34 = vmul.f32 1.442695, %v3512_v33 }
 0xd96   : > { %5451 = vpow2.f32 %v3518_v34 }
 0xd98   : > { %v7112_v52 = vpop.eup %5449 }
 0xd99   : > { %v3525_v31 = vsel %vm2061_vm5, %v7112_v52, 0.0  ;;  %v3509_v35 = vpop.xlane.xlu1 %3508 }
 0xd9a   : > { %3526 = vadd.xlane.f32.xlu1 %v3525_v31  ;;  %v3513_v37 = vsub.f32 %v3497_v20, %v3509_v35 }
 0xd9c   : > { %v3520_v39 = vmul.f32 1.442695, %v3513_v37 }
 0xd9d   : > { %v3161_v42 = vpop.permute.xlu1 %3160 }
 0xd9e   : > { %5453 = vpow2.f32 %v3520_v39  ;;  %v3166_v51 = vcombine.low %v7027_v45, %v3161_v42  ;;  %v3167_v53 = vcombine.high %v7027_v45, %v3161_v42 }
 0xda0   : > { %v7120_v29 = vpop.eup %5451  ;;  %v3174_v38 = vrot.slane %v3166_v51, %v6842_v7  ;;  %v3181_v57 = vrot.slane %v3167_v53, %v6842_v7 }
 0xda1   : > { %v3528_v47 = vsel %vm2061_vm5, %v7120_v29, 0.0 }
 0xda8   : > { %3157 = vrot.lane.b32.xlu0 %v7027_v45, %s6103_s30  ;;  %v7124_v40 = vpop.eup %5453 }
 0xda9   : > { %v3531_v41 = vsel %vm2061_vm5, %v7124_v40, 0.0 }
 0xdab   : > { %3163 = vrot.lane.b32.xlu1 %v7027_v45, %s6102_s5 }
 0xdc7   : > { %3529 = vadd.xlane.f32.xlu0 %v3528_v47 }
 0xdcf   : > { %3532 = vadd.xlane.f32.xlu1 %v3531_v41 }
 0xe1f   : > { %v3524_v43 = vpop.xlane.xlu0 %3523 }
 0xe20   : > { %5455 = vrcp.f32 %v3524_v43 }
 0xe23   : > { %v3158_v54 = vpop.permute.xlu0 %3157 }
 0xe27   : > { %v3527_v44 = vpop.xlane.xlu1 %3526 }
 0xe28   : > { %5457 = vrcp.f32 %v3527_v44 }
 0xe2a   : > { %v5456_v18 = vpop.eup %5455 }
 0xe2b   : > { %v3164_v50 = vpop.permute.xlu1 %3163  ;;  %v3538_v49 = vmul.f32 %v5456_v18, %v7108_v30 }
 0xe2c   : > { %v3182_v36 = vcombine.low %v3158_v54, %v3164_v50  ;;  %v3183_v56 = vcombine.high %v3158_v54, %v3164_v50 }
 0xe2d   : > { %v3542_v47 = vpack.c.bf16 %v3538_v49, %v3538_v49 }
 0xe2e   : > { %v3190_v58 = vrot.slane %v3182_v36, %v6842_v7  ;;  %v3197_v59 = vrot.slane %v3183_v56, %v6842_v7  ;;  %v5375_v56 = vld [vmem:[#allocation22] sm:$0xff]  }
 0xe30   : > { %v3198_v60 = vcombine.low %v3174_v38, %v3190_v58  ;;  %v3199_v61 = vcombine.high %v3174_v38, %v3190_v58  ;;  %v3214_v62 = vcombine.low %v3181_v57, %v3197_v59  ;;  %v3215_v63 = vcombine.high %v3181_v57, %v3197_v59  ;;  %v5376_v38 = vld [vmem:[#allocation22 + $0x8] sm:$0xff]   ;;  %v5378_v57 = vld [vmem:[#allocation22 + $0x18] sm:$0xff]  }
 0xe31   : > { %v5380_v58 = vld [vmem:[#allocation22 + $0x28] sm:$0xff]  }
 0xe32   : > { %v3206_v45 = vrot.slane %v3198_v60, %v6845_v14  ;;  %v3213_v0 = vrot.slane %v3199_v61, %v6845_v14  ;;  %v3222_v1 = vrot.slane %v3214_v62, %v6845_v14  ;;  %v3229_v2 = vrot.slane %v3215_v63, %v6845_v14  ;;  %v5458_v24 = vpop.eup %5457 }
 0xe33   : > { %v3539_v31 = vmul.f32 %v5458_v24, %v7112_v52 }
 0xe34   : > { %v3234_v3 = vcombine.low %v3206_v45, %v3213_v0  ;;  %v4744_v5 = vcombine.high %v3206_v45, %v3213_v0  ;;  %v3250_v6 = vcombine.low %v3222_v1, %v3229_v2  ;;  %v4745_v9 = vcombine.high %v3222_v1, %v3229_v2 }
 0xe35   : > { %v3543_v41 = vpack.c.bf16 %v3539_v31, %v3539_v31 }
 0xe36   : > { %v3241_v46 = vrot.slane %v3234_v3, %v6842_v7  ;;  %v3249_v10 = vrot.slane %v4744_v5, %v6842_v7  ;;  %v3257_v11 = vrot.slane %v3250_v6, %v6842_v7  ;;  %v3265_v12 = vrot.slane %v4745_v9, %v6842_v7 }
 0xe38   : > { %v3266_v13 = vcombine.low %v3241_v46, %v3249_v10  ;;  %v3282_v15 = vcombine.low %v3257_v11, %v3265_v12  ;;  %v3267_v16 = vcombine.high %v3241_v46, %v3249_v10  ;;  %v3283_v17 = vcombine.high %v3257_v11, %v3265_v12 }
 0xe3a   : > { %v3274_v19 = vrot.slane %v3266_v13, %v6845_v14  ;;  %v3290_v20 = vrot.slane %v3282_v15, %v6845_v14  ;;  %v3281_v21 = vrot.slane %v3267_v16, %v6845_v14  ;;  %v3297_v23 = vrot.slane %v3283_v17, %v6845_v14 }
 0xe3c   : > { %v3298_v25 = vcombine.low %v3274_v19, %v3290_v20  ;;  %v3299_v26 = vcombine.high %v3274_v19, %v3290_v20  ;;  %v3300_v27 = vcombine.low %v3281_v21, %v3297_v23  ;;  %v3301_v28 = vcombine.high %v3281_v21, %v3297_v23 }
 0xe3e   : > { %v3302_v32 = vpack.c.bf16 %v3298_v25, %v3298_v25  ;;  %v3303_v33 = vpack.c.bf16 %v3299_v26, %v3299_v26  ;;  %v3304_v37 = vpack.c.bf16 %v3300_v27, %v3300_v27  ;;  %v3305_v39 = vpack.c.bf16 %v3301_v28, %v3301_v28  ;;  %v5381_v25 = vld [vmem:[#allocation22 + $0x30] sm:$0xff]  }
 0xe40   : > { %v3550_v34 = vsel %vm2113_vm6, %v3302_v32, 0  ;;  %v3596_v35 = vsel %vm2113_vm6, %v3303_v33, 0  ;;  %v3642_v30 = vsel %vm2113_vm6, %v3304_v37, 0  ;;  %v3688_v52 = vsel %vm2113_vm6, %v3305_v39, 0 }
 0xe41   : > { %5025 = vmatpush3.bf16.msra.mxu0 %v3550_v34  ;;  %5031 = vmatpush3.bf16.msra.mxu1 %v3596_v35  ;;  %v5382_v35 = vld [vmem:[#allocation22 + $0x38] sm:$0xff]  }
 0xe42   : > { %5036 = vmatprep.subr.bf16.mxu0 %v6099_v8  ;;  %5042 = vmatprep.subr.bf16.mxu1 %v6099_v8 }
 0xe44   : > { %5027 = vmatmul.mubr.msk.bf16.vlgmr.msra.gmra.mrb[20].mxu0 %vm2061_vm5, %v3542_v47  ;;  %5033 = vmatmul.mubr.msk.bf16.vlgmr.msra.gmra.mrb[48].mxu1 %vm2061_vm5, %v3543_v41 }
 0xe45   : > { %5037 = vmatpush3.bf16.msra.mxu0 %v3642_v30  ;;  %5043 = vmatpush3.bf16.msra.mxu1 %v3688_v52 }
 0xe46   : > { %5038 = vmatprep.mubr.msk.bf16.mxu0 %vm6101_vm0, %v6099_v8  ;;  %5044 = vmatprep.mubr.msk.bf16.mxu1 %vm6101_vm0, %v6099_v8 }
 0xe47   : > { %5048 = vmatprep.subr.bf16.mxu0 %v6099_v8 }
 0xe54   : > { %v3530_v42 = vpop.xlane.xlu0 %3529 }
 0xe55   : > { %5459 = vrcp.f32 %v3530_v42 }
 0xe5c   : > { %v3533_v43 = vpop.xlane.xlu1 %3532 }
 0xe5d   : > { %5461 = vrcp.f32 %v3533_v43 }
 0xe5f   : > { %v5460_v44 = vpop.eup %5459 }
 0xe60   : > { %v3540_v51 = vmul.f32 %v5460_v44, %v7120_v29  ;;  %v5377_v29 = vld [vmem:[#allocation22 + $0x10] sm:$0xff]  }
 0xe62   : > { %v3544_v53 = vpack.c.bf16 %v3540_v51, %v3540_v51 }
 0xe64   : > { %5039 = vmatmul.mubr.msk.bf16.vlgmr.msra.gmra.mrb[24].mxu0 %vm2061_vm5, %v3544_v53 }
 0xe65   : > { %5064 = vmatprep.mubr.msk.bf16.mxu0 %vm6101_vm0, %v6099_v8  ;;  %5049 = vmatpush3.bf16.msra.mxu0 %v5375_v56 }
 0xe66   : > { %5050 = vmatprep.subr.bf16.mxu0 %v6099_v8 }
 0xe67   : > { %v5462_v54 = vpop.eup %5461 }
 0xe68   : > { %v3541_v50 = vmul.f32 %v5462_v54, %v7124_v40  ;;  %v5379_v40 = vld [vmem:[#allocation22 + $0x20] sm:$0xff]  }
 0xe69   : > { %5051 = vmatpush3.bf16.msra.mxu0 %v5376_v38 }
 0xe6a   : > { %v3545_v36 = vpack.c.bf16 %v3541_v50, %v3541_v50  ;;  %5052 = vmatprep.subr.bf16.mxu0 %v6099_v8 }
 0xe6c   : > { %5045 = vmatmul.mubr.msk.bf16.vlgmr.msra.gmra.mrb[52].mxu1 %vm2061_vm5, %v3545_v36 }
 0xe6d   : > { %4152 = vmatprep.mubr.bf16.mxu1 %v6100_v22  ;;  %5053 = vmatpush3.bf16.msra.mxu0 %v5377_v29 }
 0xe6e   : > { %5054 = vmatprep.subr.bf16.mxu0 %v6099_v8 }
 0xe71   : > { %5055 = vmatpush3.bf16.msra.mxu0 %v5378_v57 }
 0xe72   : > { %5056 = vmatprep.subr.bf16.mxu0 %v6099_v8 }
 0xe75   : > { %5057 = vmatpush3.bf16.msra.mxu0 %v5379_v40 }
 0xe76   : > { %5058 = vmatprep.subr.bf16.mxu0 %v6099_v8 }
 0xe79   : > { %5059 = vmatpush3.bf16.msra.mxu0 %v5380_v58 }
 0xe7a   : > { %5060 = vmatprep.subr.bf16.mxu0 %v6099_v8 }
 0xe7d   : > { %5061 = vmatpush3.bf16.msra.mxu0 %v5381_v25  ;;  %v5409_v25 = vld [vmem:[#allocation28 + $0x48] sm:$0xff]  }
 0xe7e   : > { %5062 = vmatprep.subr.bf16.mxu0 %v6099_v8 }
 0xe81   : > { %5063 = vmatpush3.bf16.msra.mxu0 %v5382_v35  ;;  %v5418_v35 = vld [vmem:[#allocation28 + $0x28] sm:$0xff]  }
 0xf17   : > { %v3586_v22 = vpop.f32.mrb[20].mxu0  ;;  %v3632_v59 = vpop.f32.mrb[48].mxu1 }
 0xf18   : > { %v5028_v60 = vpop.f32.mrb[21].mxu0  ;;  %v5034_v61 = vpop.f32.mrb[49].mxu1 }
 0xf19   : > { %v3589_v62 = vpop.f32.mrb[22].mxu0  ;;  %v3635_v63 = vpop.f32.mrb[50].mxu1 }
 0xf1a   : > { %v5029_v45 = vpop.f32.mrb[23].mxu0  ;;  %v5035_v0 = vpop.f32.mrb[51].mxu1 }
 0xf37   : > { %v3678_v1 = vpop.f32.mrb[24].mxu0 }
 0xf38   : > { %v3730_v2 = vcombine.low %v3586_v22, %v3678_v1  ;;  %v3731_v3 = vcombine.high %v3586_v22, %v3678_v1  ;;  %v5040_v5 = vpop.f32.mrb[25].mxu0  ;;  %v4756_v22 = vld [vmem:[#allocation24] ss:$0 sm:$0xff] }
 0xf39   : > { %v3681_v6 = vpop.f32.mrb[26].mxu0  ;;  %v5385_v5 = vld [vmem:[#allocation25 + $0x4] ss:$8 sps:$4 sm:$0xff]  }
 0xf3a   : > { %v5041_v9 = vpop.f32.mrb[27].mxu0  ;;  %v3738_v15 = vrot.slane %v3730_v2, %v6842_v7  ;;  %v3745_v16 = vrot.slane %v3731_v3, %v6842_v7  ;;  %v5383_v6 = vld [vmem:[#allocation25] ss:$8 sps:$4 sm:$0xff]   ;;  %4120 = vmatprep.subr.bf16.mxu1 %v5385_v5 }
 0xf3b   : > { %4121 = vmatpush1.bf16.msra.mxu1 %v5383_v6  ;;  %v5388_v9 = vld [vmem:[#allocation25 + $0x14] ss:$8 sps:$4 sm:$0xff]  }
 0xf3c   : > { %4122 = vmatprep.subr.bf16.mxu1 %v5388_v9 }
 0xf3f   : > { %v3724_v46 = vpop.f32.mrb[52].mxu1 }
 0xf40   : > { %v3746_v10 = vcombine.low %v3632_v59, %v3724_v46  ;;  %v3747_v11 = vcombine.high %v3632_v59, %v3724_v46  ;;  %v5046_v12 = vpop.f32.mrb[53].mxu1  ;;  %v5386_v46 = vld [vmem:[#allocation25 + $0x10] ss:$8 sps:$4 sm:$0xff]  }
 0xf41   : > { %v3727_v13 = vpop.f32.mrb[54].mxu1  ;;  %4123 = vmatpush1.bf16.msra.mxu1 %v5386_v46  ;;  %v5392_v12 = vld [vmem:[#allocation25 + $0x30] ss:$8 sps:$4 sm:$0xff]  }
 0xf42   : > { %v3754_v17 = vrot.slane %v3746_v10, %v6842_v7  ;;  %v3761_v18 = vrot.slane %v3747_v11, %v6842_v7  ;;  %v5047_v19 = vpop.f32.mrb[55].mxu1  ;;  %v5389_v10 = vld [vmem:[#allocation25 + $0x20] ss:$8 sps:$4 sm:$0xff]   ;;  %v5394_v11 = vld [vmem:[#allocation25 + $0x34] ss:$8 sps:$4 sm:$0xff]  }
 0xf43   : > { %v5397_v13 = vld [vmem:[#allocation25 + $0x44] ss:$8 sps:$4 sm:$0xff]   ;;  %v5401_v19 = vld [vmem:[#allocation25 + $0x60] ss:$8 sps:$4 sm:$0xff]  }
 0xf44   : > { %v3762_v20 = vcombine.low %v3738_v15, %v3754_v17  ;;  %v3763_v21 = vcombine.high %v3738_v15, %v3754_v17  ;;  %v3778_v23 = vcombine.low %v3745_v16, %v3761_v18  ;;  %v3779_v24 = vcombine.high %v3745_v16, %v3761_v18  ;;  %v5395_v15 = vld [vmem:[#allocation25 + $0x40] ss:$8 sps:$4 sm:$0xff]   ;;  %v5400_v16 = vld [vmem:[#allocation25 + $0x54] ss:$8 sps:$4 sm:$0xff]   ;;  %v5398_v17 = vld [vmem:[#allocation25 + $0x50] ss:$8 sps:$4 sm:$0xff]  }
 0xf45   : > { %v5403_v18 = vld [vmem:[#allocation25 + $0x64] ss:$8 sps:$4 sm:$0xff]  }
 0xf46   : > { %v3770_v26 = vrot.slane %v3762_v20, %v6845_v14  ;;  %v3777_v27 = vrot.slane %v3763_v21, %v6845_v14  ;;  %v3786_v28 = vrot.slane %v3778_v23, %v6845_v14  ;;  %v3793_v49 = vrot.slane %v3779_v24, %v6845_v14  ;;  %v5406_v20 = vld [vmem:[#allocation25 + $0x74] ss:$8 sps:$4 sm:$0xff]   ;;  %v5404_v21 = vld [vmem:[#allocation25 + $0x70] ss:$8 sps:$4 sm:$0xff]   ;;  %v5407_v23 = vld [vmem:[#allocation28 + $0x40] sm:$0xff]  }
 0xf47   : > { %v5408_v24 = vld [vmem:[#allocation28] sm:$0xff]   ;;  %4870 = vmatprep.subr.bf16.mxu0 %v5407_v23 }
 0xf48   : > { %v3798_v31 = vcombine.low %v3770_v26, %v3777_v27  ;;  %v4754_v32 = vcombine.high %v3770_v26, %v3777_v27  ;;  %v3814_v33 = vcombine.low %v3786_v28, %v3793_v49  ;;  %v4755_v34 = vcombine.high %v3786_v28, %v3793_v49  ;;  %v5410_v26 = vld [vmem:[#allocation28 + $0x8] sm:$0xff]   ;;  %v5411_v27 = vld [vmem:[#allocation28 + $0x50] sm:$0xff]   ;;  %v5413_v49 = vld [vmem:[#allocation28 + $0x58] sm:$0xff]  }
 0xf49   : > { %v5412_v28 = vld [vmem:[#allocation28 + $0x10] sm:$0xff]  }
 0xf4a   : > { %v3805_v37 = vrot.slane %v3798_v31, %v6842_v7  ;;  %v3813_v39 = vrot.slane %v4754_v32, %v6842_v7  ;;  %v3821_v47 = vrot.slane %v3814_v33, %v6842_v7  ;;  %v3829_v41 = vrot.slane %v4755_v34, %v6842_v7  ;;  %v5414_v31 = vld [vmem:[#allocation28 + $0x18] sm:$0xff]   ;;  %v5415_v32 = vld [vmem:[#allocation28 + $0x60] sm:$0xff]   ;;  %v5417_v34 = vld [vmem:[#allocation28 + $0x68] sm:$0xff]  }
 0xf4b   : > { %v5416_v33 = vld [vmem:[#allocation28 + $0x20] sm:$0xff]  }
 0xf4c   : > { %v3831_v30 = vcombine.high %v3805_v37, %v3813_v39  ;;  %v3847_v52 = vcombine.high %v3821_v47, %v3829_v41  ;;  %v3830_v42 = vcombine.low %v3805_v37, %v3813_v39  ;;  %v3846_v43 = vcombine.low %v3821_v47, %v3829_v41 }
 0xf4e   : > { %v3845_v8 = vrot.slane %v3831_v30, %v6845_v14  ;;  %v3861_v44 = vrot.slane %v3847_v52, %v6845_v14  ;;  %v3838_v51 = vrot.slane %v3830_v42, %v6845_v14  ;;  %v3854_v53 = vrot.slane %v3846_v43, %v6845_v14 }
 0xf50   : > { %v3864_v54 = vcombine.low %v3845_v8, %v3861_v44  ;;  %v3863_v50 = vcombine.high %v3838_v51, %v3854_v53  ;;  %v3865_v36 = vcombine.high %v3845_v8, %v3861_v44  ;;  %v3862_v56 = vcombine.low %v3838_v51, %v3854_v53  ;;  %v4766_v53 = vld [vmem:[%s7346_s8] ss:$0 sm:$0xff] }
 0xf52   : > { %3871 = vrot.lane.b32.xlu1 %v3864_v54, %s6104_s29  ;;  %3867 = vrot.lane.b32.xlu0 %v3863_v50, %s6102_s5  ;;  %s7345_s29 = sld [smem:[#allocation58_spill]] }
 0xf56   : > { %3875 = vrot.lane.b32.xlu0 %v3865_v36, %s6103_s30 }
 0xf58   : > { %v4765_v44 = vld [vmem:[%s7345_s29] ss:$0 sm:$0xff] }
 0xfc4   : > { %v3868_v7 = vpop.permute.xlu0 %3867  ;;  %v3872_v38 = vpop.permute.xlu1 %3871 }
 0xfc5   : > { %v3878_v29 = vsel %vm1868_vm3, %v3862_v56, %v3868_v7  ;;  %v5419_v56 = vld [vmem:[#allocation28 + $0x70] sm:$0xff]  }
 0xfc6   : > { %v3879_v40 = vsel %vm2444_vm7, %v3878_v29, %v3872_v38  ;;  %v5420_v7 = vld [vmem:[#allocation28 + $0x30] sm:$0xff]   ;;  %v5421_v38 = vld [vmem:[#allocation28 + $0x78] sm:$0xff]  }
 0xfc7   : > { %v5422_v29 = vld [vmem:[#allocation28 + $0x38] sm:$0xff]  }
 0xfc8   : > { %v3876_v57 = vpop.permute.xlu0 %3875 }
 0xfc9   : > { %v3880_v58 = vsel %vm2446_vm8, %v3879_v40, %v3876_v57  ;;  %v4028_v57 = vld [vmem:[#allocation27] sm:$0x3] }
 0xfca   : > { %v3881_v14 = vpack.c.bf16 %v3880_v58, %v3880_v58  ;;  %v4033_v40 = vrot.slane %v4028_v57, %v6831_v55  ;;  %v4037_v58 = vrot.slane %v4028_v57, %v6822_v48  ;;  %v4799_v55 = vld [vmem:[#allocation30] ss:$0 sm:$0xff] }
 0xfcc   : > { %5065 = vmatmul.mubr.bf16.vlgmr.msra.gmra.mrb[28].mxu0 %v3881_v14 }
 0xfcd   : > { %4871 = vmatpush3.bf16.msra.mxu0 %v5408_v24 }
 0xfce   : > { %4872 = vmatprep.subr.bf16.mxu0 %v5409_v25 }
 0xfd1   : > { %4873 = vmatpush3.bf16.msra.mxu0 %v5410_v26 }
 0xfd2   : > { %4874 = vmatprep.subr.bf16.mxu0 %v5411_v27 }
 0xfd5   : > { %4875 = vmatpush3.bf16.msra.mxu0 %v5412_v28 }
 0xfd6   : > { %4876 = vmatprep.subr.bf16.mxu0 %v5413_v49 }
 0xfd9   : > { %4877 = vmatpush3.bf16.msra.mxu0 %v5414_v31 }
 0xfda   : > { %4878 = vmatprep.subr.bf16.mxu0 %v5415_v32 }
 0xfdd   : > { %4879 = vmatpush3.bf16.msra.mxu0 %v5416_v33 }
 0xfde   : > { %4880 = vmatprep.subr.bf16.mxu0 %v5417_v34 }
 0xfe1   : > { %4881 = vmatpush3.bf16.msra.mxu0 %v5418_v35 }
 0xfe2   : > { %4882 = vmatprep.subr.bf16.mxu0 %v5419_v56 }
 0xfe5   : > { %4883 = vmatpush3.bf16.msra.mxu0 %v5420_v7 }
 0xfe6   : > { %4884 = vmatprep.subr.bf16.mxu0 %v5421_v38 }
 0xfe9   : > { %4885 = vmatpush3.bf16.msra.mxu0 %v5422_v29 }
0x109f   : > { %v3970_v59 = vpop.f32.mrb[28].mxu0 }
0x10a0   : > { %v3971_v60 = vadd.f32 %v4756_v22, %v3970_v59  ;;  %v5066_v61 = vpop.f32.mrb[29].mxu0 }
0x10a1   : > { %v3973_v62 = vpop.f32.mrb[30].mxu0 }
0x10a2   : > { %v7198_v63 = vadd.f32 %v3971_v60, %v7006_v4  ;;  %v5067_v45 = vpop.f32.mrb[31].mxu0  ;;  %v5391_v4 = vld [vmem:[#allocation25 + $0x24] ss:$8 sps:$4 sm:$0xff]  }
0x10a3   : > { %4124 = vmatprep.subr.bf16.mxu1 %v5391_v4 }
0x10a4   : > { %3979 = vadd.xlane.f32.xlu1 %v7198_v63  ;;  %4125 = vmatpush1.bf16.msra.mxu1 %v5389_v10 }
0x10a5   : > { %4126 = vmatprep.subr.bf16.mxu1 %v5394_v11 }
0x10a8   : > { %4127 = vmatpush1.bf16.msra.mxu1 %v5392_v12 }
0x10a9   : > { %4128 = vmatprep.subr.bf16.mxu1 %v5397_v13 }
0x10ac   : > { %4129 = vmatpush1.bf16.msra.mxu1 %v5395_v15 }
0x10ad   : > { %4130 = vmatprep.subr.bf16.mxu1 %v5400_v16 }
0x10b0   : > { %4131 = vmatpush1.bf16.msra.mxu1 %v5398_v17 }
0x10b1   : > { %4132 = vmatprep.subr.bf16.mxu1 %v5403_v18 }
0x10b4   : > { %4133 = vmatpush1.bf16.msra.mxu1 %v5401_v19 }
0x10b5   : > { %4134 = vmatprep.subr.bf16.mxu1 %v5406_v20 }
0x10b8   : > { %4135 = vmatpush1.bf16.msra.mxu1 %v5404_v21 }
0x1131   : > { %v3980_v0 = vpop.xlane.xlu1 %3979 }
0x1132   : > { %v3981_v1 = vmul.f32 0.0078125, %v3980_v0 }
0x1134   : > { %v7202_v2 = vsub.f32 %v7198_v63, %v3981_v1 }
0x1136   : > { %v3983_v3 = vmul.f32 %v7202_v2, %v7202_v2 }
0x1138   : > { %3984 = vadd.xlane.f32.xlu0 %v3983_v3 }
0x11c5   : > { %v3985_v37 = vpop.xlane.xlu0 %3984 }
0x11c6   : > { %v3986_v39 = vmul.f32 0.007874016, %v3985_v37 }
0x11c8   : > { %5463 = vrsqrt.f32 %v3986_v39  ;;  %vm3989_vm12 = vcmp.eq.f32.partialorder %v3986_v39, inf  ;;  %v3992_v30 = vand.u32 2147483648, %v3986_v39  ;;  %vm3991_vm13 = vcmp.eq.f32.partialorder %v3986_v39, 0.0 }
0x11d2   : > { %v5464_v47 = vpop.eup %5463 }
0x11d3   : > { %v3988_v41 = vmul.f32 %v5464_v47, %v3986_v39 }
0x11d5   : > { %v3990_v52 = vsel %vm3989_vm12, %v3986_v39, %v3988_v41 }
0x11d6   : > { %v3993_v42 = vsel %vm3991_vm13, %v3992_v30, %v3990_v52 }
0x11d7   : > { %v3994_v43 = vadd.f32 1e-06, %v3993_v42 }
0x11d9   : > { %5465 = vrcp.f32 %v3994_v43 }
0x11e3   : > { %v5466_v8 = vpop.eup %5465 }
0x11e4   : > { %v3996_v51 = vmul.f32 %v5466_v8, %v7202_v2 }
0x11e6   : > { %v4003_v54 = vmul.f32 %v4765_v44, %v3996_v51 }
0x11e8   : > { %v4010_v50 = vadd.f32 %v4766_v53, %v4003_v54 }
0x11ea   : > { %v4011_v36 = vpack.c.bf16 %v4010_v50, %v4010_v50 }
0x11ec   : > { %4153 = vmatmul.mubr.bf16.vlgmr.msra.gmra.mrb[56].mxu1 %v4011_v36 }
0x12bf   : > { %v4154_v14 = vpop.f32.mrb[56].mxu1 }
0x12c0   : > { %v4155_v22 = vadd.f32 %v4154_v14, %v4033_v40  ;;  %v4156_v59 = vpop.f32.mrb[57].mxu1 }
0x12c1   : > { %v4157_v60 = vadd.f32 %v4156_v59, %v4037_v58  ;;  %v4158_v61 = vpop.f32.mrb[58].mxu1 }
0x12c2   : > { %v4161_v62 = vmax.f32 %v4155_v22, 0.0  ;;  %v4159_v45 = vpop.f32.mrb[59].mxu1 }
0x12c3   : > { %v4162_v0 = vmax.f32 %v4157_v60, 0.0 }
0x12c4   : > { %v4163_v2 = vpack.c.bf16 %v4161_v62, %v4161_v62 }
0x12c5   : > { %v4164_v1 = vpack.c.bf16 %v4162_v0, %v4162_v0 }
0x12c7   : > { %4325 = vmatprep.mubr.bf16.mxu0 %v4164_v1 }
0x12c8   : > { %4326 = vmatmul.mubr.bf16.vlgmr.msra.gmra.mrb[32].mxu0 %v4163_v2 }
0x139b   : > { %v4886_v3 = vpop.f32.mrb[32].mxu0 }
0x139c   : > { %v4887_v5 = vpop.f32.mrb[33].mxu0 }
0x139d   : > { %v4888_v6 = vadd.f32 %v4887_v5, %v4886_v3  ;;  %v4889_v9 = vpop.f32.mrb[34].mxu0 }
0x139e   : > { %v4890_v46 = vpop.f32.mrb[35].mxu0 }
0x139f   : > { %v4333_v48 = vadd.f32 %v4888_v6, %v7198_v63 }
0x13a1   : > { %v4341_v4 = vadd.f32 %v4799_v55, %v4333_v48 }
0x13a3   : > { %4342 = vst [vmem:[%s1096_s0] sm:$0xff] %v4341_v4 }
0x13a4 PF: > { %s7348_s27 = sld [smem:[#allocation42_spill]]  ;;  %s7349_s24 = sld [smem:[#allocation43_spill]] }
0x13a5   : > { %p45_p3 = scmp.ge.s32.totalorder %s6691_s25, 4   ;;  %s7350_s3 = smov %s6703_s18 }
0x13a7   :  { %47 = sbr.rel (!%p45_p3) target bundleno = 27 (0x1b), region = 245 }
0x13ae   :  { %4362 = vsyncpa [#allocation3], 1 }
0x13af   :  { %4364 = vsyncpa [#allocation3 + $0x1], 1 }
0x13b0   :  { %4365 = vsyncpa [#allocation5], 1 }
0x13b1   :  { %4366 = vsyncpa [#allocation8], 1 }
0x13b2   :  { %4367 = vsyncpa [#allocation11], 1 }
0x13b3   :  { %4368 = vsyncpa [#allocation14], 1 }
0x13b4   :  { %4369 = vsyncpa [#allocation17], 1 }
0x13b5   :  { %4370 = vsyncpa [#allocation20], 1 }
0x13b6   :  { %4371 = vsyncpa [#allocation23], 1 }
0x13b7   :  { %4372 = vsyncpa [#allocation26], 1 }
0x13b8   :  { %4373 = vsyncpa [#allocation29], 1 }

// kernel: decoder_forward.3
= control target key start
LH: loop header
LB: loop body
LE: loop exit
PB: predicated region body
PF: predicated region fallthrough
CT: control target
= control target key end

     0   :  { %s5919_s0 = inlined_call_operand.vmem [shape: f32[2,8,128], index: 0, kind: input, shape index: {}]   ;;  %s5920_s1 = inlined_call_operand.vmem [shape: f32[2,8,128], index: 1, kind: input, shape index: {}]   ;;  %s5921_s2 = inlined_call_operand.vmem [shape: f32[2,8,8], index: 2, kind: input, shape index: {}]   ;;  %s5922_s3 = inlined_call_operand.vmem [shape: f32[2,8,8], index: 3, kind: input, shape index: {}]   ;;  %s5923_s4 = inlined_call_operand.vmem [shape: f32[1,128], index: 4, kind: input, shape index: {}]   ;;  %s5924_s5 = inlined_call_operand.vmem [shape: f32[1,128], index: 5, kind: input, shape index: {}]   ;;  %s5925_s6 = inlined_call_operand.vmem [shape: bf16[128,384], index: 6, kind: input, shape index: {}]   ;;  %s5926_s7 = inlined_call_operand.vmem [shape: f32[1,384], index: 7, kind: input, shape index: {}]   ;;  %s5927_s8 = inlined_call_operand.vmem [shape: bf16[128,128], index: 8, kind: input, shape index: {}]   ;;  %s5928_s9 = inlined_call_operand.vmem [shape: f32[1,128], index: 9, kind: input, shape index: {}]   ;;  %s5929_s10 = inlined_call_operand.vmem [shape: f32[1,128], index: 10, kind: input, shape index: {}]   ;;  %s5930_s11 = inlined_call_operand.vmem [shape: f32[1,128], index: 11, kind: input, shape index: {}]   ;;  %s5931_s12 = inlined_call_operand.vmem [shape: bf16[128,128], index: 12, kind: input, shape index: {}]   ;;  %s5932_s13 = inlined_call_operand.vmem [shape: f32[1,128], index: 13, kind: input, shape index: {}]   ;;  %s5933_s14 = inlined_call_operand.vmem [shape: bf16[128,256], index: 14, kind: input, shape index: {}]   ;;  %s5934_s15 = inlined_call_operand.vmem [shape: f32[1,256], index: 15, kind: input, shape index: {}]   ;;  %s5935_s16 = inlined_call_operand.vmem [shape: bf16[128,128], index: 16, kind: input, shape index: {}]   ;;  %s5936_s17 = inlined_call_operand.vmem [shape: f32[1,128], index: 17, kind: input, shape index: {}]   ;;  %s5937_s18 = inlined_call_operand.vmem [shape: f32[1,128], index: 18, kind: input, shape index: {}]   ;;  %s5938_s19 = inlined_call_operand.vmem [shape: f32[1,128], index: 19, kind: input, shape index: {}]   ;;  %s5939_s20 = inlined_call_operand.vmem [shape: bf16[128,256], index: 20, kind: input, shape index: {}]   ;;  %s5940_s21 = inlined_call_operand.vmem [shape: f32[1,256], index: 21, kind: input, shape index: {}]   ;;  %s5941_s22 = inlined_call_operand.vmem [shape: bf16[256,128], index: 22, kind: input, shape index: {}]   ;;  %s5942_s23 = inlined_call_operand.vmem [shape: f32[1,128], index: 23, kind: input, shape index: {}]   ;;  %s5943_s24 = inlined_call_operand.vmem [shape: f32[1,128], index: 24, kind: input, shape index: {}]   ;;  %s5944_s25 = inlined_call_operand.vmem [shape: f32[1,128], index: 25, kind: input, shape index: {}]   ;;  %s5945_s26 = inlined_call_operand.hbm [shape: f32[2,8,128], index: 26, kind: output, shape index: {}]  }
   0x1   :  { %5963 = sst [smem:[#allocation11_spill]] %s5919_s0 }
   0x2   :  { %5964 = sst [smem:[#allocation12_spill]] %s5920_s1 }
   0x3   :  { %5965 = sst [smem:[#allocation13_spill]] %s5921_s2 }
   0x4   :  { %5966 = sst [smem:[#allocation14_spill]] %s5922_s3 }
   0x5   :  { %5967 = sst [smem:[#allocation15_spill]] %s5923_s4 }
   0x6   :  { %5968 = sst [smem:[#allocation16_spill]] %s5924_s5 }
   0x7   :  { %5969 = sst [smem:[#allocation17_spill]] %s5925_s6 }
   0x8   :  { %5970 = sst [smem:[#allocation18_spill]] %s5926_s7 }
   0x9   :  { %5971 = sst [smem:[#allocation19_spill]] %s5927_s8 }
   0xa   :  { %5972 = sst [smem:[#allocation20_spill]] %s5928_s9 }
   0xb   :  { %5973 = sst [smem:[#allocation21_spill]] %s5929_s10 }
   0xc   :  { %5974 = sst [smem:[#allocation22_spill]] %s5930_s11 }
   0xd   :  { %5975 = sst [smem:[#allocation23_spill]] %s5943_s24 }
   0xe   :  { %5976 = sst [smem:[#allocation24_spill]] %s5944_s25 }
   0xf   :  { %5977 = sst [smem:[#allocation25_spill]] %s5945_s26 }
  0x10   :  { %31 = vsyncpa [#allocation3], 0 }
  0x11   :  { %33 = vsyncpa [#allocation3 + $0x1], 0  ;;  %s5072_s27 = smov 0   ;;  %s5074_s3 = smov 0  }
  0x12   :  { %s5076_s7 = smov 0   ;;  %s5078_s28 = smov 0  }
  0x13 LB: > { %5978 = sst [smem:[#allocation5_spill]] %s4913_s27  ;;  %s5093_s8 = sadd.s32 4294967295, %s4925_s28   ;;  %s4925_s28 = sphi %s5078_s28, %s6009_s28   ;;  %s4921_s7 = sphi %s5076_s7, %s6011_s7   ;;  %s4917_s3 = sphi %s5074_s3, %s6013_s3   ;;  %s4913_s27 = sphi %s5072_s27, %s6012_s27  }
  0x14   : > { %5979 = sst [smem:[#allocation6_spill]] %s4921_s7  ;;  %s4227_s4 = sadd.s32 4294967294, %s4925_s28  }
  0x15   : > { %5980 = sst [smem:[#allocation7_spill]] %s4925_s28  ;;  %s5097_s29 = sadd.s32 1, %s4925_s28  }
  0x16   : > { %5981 = sst [smem:[#allocation8_spill]] %s5097_s29  ;;  %s612_s0 = sadd.s32 1, %s4921_s7 }
  0x17   : > { %s609_s9 = ssub.s32 %s4925_s28, %s5097_s29  ;;  %p622_p0 = scmp.ne.s32.totalorder %s4921_s7, %s4917_s3 }
  0x18   : > { %p610_p1 = scmp.eq.s32.totalorder %s609_s9, 0  ;;  %p623_p2 = scmp.eq.s32.totalorder %s5093_s8, 1 }
  0x19   : > { %p628_p3 = scmp.ne.s32.totalorder %s4917_s3, %s4913_s27  ;;  %p629_p4 = scmp.eq.s32.totalorder %s4227_s4, 1 }
  0x1a   : > { %s5108_s30 = scalar_select %p610_p1, %s4921_s7, %s612_s0  }
  0x1b   : > { %p5110_p5 = por %p623_p2, %p622_p0  ;;  %p5114_p6 = por %p629_p4, %p628_p3 }
  0x1c   : > { %5982 = sst [smem:[#allocation9_spill]] %s5108_s30  ;;  %p4230_p7 = scmp.ge.s32.totalorder %s4925_s28, 1 }
  0x1d   : > { %s5984_s5 = scalar_select %p5114_p6, 1, 0 }
  0x1e   : > { %p741_p8 = scmp.lt.s32.totalorder %s4925_s28, 3 }
  0x1f   : > { %5985 = sst [smem:[#allocation10_spill]] %s5984_s5 }
  0x20   : > { %p742_p9 = pnand %p4230_p7, %p741_p8 }
  0x21   : > { %p822_p10 = scmp.lt.s32.totalorder (!%p742_p9), %s5093_s8, 1  ;;  %s5986_s0 = sld [smem:[#allocation11_spill]] (!%p742_p9)  ;;  %v4927_v8 = vmov (!%p742_p9), 0.0   ;;  %v4928_v22 = vmov (!%p742_p9), 0   ;;  %vm4929_vm0 = vmmov (!%p742_p9), 0   ;;  %v918_v46 = vlaneseq (!%p742_p9) }
  0x22   : > { %745 = sbr.rel (%p742_p9) target bundleno = 4850 (0x12f2), region = 124  ;;  %s5987_s7 = sld [smem:[#allocation17_spill]] (!%p742_p9)  ;;  %4470 = vmatprep.subr.bf16.mxu1 (!%p742_p9), %v4927_v8  ;;  %1093 = vmatprep.mubr.bf16.mxu0 (!%p742_p9), %v4928_v22  ;;  %v4933_v63 = vmov (!%p742_p9), 1983009808   ;;  %vm1609_vm3 = vcmask (!%p742_p9), 261120   ;;  %vm1802_vm5 = vcmask (!%p742_p9), 64512  }
  0x23   : > { %4486 = vmatprep.mubr.msk.bf16.mxu1 (!%p742_p9), %vm4929_vm0, %v4927_v8  ;;  %s5989_s26 = sld [smem:[#allocation15_spill]] (!%p742_p9)  ;;  %s5990_s1 = sld [smem:[#allocation16_spill]] (!%p742_p9)  ;;  %v5231_v47 = vshrl.u32 (!%p742_p9), %v918_v46, 7  ;;  %vm1854_vm6 = vcmask (!%p742_p9), 1043456   ;;  %vm2185_vm7 = vcmask (!%p742_p9), 523264   ;;  %vm2187_vm8 = vcmask (!%p742_p9), 785408  }
  0x24   : > { %s5955_s30 = smov (!%p742_p9), 96   ;;  %s5959_s27 = smov (!%p742_p9), 64  }
  0x25   : > { %v5234_v48 = vsub.s32 (!%p742_p9), 1, %v5231_v47  ;;  %v5246_v55 = vsub.s32 (!%p742_p9), 0, %v5231_v47  ;;  %s5994_s28 = smov (!%p742_p9), 32   ;;  %s5995_s4 = smov (!%p742_p9), 96  }
  0x26   : > { %s5997_s25 = sld [smem:[#allocation12_spill]] (!%p742_p9)  ;;  %s6000_s11 = sld [smem:[#allocation22_spill]] (!%p742_p9) }
  0x27   : > { %s4377_s24 = sshll.u32 (!%p742_p9), %s5093_s8, 7 }
  0x28   : > { %s5988_s29 = smov (!%p742_p9), %s5987_s7  ;;  %v4694_v5 = vld [vmem:[%s5987_s7 + $0x4] ss:$12 sps:$4 sm:$0xff] (!%p742_p9)   ;;  %s5957_s7 = smov (!%p742_p9), 32  }
  0x29   : > { %s823_s10 = scalar_select %p822_p10, %s5093_s8, 1  ;;  %v4696_v6 = vld [vmem:[%s5988_s29] ss:$12 sps:$4 sm:$0xff]   ;;  %v4697_v7 = vld [vmem:[%s5988_s29 + $0x8] ss:$12 sps:$4 sm:$0xff]   ;;  %1061 = vmatprep.subr.bf16.mxu0 %v4694_v5 }
  0x2a   : > { %1062 = vmatpush1.bf16.msra.mxu0 %v4696_v6  ;;  %4471 = vmatpush3.bf16.msra.mxu1 %v4697_v7  ;;  %v4698_v9 = vld [vmem:[%s5988_s29 + $0x1c] ss:$12 sps:$4 sm:$0xff]   ;;  %v4700_v10 = vld [vmem:[%s5988_s29 + $0x18] ss:$12 sps:$4 sm:$0xff]   ;;  %v4701_v11 = vld [vmem:[%s5988_s29 + $0x20] ss:$12 sps:$4 sm:$0xff]  }
  0x2b   : > { %s5122_s6 = sshll.u32 %s823_s10, 3  ;;  %4472 = vmatprep.subr.bf16.mxu1 %v4927_v8  ;;  %1063 = vmatprep.subr.bf16.mxu0 %v4698_v9  ;;  %v4702_v12 = vld [vmem:[%s5988_s29 + $0x34] ss:$12 sps:$4 sm:$0xff]   ;;  %v4704_v13 = vld [vmem:[%s5988_s29 + $0x30] ss:$12 sps:$4 sm:$0xff]   ;;  %s5992_s10 = sld [smem:[#allocation13_spill]] }
  0x2c   : > { %s5128_s9 = scalar_lea.vmem %s5986_s0, %s5122_s6  ;;  %v4705_v14 = vld [vmem:[%s5988_s29 + $0x38] ss:$12 sps:$4 sm:$0xff]   ;;  %v4708_v16 = vld [vmem:[%s5988_s29 + $0x48] ss:$12 sps:$4 sm:$0xff]   ;;  %v4709_v17 = vld [vmem:[%s5988_s29 + $0x50] ss:$12 sps:$4 sm:$0xff]  }
  0x2d   : > { %v839_v0 = vld [vmem:[%s5128_s9] sm:$0xff]  ;;  %v4706_v15 = vld [vmem:[%s5988_s29 + $0x4c] ss:$12 sps:$4 sm:$0xff]   ;;  %v4713_v20 = vld [vmem:[%s5988_s29 + $0x68] ss:$12 sps:$4 sm:$0xff]   ;;  %s5991_s0 = sld [smem:[#allocation18_spill]] }
  0x2e   : > { %850 = vadd.xlane.f32.xlu0 %v839_v0  ;;  %1064 = vmatpush1.bf16.msra.mxu0 %v4700_v10  ;;  %v4710_v18 = vld [vmem:[%s5988_s29 + $0x64] ss:$12 sps:$4 sm:$0xff]   ;;  %v4712_v19 = vld [vmem:[%s5988_s29 + $0x60] ss:$12 sps:$4 sm:$0xff]   ;;  %v4714_v21 = vld [vmem:[%s5988_s29 + $0x7c] ss:$12 sps:$4 sm:$0xff]  }
  0x2f   : > { %4473 = vmatpush3.bf16.msra.mxu1 %v4701_v11  ;;  %1065 = vmatprep.subr.bf16.mxu0 %v4702_v12  ;;  %v4716_v23 = vld [vmem:[%s5988_s29 + $0x78] ss:$12 sps:$4 sm:$0xff]   ;;  %v4717_v24 = vld [vmem:[%s5988_s29 + $0x80] ss:$12 sps:$4 sm:$0xff]   ;;  %v4720_v26 = vld [vmem:[%s5988_s29 + $0x90] ss:$12 sps:$4 sm:$0xff]  }
  0x30   : > { %4474 = vmatprep.subr.bf16.mxu1 %v4927_v8  ;;  %v4718_v25 = vld [vmem:[%s5988_s29 + $0x94] ss:$12 sps:$4 sm:$0xff]   ;;  %v4721_v27 = vld [vmem:[%s5988_s29 + $0x98] ss:$12 sps:$4 sm:$0xff]   ;;  %v4725_v30 = vld [vmem:[%s5988_s29 + $0xb0] ss:$12 sps:$4 sm:$0xff]  }
  0x31   : > { %v4722_v28 = vld [vmem:[%s5988_s29 + $0xac] ss:$12 sps:$4 sm:$0xff]   ;;  %v4724_v29 = vld [vmem:[%s5988_s29 + $0xa8] ss:$12 sps:$4 sm:$0xff]   ;;  %v4236_v40 = vld [vmem:[%s5989_s26] ss:$0 sm:$0xff] }
  0x32   : > { %1066 = vmatpush1.bf16.msra.mxu0 %v4704_v13  ;;  %v4237_v42 = vld [vmem:[%s5990_s1] ss:$0 sm:$0xff]  ;;  %s833_s1 = scalar_lea.vmem %s5992_s10, %s5122_s6  ;;  %s5999_s10 = sld [smem:[#allocation21_spill]] }
  0x33   : > { %4475 = vmatpush3.bf16.msra.mxu1 %v4705_v14  ;;  %1067 = vmatprep.subr.bf16.mxu0 %v4706_v15  ;;  %v5239_v49 = vld [vmem:[%s5991_s0] sm:$0x7]  ;;  %s5993_s0 = sld [smem:[#allocation19_spill]]  ;;  %s6003_s26 = sld [smem:[#allocation24_spill]] }
  0x34   : > { %4476 = vmatprep.subr.bf16.mxu1 %v4927_v8  ;;  %v925_v50 = vrot.slane %v5239_v49, %v5234_v48  ;;  %v921_v61 = vrot.slane %v5239_v49, %v5246_v55  ;;  %s4936_s8 = smov [#allocation2]  }
  0x36   : > { %1068 = vmatpush1.bf16.msra.mxu0 %v4708_v16 }
  0x37   : > { %4477 = vmatpush3.bf16.msra.mxu1 %v4709_v17  ;;  %1069 = vmatprep.subr.bf16.mxu0 %v4710_v18 }
  0x38   : > { %4478 = vmatprep.subr.bf16.mxu1 %v4927_v8 }
  0x3a   : > { %1070 = vmatpush1.bf16.msra.mxu0 %v4712_v19 }
  0x3b   : > { %4479 = vmatpush3.bf16.msra.mxu1 %v4713_v20  ;;  %1071 = vmatprep.subr.bf16.mxu0 %v4714_v21 }
  0x3c   : > { %4480 = vmatprep.subr.bf16.mxu1 %v4927_v8 }
  0x3e   : > { %1072 = vmatpush1.bf16.msra.mxu0 %v4716_v23 }
  0x3f   : > { %4481 = vmatpush3.bf16.msra.mxu1 %v4717_v24  ;;  %1073 = vmatprep.subr.bf16.mxu0 %v4718_v25 }
  0x40   : > { %4482 = vmatprep.subr.bf16.mxu1 %v4927_v8 }
  0x42   : > { %1074 = vmatpush1.bf16.msra.mxu0 %v4720_v26 }
  0x43   : > { %4483 = vmatpush3.bf16.msra.mxu1 %v4721_v27  ;;  %1075 = vmatprep.subr.bf16.mxu0 %v4722_v28 }
  0x44   : > { %4484 = vmatprep.subr.bf16.mxu1 %v4927_v8 }
  0x46   : > { %1076 = vmatpush1.bf16.msra.mxu0 %v4724_v29 }
  0x47   : > { %4485 = vmatpush3.bf16.msra.mxu1 %v4725_v30  ;;  %4514 = vmatprep.subr.bf16.mxu0 %v4927_v8 }
  0x48   : > { %4490 = vmatprep.subr.bf16.mxu1 %v4927_v8 }
  0xbb   : > { %v851_v1 = vpop.xlane.xlu0 %850 }
  0xbc   : > { %v853_v2 = vmul.f32 0.0078125, %v851_v1  ;;  %v4934_v1 = vmov 1934713408  }
  0xbe   : > { %v5131_v3 = vsub.f32 %v839_v0, %v853_v2  ;;  %v1172_v0 = vunpack.c.l.s4 %v4933_v63  ;;  %v1204_v2 = vunpack.c.l.s4 %v4934_v1 }
  0xc0   : > { %v855_v4 = vmul.f32 %v5131_v3, %v5131_v3  ;;  %v1205_v6 = vunpack.c.0.s8 %v1204_v2 }
  0xc2   : > { %856 = vadd.xlane.f32.xlu0 %v855_v4  ;;  %v5260_v14 = vsub.s32 %v1205_v6, %v5231_v47 }
 0x14f   : > { %v857_v31 = vpop.xlane.xlu0 %856 }
 0x150   : > { %v858_v32 = vmul.f32 0.007874016, %v857_v31 }
 0x152   : > { %4814 = vrsqrt.f32 %v858_v32  ;;  %vm861_vm1 = vcmp.eq.f32.partialorder %v858_v32, inf  ;;  %v864_v35 = vand.u32 2147483648, %v858_v32  ;;  %vm863_vm2 = vcmp.eq.f32.partialorder %v858_v32, 0.0 }
 0x15c   : > { %v4815_v33 = vpop.eup %4814 }
 0x15d   : > { %v860_v34 = vmul.f32 %v4815_v33, %v858_v32 }
 0x15f   : > { %v862_v36 = vsel %vm861_vm1, %v858_v32, %v860_v34 }
 0x160   : > { %v865_v37 = vsel %vm863_vm2, %v864_v35, %v862_v36 }
 0x161   : > { %v866_v38 = vadd.f32 1e-06, %v865_v37 }
 0x163   : > { %4816 = vrcp.f32 %v866_v38 }
 0x16d   : > { %v4817_v39 = vpop.eup %4816 }
 0x16e   : > { %v868_v41 = vmul.f32 %v4817_v39, %v5131_v3  ;;  %v1173_v3 = vunpack.c.0.s8 %v1172_v0 }
 0x170   : > { %v875_v43 = vmul.f32 %v4236_v40, %v868_v41  ;;  %v5257_v7 = vsub.s32 %v1173_v3, %v5231_v47 }
 0x172   : > { %v882_v44 = vadd.f32 %v4237_v42, %v875_v43 }
 0x174   : > { %v883_v45 = vpack.c.bf16 %v882_v44, %v882_v44 }
 0x176   : > { %1094 = vmatmul.mubr.bf16.vlgmr.msra.gmra.mrb[0].mxu0 %v883_v45  ;;  %4487 = vmatmul.mubr.bf16.vlgmr.msra.gmra.mrb[0].mxu1 %v883_v45 }
 0x177   : > { %4492 = vmatprep.mubr.msk.bf16.mxu1 %vm4929_vm0, %v4927_v8  ;;  %4516 = vmatprep.mubr.msk.bf16.mxu0 %vm4929_vm0, %v4927_v8 }
 0x249   : > { %v1095_v51 = vpop.f32.mrb[0].mxu0  ;;  %v5243_v52 = vpop.f32.mrb[0].mxu1 }
 0x24a   : > { %v1097_v53 = vpop.f32.mrb[1].mxu0  ;;  %v4488_v54 = vpop.f32.mrb[1].mxu1  ;;  %v1096_v62 = vadd.f32 %v1095_v51, %v921_v61 }
 0x24b   : > { %v1098_v56 = vadd.f32 %v1097_v53, %v925_v50  ;;  %v1099_v57 = vpop.f32.mrb[2].mxu0  ;;  %v1139_v58 = vpop.f32.mrb[2].mxu1 }
 0x24c   : > { %v1100_v59 = vpop.f32.mrb[3].mxu0  ;;  %v4489_v60 = vpop.f32.mrb[3].mxu1 }
 0x24d   : > { %1316 = vrot.lane.b32.xlu0 %v1098_v56, %s5957_s7  ;;  %1310 = vrot.lane.b32.xlu1 %v1098_v56, %s5955_s30 }
 0x251   : > { %1313 = vrot.lane.b32.xlu1 %v1098_v56, %s5959_s27 }
 0x255   : > { %1160 = vrot.lane.b32.xlu1 %v1096_v62, %s5955_s30 }
 0x259   : > { %1163 = vrot.lane.b32.xlu1 %v1096_v62, %s5959_s27 }
 0x25d   : > { %1166 = vrot.lane.b32.xlu1 %v1096_v62, %s5957_s7 }
 0x2bf   : > { %v1317_v4 = vpop.permute.xlu0 %1316  ;;  %v1311_v5 = vpop.permute.xlu1 %1310 }
 0x2c0   : > { %v1335_v9 = vcombine.low %v1311_v5, %v1317_v4  ;;  %v1336_v10 = vcombine.high %v1311_v5, %v1317_v4 }
 0x2c2   : > { %v1343_v15 = vrot.slane %v1335_v9, %v5257_v7  ;;  %v1350_v16 = vrot.slane %v1336_v10, %v5257_v7 }
 0x2c3   : > { %v1314_v11 = vpop.permute.xlu1 %1313 }
 0x2c4   : > { %v1319_v12 = vcombine.low %v1098_v56, %v1314_v11  ;;  %v1320_v13 = vcombine.high %v1098_v56, %v1314_v11 }
 0x2c6   : > { %v1327_v17 = vrot.slane %v1319_v12, %v5257_v7  ;;  %v1334_v18 = vrot.slane %v1320_v13, %v5257_v7 }
 0x2c7   : > { %v1161_v19 = vpop.permute.xlu1 %1160 }
 0x2c8   : > { %v1351_v20 = vcombine.low %v1327_v17, %v1343_v15  ;;  %v1352_v21 = vcombine.high %v1327_v17, %v1343_v15  ;;  %v1367_v23 = vcombine.low %v1334_v18, %v1350_v16  ;;  %v1368_v24 = vcombine.high %v1334_v18, %v1350_v16 }
 0x2ca   : > { %v1359_v25 = vrot.slane %v1351_v20, %v5260_v14  ;;  %v1366_v26 = vrot.slane %v1352_v21, %v5260_v14  ;;  %v1375_v27 = vrot.slane %v1367_v23, %v5260_v14  ;;  %v1382_v28 = vrot.slane %v1368_v24, %v5260_v14 }
 0x2cb   : > { %v1164_v29 = vpop.permute.xlu1 %1163 }
 0x2cc   : > { %v1387_v30 = vcombine.low %v1359_v25, %v1366_v26  ;;  %v4264_v31 = vcombine.high %v1359_v25, %v1366_v26  ;;  %v1403_v32 = vcombine.low %v1375_v27, %v1382_v28  ;;  %v4265_v33 = vcombine.high %v1375_v27, %v1382_v28 }
 0x2cd   : > { %v1169_v34 = vcombine.low %v1096_v62, %v1164_v29  ;;  %v1170_v35 = vcombine.high %v1096_v62, %v1164_v29 }
 0x2ce   : > { %v1394_v36 = vrot.slane %v1387_v30, %v5257_v7  ;;  %v1402_v37 = vrot.slane %v4264_v31, %v5257_v7  ;;  %v1410_v38 = vrot.slane %v1403_v32, %v5257_v7  ;;  %v1418_v39 = vrot.slane %v4265_v33, %v5257_v7 }
 0x2cf   : > { %v1167_v40 = vpop.permute.xlu1 %1166  ;;  %v1177_v45 = vrot.slane %v1169_v34, %v5257_v7  ;;  %v1184_v46 = vrot.slane %v1170_v35, %v5257_v7 }
 0x2d0   : > { %v1185_v41 = vcombine.low %v1161_v19, %v1167_v40  ;;  %v1186_v42 = vcombine.high %v1161_v19, %v1167_v40  ;;  %v1419_v43 = vcombine.low %v1394_v36, %v1402_v37  ;;  %v1435_v44 = vcombine.low %v1410_v38, %v1418_v39 }
 0x2d1   : > { %v1420_v13 = vcombine.high %v1394_v36, %v1402_v37  ;;  %v1436_v18 = vcombine.high %v1410_v38, %v1418_v39 }
 0x2d2   : > { %v1193_v50 = vrot.slane %v1185_v41, %v5257_v7  ;;  %v1200_v51 = vrot.slane %v1186_v42, %v5257_v7  ;;  %v1427_v53 = vrot.slane %v1419_v43, %v5260_v14  ;;  %v1443_v54 = vrot.slane %v1435_v44, %v5260_v14  ;;  %v842_v44 = vld [vmem:[%s833_s1] sm:$0xff] }
 0x2d3   : > { %v1434_v24 = vrot.slane %v1420_v13, %v5260_v14  ;;  %v1450_v25 = vrot.slane %v1436_v18, %v5260_v14  ;;  %vm843_vm4 = vcmp.ne.f32.partialorder %v842_v44, 0.0 }
 0x2d4   : > { %v1201_v56 = vcombine.low %v1177_v45, %v1193_v50  ;;  %v1202_v57 = vcombine.high %v1177_v45, %v1193_v50  ;;  %v1217_v58 = vcombine.low %v1184_v46, %v1200_v51  ;;  %v1218_v59 = vcombine.high %v1184_v46, %v1200_v51 }
 0x2d5   : > { %v1451_v60 = vcombine.low %v1427_v53, %v1443_v54  ;;  %v1452_v17 = vcombine.high %v1427_v53, %v1443_v54  ;;  %v1453_v28 = vcombine.low %v1434_v24, %v1450_v25  ;;  %v1454_v37 = vcombine.high %v1434_v24, %v1450_v25 }
 0x2d6   : > { %v1209_v61 = vrot.slane %v1201_v56, %v5260_v14  ;;  %v1216_v62 = vrot.slane %v1202_v57, %v5260_v14  ;;  %v1225_v63 = vrot.slane %v1217_v58, %v5260_v14  ;;  %v1232_v0 = vrot.slane %v1218_v59, %v5260_v14 }
 0x2d7   : > { %v1455_v1 = vpack.c.bf16 %v1451_v60, %v1451_v60  ;;  %v1456_v23 = vpack.c.bf16 %v1452_v17, %v1452_v17  ;;  %v1457_v32 = vpack.c.bf16 %v1453_v28, %v1453_v28  ;;  %v1458_v39 = vpack.c.bf16 %v1454_v37, %v1454_v37 }
 0x2d8   : > { %v1237_v2 = vcombine.low %v1209_v61, %v1216_v62  ;;  %v4262_v3 = vcombine.high %v1209_v61, %v1216_v62  ;;  %v1253_v4 = vcombine.low %v1225_v63, %v1232_v0  ;;  %v4263_v5 = vcombine.high %v1225_v63, %v1232_v0 }
 0x2d9   : > { %v1614_v6 = vsel %vm1609_vm3, %v1455_v1, 0  ;;  %v1660_v27 = vsel %vm1609_vm3, %v1456_v23, 0  ;;  %v1706_v36 = vsel %vm1609_vm3, %v1457_v32, 0  ;;  %v1752_v41 = vsel %vm1609_vm3, %v1458_v39, 0 }
 0x2da   : > { %v1244_v9 = vrot.slane %v1237_v2, %v5257_v7  ;;  %v1252_v10 = vrot.slane %v4262_v3, %v5257_v7  ;;  %v1260_v11 = vrot.slane %v1253_v4, %v5257_v7  ;;  %v1268_v12 = vrot.slane %v4263_v5, %v5257_v7  ;;  %4491 = vmatpush3.bf16.xpose.msra.mxu1 %v1614_v6 }
 0x2db   : > { %4496 = vmatprep.subr.bf16.mxu1 %v4927_v8  ;;  %v4935_v46 = vmov -1e+09  }
 0x2dc   : > { %v1269_v15 = vcombine.low %v1244_v9, %v1252_v10  ;;  %v1285_v16 = vcombine.low %v1260_v11, %v1268_v12  ;;  %v1270_v29 = vcombine.high %v1244_v9, %v1252_v10  ;;  %v1286_v30 = vcombine.high %v1260_v11, %v1268_v12 }
 0x2dd   : > { %v844_v50 = vsel %vm843_vm4, 0.0, %v4935_v46 }
 0x2de   : > { %v1277_v19 = vrot.slane %v1269_v15, %v5260_v14  ;;  %v1293_v20 = vrot.slane %v1285_v16, %v5260_v14  ;;  %v1284_v34 = vrot.slane %v1270_v29, %v5260_v14  ;;  %v1300_v35 = vrot.slane %v1286_v30, %v5260_v14 }
 0x2e0   : > { %v1301_v21 = vcombine.low %v1277_v19, %v1293_v20  ;;  %v1302_v31 = vcombine.high %v1277_v19, %v1293_v20  ;;  %v1303_v38 = vcombine.low %v1284_v34, %v1300_v35  ;;  %v1304_v42 = vcombine.high %v1284_v34, %v1300_v35 }
 0x2e1   : > { %v928_v19 = vsub.s32 2, %v5231_v47 }
 0x2e2   : > { %v1305_v26 = vpack.c.bf16 %v1301_v21, %v1301_v21  ;;  %v1306_v33 = vpack.c.bf16 %v1302_v31, %v1302_v31  ;;  %v1307_v40 = vpack.c.bf16 %v1303_v38, %v1303_v38  ;;  %v1308_v43 = vpack.c.bf16 %v1304_v42, %v1304_v42 }
 0x2e3   : > { %v929_v20 = vrot.slane %v5239_v49, %v928_v19 }
 0x2e4   : > { %4493 = vmatmul.mubr.msk.bf16.vlgmr.msra.gmra.mrb[4].mxu1 %vm1609_vm3, %v1305_v26 }
 0x2e5   : > { %4497 = vmatpush3.bf16.xpose.msra.mxu1 %v1660_v27  ;;  %4498 = vmatprep.mubr.msk.bf16.mxu1 %vm4929_vm0, %v4927_v8  ;;  %v1137_v21 = vadd.f32 %v5243_v52, %v929_v20 }
 0x2e6   : > { %4502 = vmatprep.subr.bf16.mxu1 %v4927_v8 }
 0x2ec   : > { %4499 = vmatmul.mubr.msk.bf16.vlgmr.msra.gmra.mrb[8].mxu1 %vm1609_vm3, %v1306_v33 }
 0x2ed   : > { %4503 = vmatpush3.bf16.xpose.msra.mxu1 %v1706_v36  ;;  %4504 = vmatprep.mubr.msk.bf16.mxu1 %vm4929_vm0, %v4927_v8 }
 0x2ee   : > { %4508 = vmatprep.subr.bf16.mxu1 %v4927_v8 }
 0x2f4   : > { %4505 = vmatmul.mubr.msk.bf16.vlgmr.msra.gmra.mrb[12].mxu1 %vm1609_vm3, %v1307_v40 }
 0x2f5   : > { %4509 = vmatpush3.bf16.xpose.msra.mxu1 %v1752_v41  ;;  %4510 = vmatprep.mubr.msk.bf16.mxu1 %vm4929_vm0, %v4927_v8 }
 0x2f6   : > { %4520 = vmatprep.subr.bf16.mxu1 %v4927_v8 }
 0x2fc   : > { %4511 = vmatmul.mubr.msk.bf16.vlgmr.msra.gmra.mrb[16].mxu1 %vm1609_vm3, %v1308_v43 }
 0x2fd   : > { %4522 = vmatprep.mubr.msk.bf16.mxu1 %vm4929_vm0, %v4927_v8 }
 0x3b7   : > { %v1650_v45 = vpop.f32.mrb[4].mxu1 }
 0x3b8   : > { %v1794_v51 = vmul.f32 0.17677669, %v1650_v45  ;;  %v4494_v53 = vpop.f32.mrb[5].mxu1 }
 0x3b9   : > { %v1653_v54 = vpop.f32.mrb[6].mxu1 }
 0x3ba   : > { %v4495_v56 = vpop.f32.mrb[7].mxu1  ;;  %v1798_v57 = vadd.f32 %v1794_v51, %v844_v50 }
 0x3bc   : > { %v1803_v58 = vsel %vm1802_vm5, %v1798_v57, -inf }
 0x3bd   : > { %1804 = vmax.xlane.f32.xlu1 %v1803_v58 }
 0x3bf   : > { %v1696_v59 = vpop.f32.mrb[8].mxu1 }
 0x3c0   : > { %v1795_v60 = vmul.f32 0.17677669, %v1696_v59  ;;  %v4500_v61 = vpop.f32.mrb[9].mxu1 }
 0x3c1   : > { %v1699_v62 = vpop.f32.mrb[10].mxu1 }
 0x3c2   : > { %v4501_v63 = vpop.f32.mrb[11].mxu1  ;;  %v1799_v0 = vadd.f32 %v1795_v60, %v844_v50 }
 0x3c4   : > { %v1806_v1 = vsel %vm1802_vm5, %v1799_v0, -inf }
 0x3c5   : > { %1807 = vmax.xlane.f32.xlu0 %v1806_v1 }
 0x3c7   : > { %v1742_v2 = vpop.f32.mrb[12].mxu1 }
 0x3c8   : > { %v1796_v3 = vmul.f32 0.17677669, %v1742_v2  ;;  %v4506_v4 = vpop.f32.mrb[13].mxu1 }
 0x3c9   : > { %v1745_v5 = vpop.f32.mrb[14].mxu1 }
 0x3ca   : > { %v4507_v6 = vpop.f32.mrb[15].mxu1  ;;  %v1800_v9 = vadd.f32 %v1796_v3, %v844_v50 }
 0x3cc   : > { %v1809_v10 = vsel %vm1802_vm5, %v1800_v9, -inf }
 0x3cd   : > { %1810 = vmax.xlane.f32.xlu1 %v1809_v10 }
 0x3cf   : > { %v1788_v11 = vpop.f32.mrb[16].mxu1 }
 0x3d0   : > { %v1797_v12 = vmul.f32 0.17677669, %v1788_v11  ;;  %v4512_v13 = vpop.f32.mrb[17].mxu1 }
 0x3d1   : > { %v1791_v15 = vpop.f32.mrb[18].mxu1 }
 0x3d2   : > { %v4513_v16 = vpop.f32.mrb[19].mxu1  ;;  %v1801_v17 = vadd.f32 %v1797_v12, %v844_v50 }
 0x3d4   : > { %v1812_v18 = vsel %vm1802_vm5, %v1801_v17, -inf }
 0x3d5   : > { %1813 = vmax.xlane.f32.xlu1 %v1812_v18 }
 0x3e6   : > { %1463 = vrot.lane.b32.xlu1 %v1137_v21, %s5959_s27 }
 0x44a   : > { %v1805_v23 = vpop.xlane.xlu1 %1804 }
 0x44b   : > { %v1815_v24 = vsub.f32 %v1798_v57, %v1805_v23 }
 0x44d   : > { %v1819_v25 = vmul.f32 1.442695, %v1815_v24 }
 0x44f   : > { %4818 = vpow2.f32 %v1819_v25 }
 0x452   : > { %v1808_v26 = vpop.xlane.xlu0 %1807 }
 0x453   : > { %v1816_v27 = vsub.f32 %v1799_v0, %v1808_v26 }
 0x455   : > { %v1821_v28 = vmul.f32 1.442695, %v1816_v27 }
 0x457   : > { %4820 = vpow2.f32 %v1821_v28 }
 0x459   : > { %v5327_v29 = vpop.eup %4818 }
 0x45a   : > { %v1827_v30 = vsel %vm1802_vm5, %v5327_v29, 0.0  ;;  %v1811_v52 = vpop.xlane.xlu1 %1810 }
 0x45b   : > { %1828 = vadd.xlane.f32.xlu0 %v1827_v30  ;;  %v1817_v31 = vsub.f32 %v1800_v9, %v1811_v52 }
 0x45d   : > { %v1823_v32 = vmul.f32 1.442695, %v1817_v31 }
 0x45f   : > { %4822 = vpow2.f32 %v1823_v32 }
 0x461   : > { %v5331_v47 = vpop.eup %4820 }
 0x462   : > { %v1830_v49 = vsel %vm1802_vm5, %v5331_v47, 0.0  ;;  %v1814_v33 = vpop.xlane.xlu1 %1813 }
 0x463   : > { %1831 = vadd.xlane.f32.xlu1 %v1830_v49  ;;  %v1818_v34 = vsub.f32 %v1801_v17, %v1814_v33 }
 0x465   : > { %v1825_v35 = vmul.f32 1.442695, %v1818_v34 }
 0x466   : > { %v1464_v40 = vpop.permute.xlu1 %1463 }
 0x467   : > { %4824 = vpow2.f32 %v1825_v35  ;;  %v1469_v43 = vcombine.low %v1137_v21, %v1464_v40  ;;  %v1470_v44 = vcombine.high %v1137_v21, %v1464_v40 }
 0x469   : > { %v5337_v36 = vpop.eup %4822  ;;  %v1477_v54 = vrot.slane %v1469_v43, %v5257_v7  ;;  %v1484_v56 = vrot.slane %v1470_v44, %v5257_v7 }
 0x46a   : > { %v1833_v37 = vsel %vm1802_vm5, %v5337_v36, 0.0 }
 0x471   : > { %1460 = vrot.lane.b32.xlu0 %v1137_v21, %s5955_s30  ;;  %v5341_v38 = vpop.eup %4824 }
 0x472   : > { %v1836_v39 = vsel %vm1802_vm5, %v5341_v38, 0.0 }
 0x474   : > { %1466 = vrot.lane.b32.xlu1 %v1137_v21, %s5957_s7  ;;  %s5996_s7 = sld [smem:[#allocation20_spill]] }
 0x490   : > { %1834 = vadd.xlane.f32.xlu0 %v1833_v37 }
 0x498   : > { %1837 = vadd.xlane.f32.xlu1 %v1836_v39 }
 0x4e8   : > { %v1829_v41 = vpop.xlane.xlu0 %1828 }
 0x4e9   : > { %4826 = vrcp.f32 %v1829_v41 }
 0x4ec   : > { %v1461_v45 = vpop.permute.xlu0 %1460 }
 0x4f0   : > { %v1832_v42 = vpop.xlane.xlu1 %1831 }
 0x4f1   : > { %4828 = vrcp.f32 %v1832_v42 }
 0x4f3   : > { %v4827_v18 = vpop.eup %4826 }
 0x4f4   : > { %v1467_v50 = vpop.permute.xlu1 %1466  ;;  %v1843_v30 = vmul.f32 %v4827_v18, %v5327_v29 }
 0x4f5   : > { %v1485_v51 = vcombine.low %v1461_v45, %v1467_v50  ;;  %v1486_v53 = vcombine.high %v1461_v45, %v1467_v50 }
 0x4f6   : > { %v1847_v37 = vpack.c.bf16 %v1843_v30, %v1843_v30 }
 0x4f7   : > { %v1493_v57 = vrot.slane %v1485_v51, %v5257_v7  ;;  %v1500_v58 = vrot.slane %v1486_v53, %v5257_v7  ;;  %v4726_v53 = vld [vmem:[%s5993_s0] sm:$0xff]  }
 0x4f9   : > { %v1501_v59 = vcombine.low %v1477_v54, %v1493_v57  ;;  %v1502_v60 = vcombine.high %v1477_v54, %v1493_v57  ;;  %v1517_v61 = vcombine.low %v1484_v56, %v1500_v58  ;;  %v1518_v62 = vcombine.high %v1484_v56, %v1500_v58  ;;  %v4729_v54 = vld [vmem:[%s5993_s0 + $0x18] sm:$0xff]   ;;  %v4730_v56 = vld [vmem:[%s5993_s0 + $0x20] sm:$0xff]   ;;  %v4731_v57 = vld [vmem:[%s5993_s0 + $0x28] sm:$0xff]  }
 0x4fb   : > { %v1509_v63 = vrot.slane %v1501_v59, %v5260_v14  ;;  %v1516_v0 = vrot.slane %v1502_v60, %v5260_v14  ;;  %v1525_v1 = vrot.slane %v1517_v61, %v5260_v14  ;;  %v1532_v2 = vrot.slane %v1518_v62, %v5260_v14  ;;  %v4829_v24 = vpop.eup %4828 }
 0x4fc   : > { %v1844_v49 = vmul.f32 %v4829_v24, %v5331_v47 }
 0x4fd   : > { %v1537_v3 = vcombine.low %v1509_v63, %v1516_v0  ;;  %v4266_v4 = vcombine.high %v1509_v63, %v1516_v0  ;;  %v1553_v5 = vcombine.low %v1525_v1, %v1532_v2  ;;  %v4267_v6 = vcombine.high %v1525_v1, %v1532_v2 }
 0x4fe   : > { %v1848_v39 = vpack.c.bf16 %v1844_v49, %v1844_v49 }
 0x4ff   : > { %v1544_v9 = vrot.slane %v1537_v3, %v5257_v7  ;;  %v1552_v10 = vrot.slane %v4266_v4, %v5257_v7  ;;  %v1560_v11 = vrot.slane %v1553_v5, %v5257_v7  ;;  %v1568_v12 = vrot.slane %v4267_v6, %v5257_v7 }
 0x501   : > { %v1569_v13 = vcombine.low %v1544_v9, %v1552_v10  ;;  %v1585_v15 = vcombine.low %v1560_v11, %v1568_v12  ;;  %v1570_v16 = vcombine.high %v1544_v9, %v1552_v10  ;;  %v1586_v17 = vcombine.high %v1560_v11, %v1568_v12 }
 0x503   : > { %v1577_v19 = vrot.slane %v1569_v13, %v5260_v14  ;;  %v1593_v20 = vrot.slane %v1585_v15, %v5260_v14  ;;  %v1584_v21 = vrot.slane %v1570_v16, %v5260_v14  ;;  %v1600_v23 = vrot.slane %v1586_v17, %v5260_v14 }
 0x505   : > { %v1601_v25 = vcombine.low %v1577_v19, %v1593_v20  ;;  %v1602_v26 = vcombine.high %v1577_v19, %v1593_v20  ;;  %v1603_v27 = vcombine.low %v1584_v21, %v1600_v23  ;;  %v1604_v28 = vcombine.high %v1584_v21, %v1600_v23 }
 0x507   : > { %v1605_v52 = vpack.c.bf16 %v1601_v25, %v1601_v25  ;;  %v1606_v31 = vpack.c.bf16 %v1602_v26, %v1602_v26  ;;  %v1607_v34 = vpack.c.bf16 %v1603_v27, %v1603_v27  ;;  %v1608_v35 = vpack.c.bf16 %v1604_v28, %v1604_v28  ;;  %v4732_v26 = vld [vmem:[%s5993_s0 + $0x30] sm:$0xff]  }
 0x509   : > { %v1856_v32 = vsel %vm1854_vm6, %v1605_v52, 0  ;;  %v1902_v33 = vsel %vm1854_vm6, %v1606_v31, 0  ;;  %v1948_v29 = vsel %vm1854_vm6, %v1607_v34, 0  ;;  %v1994_v47 = vsel %vm1854_vm6, %v1608_v35, 0  ;;  %v4733_v34 = vld [vmem:[%s5993_s0 + $0x38] sm:$0xff]  }
 0x50a   : > { %4515 = vmatpush3.bf16.msra.mxu0 %v1856_v32  ;;  %4521 = vmatpush3.bf16.msra.mxu1 %v1902_v33 }
 0x50b   : > { %4526 = vmatprep.subr.bf16.mxu0 %v4927_v8  ;;  %4532 = vmatprep.subr.bf16.mxu1 %v4927_v8 }
 0x50d   : > { %4517 = vmatmul.mubr.msk.bf16.vlgmr.msra.gmra.mrb[4].mxu0 %vm1802_vm5, %v1847_v37  ;;  %4523 = vmatmul.mubr.msk.bf16.vlgmr.msra.gmra.mrb[20].mxu1 %vm1802_vm5, %v1848_v39 }
 0x50e   : > { %4527 = vmatpush3.bf16.msra.mxu0 %v1948_v29  ;;  %4533 = vmatpush3.bf16.msra.mxu1 %v1994_v47 }
 0x50f   : > { %4528 = vmatprep.mubr.msk.bf16.mxu0 %vm4929_vm0, %v4927_v8  ;;  %4534 = vmatprep.mubr.msk.bf16.mxu1 %vm4929_vm0, %v4927_v8 }
 0x510   : > { %4538 = vmatprep.subr.bf16.mxu0 %v4927_v8  ;;  %4558 = vmatprep.subr.bf16.mxu1 %v4927_v8 }
 0x51d   : > { %v1835_v40 = vpop.xlane.xlu0 %1834 }
 0x51e   : > { %4830 = vrcp.f32 %v1835_v40 }
 0x525   : > { %v1838_v41 = vpop.xlane.xlu1 %1837 }
 0x526   : > { %4832 = vrcp.f32 %v1838_v41 }
 0x528   : > { %v4831_v42 = vpop.eup %4830 }
 0x529   : > { %v1845_v43 = vmul.f32 %v4831_v42, %v5337_v36  ;;  %v4727_v36 = vld [vmem:[%s5993_s0 + $0x8] sm:$0xff]  }
 0x52b   : > { %v1849_v44 = vpack.c.bf16 %v1845_v43, %v1845_v43 }
 0x52d   : > { %4529 = vmatmul.mubr.msk.bf16.vlgmr.msra.gmra.mrb[8].mxu0 %vm1802_vm5, %v1849_v44 }
 0x52e   : > { %4554 = vmatprep.mubr.msk.bf16.mxu0 %vm4929_vm0, %v4927_v8  ;;  %4539 = vmatpush3.bf16.msra.mxu0 %v4726_v53 }
 0x52f   : > { %4540 = vmatprep.subr.bf16.mxu0 %v4927_v8 }
 0x530   : > { %v4833_v45 = vpop.eup %4832 }
 0x531   : > { %v1846_v50 = vmul.f32 %v4833_v45, %v5341_v38  ;;  %v4728_v38 = vld [vmem:[%s5993_s0 + $0x10] sm:$0xff]   ;;  %s5998_s0 = smov 64  }
 0x532   : > { %4541 = vmatpush3.bf16.msra.mxu0 %v4727_v36 }
 0x533   : > { %v1850_v51 = vpack.c.bf16 %v1846_v50, %v1846_v50  ;;  %4542 = vmatprep.subr.bf16.mxu0 %v4927_v8 }
 0x535   : > { %4535 = vmatmul.mubr.msk.bf16.vlgmr.msra.gmra.mrb[24].mxu1 %vm1802_vm5, %v1850_v51 }
 0x536   : > { %4574 = vmatprep.mubr.msk.bf16.mxu1 %vm4929_vm0, %v4927_v8  ;;  %4543 = vmatpush3.bf16.msra.mxu0 %v4728_v38 }
 0x537   : > { %4544 = vmatprep.subr.bf16.mxu0 %v4927_v8 }
 0x53a   : > { %4545 = vmatpush3.bf16.msra.mxu0 %v4729_v54 }
 0x53b   : > { %4546 = vmatprep.subr.bf16.mxu0 %v4927_v8 }
 0x53e   : > { %4547 = vmatpush3.bf16.msra.mxu0 %v4730_v56 }
 0x53f   : > { %4548 = vmatprep.subr.bf16.mxu0 %v4927_v8 }
 0x542   : > { %4549 = vmatpush3.bf16.msra.mxu0 %v4731_v57 }
 0x543   : > { %4550 = vmatprep.subr.bf16.mxu0 %v4927_v8 }
 0x546   : > { %4551 = vmatpush3.bf16.msra.mxu0 %v4732_v26 }
 0x547   : > { %4552 = vmatprep.subr.bf16.mxu0 %v4927_v8 }
 0x54a   : > { %4553 = vmatpush3.bf16.msra.mxu0 %v4733_v34  ;;  %v4761_v34 = vld [vmem:[%s5931_s12 + $0x18] sm:$0xff]  }
 0x5e0   : > { %v1892_v58 = vpop.f32.mrb[4].mxu0  ;;  %v1938_v59 = vpop.f32.mrb[20].mxu1 }
 0x5e1   : > { %v4518_v60 = vpop.f32.mrb[5].mxu0  ;;  %v4524_v61 = vpop.f32.mrb[21].mxu1 }
 0x5e2   : > { %v1895_v62 = vpop.f32.mrb[6].mxu0  ;;  %v1941_v63 = vpop.f32.mrb[22].mxu1 }
 0x5e3   : > { %v4519_v0 = vpop.f32.mrb[7].mxu0  ;;  %v4525_v1 = vpop.f32.mrb[23].mxu1  ;;  %v4278_v62 = vld [vmem:[%s5996_s7] ss:$0 sm:$0xff]  ;;  %s6004_s7 = sld [smem:[#allocation25_spill]] }
 0x5e9   : > { %s6005_s30 = smov %s6004_s7 }
 0x600   : > { %v1984_v2 = vpop.f32.mrb[8].mxu0 }
 0x601   : > { %v2036_v3 = vcombine.low %v1892_v58, %v1984_v2  ;;  %v2037_v4 = vcombine.high %v1892_v58, %v1984_v2  ;;  %v4530_v5 = vpop.f32.mrb[9].mxu0 }
 0x602   : > { %v1987_v6 = vpop.f32.mrb[10].mxu0 }
 0x603   : > { %v4531_v9 = vpop.f32.mrb[11].mxu0  ;;  %v2044_v16 = vrot.slane %v2036_v3, %v5257_v7  ;;  %v2051_v17 = vrot.slane %v2037_v4, %v5257_v7  ;;  %v4862_v3 = vld [vmem:[%s5128_s9] sm:$0xff]  ;;  %s6001_s9 = sld [smem:[#allocation14_spill]] }
 0x604   : > { %v4734_v6 = vld [vmem:[%s5933_s14] ss:$8 sps:$4 sm:$0xff]   ;;  %v4736_v9 = vld [vmem:[%s5933_s14 + $0x4] ss:$8 sps:$4 sm:$0xff]  }
 0x605   : > { %2539 = vmatprep.subr.bf16.mxu0 %v4736_v9 }
 0x608   : > { %v2030_v10 = vpop.f32.mrb[24].mxu1 }
 0x609   : > { %v2052_v11 = vcombine.low %v1938_v59, %v2030_v10  ;;  %v2053_v12 = vcombine.high %v1938_v59, %v2030_v10  ;;  %v4536_v13 = vpop.f32.mrb[25].mxu1  ;;  %v4739_v10 = vld [vmem:[%s5933_s14 + $0x14] ss:$8 sps:$4 sm:$0xff]   ;;  %s837_s29 = scalar_lea.vmem %s6001_s9, %s5122_s6 }
 0x60a   : > { %v2033_v15 = vpop.f32.mrb[26].mxu1  ;;  %v4740_v13 = vld [vmem:[%s5933_s14 + $0x20] ss:$8 sps:$4 sm:$0xff]  }
 0x60b   : > { %v2060_v18 = vrot.slane %v2052_v11, %v5257_v7  ;;  %v2067_v19 = vrot.slane %v2053_v12, %v5257_v7  ;;  %v4537_v20 = vpop.f32.mrb[27].mxu1  ;;  %v4737_v11 = vld [vmem:[%s5933_s14 + $0x10] ss:$8 sps:$4 sm:$0xff]   ;;  %v4742_v12 = vld [vmem:[%s5933_s14 + $0x24] ss:$8 sps:$4 sm:$0xff]  }
 0x60c   : > { %v4745_v15 = vld [vmem:[%s5933_s14 + $0x34] ss:$8 sps:$4 sm:$0xff]   ;;  %v4749_v20 = vld [vmem:[%s5933_s14 + $0x50] ss:$8 sps:$4 sm:$0xff]  }
 0x60d   : > { %v2068_v21 = vcombine.low %v2044_v16, %v2060_v18  ;;  %v2069_v23 = vcombine.high %v2044_v16, %v2060_v18  ;;  %v2084_v24 = vcombine.low %v2051_v17, %v2067_v19  ;;  %v2085_v25 = vcombine.high %v2051_v17, %v2067_v19  ;;  %v4743_v16 = vld [vmem:[%s5933_s14 + $0x30] ss:$8 sps:$4 sm:$0xff]   ;;  %v4748_v17 = vld [vmem:[%s5933_s14 + $0x44] ss:$8 sps:$4 sm:$0xff]   ;;  %v4746_v18 = vld [vmem:[%s5933_s14 + $0x40] ss:$8 sps:$4 sm:$0xff]  }
 0x60e   : > { %v4751_v19 = vld [vmem:[%s5933_s14 + $0x54] ss:$8 sps:$4 sm:$0xff]  }
 0x60f   : > { %v2076_v27 = vrot.slane %v2068_v21, %v5260_v14  ;;  %v2083_v28 = vrot.slane %v2069_v23, %v5260_v14  ;;  %v2092_v30 = vrot.slane %v2084_v24, %v5260_v14  ;;  %v2099_v49 = vrot.slane %v2085_v25, %v5260_v14  ;;  %v4754_v21 = vld [vmem:[%s5933_s14 + $0x64] ss:$8 sps:$4 sm:$0xff]   ;;  %v4752_v23 = vld [vmem:[%s5933_s14 + $0x60] ss:$8 sps:$4 sm:$0xff]   ;;  %v4757_v24 = vld [vmem:[%s5933_s14 + $0x74] ss:$8 sps:$4 sm:$0xff]  }
 0x610   : > { %v4755_v25 = vld [vmem:[%s5933_s14 + $0x70] ss:$8 sps:$4 sm:$0xff]  }
 0x611   : > { %v2104_v52 = vcombine.low %v2076_v27, %v2083_v28  ;;  %v4276_v31 = vcombine.high %v2076_v27, %v2083_v28  ;;  %v2120_v32 = vcombine.low %v2092_v30, %v2099_v49  ;;  %v4277_v33 = vcombine.high %v2092_v30, %v2099_v49 }
 0x613   : > { %v2111_v35 = vrot.slane %v2104_v52, %v5257_v7  ;;  %v2119_v37 = vrot.slane %v4276_v31, %v5257_v7  ;;  %v2127_v39 = vrot.slane %v2120_v32, %v5257_v7  ;;  %v2135_v29 = vrot.slane %v4277_v33, %v5257_v7  ;;  %v4758_v31 = vld [vmem:[%s5931_s12] sm:$0xff]   ;;  %v4759_v32 = vld [vmem:[%s5931_s12 + $0x8] sm:$0xff]   ;;  %v4760_v33 = vld [vmem:[%s5931_s12 + $0x10] sm:$0xff]  }
 0x614   : > { %4559 = vmatpush3.bf16.msra.mxu1 %v4758_v31 }
 0x615   : > { %v2137_v47 = vcombine.high %v2111_v35, %v2119_v37  ;;  %v2153_v40 = vcombine.high %v2127_v39, %v2135_v29  ;;  %v2136_v41 = vcombine.low %v2111_v35, %v2119_v37  ;;  %v2152_v42 = vcombine.low %v2127_v39, %v2135_v29  ;;  %4560 = vmatprep.subr.bf16.mxu1 %v4927_v8  ;;  %v4762_v35 = vld [vmem:[%s5931_s12 + $0x20] sm:$0xff]   ;;  %v4763_v37 = vld [vmem:[%s5931_s12 + $0x28] sm:$0xff]   ;;  %v4764_v39 = vld [vmem:[%s5931_s12 + $0x30] sm:$0xff]  }
 0x616   : > { %v4765_v29 = vld [vmem:[%s5931_s12 + $0x38] sm:$0xff]  }
 0x617   : > { %v2151_v43 = vrot.slane %v2137_v47, %v5260_v14  ;;  %v2167_v44 = vrot.slane %v2153_v40, %v5260_v14  ;;  %v2144_v45 = vrot.slane %v2136_v41, %v5260_v14  ;;  %v2160_v50 = vrot.slane %v2152_v42, %v5260_v14  ;;  %v2447_v47 = vld [vmem:[%s5934_s15] sm:$0x3] }
 0x618   : > { %4561 = vmatpush3.bf16.msra.mxu1 %v4759_v32  ;;  %v2452_v40 = vrot.slane %v2447_v47, %v5246_v55  ;;  %v2456_v41 = vrot.slane %v2447_v47, %v5234_v48 }
 0x619   : > { %v2170_v51 = vcombine.low %v2151_v43, %v2167_v44  ;;  %v2169_v53 = vcombine.high %v2144_v45, %v2160_v50  ;;  %v2171_v36 = vcombine.high %v2151_v43, %v2167_v44  ;;  %v2168_v38 = vcombine.low %v2144_v45, %v2160_v50  ;;  %4562 = vmatprep.subr.bf16.mxu1 %v4927_v8 }
 0x61b   : > { %2177 = vrot.lane.b32.xlu1 %v2170_v51, %s5959_s27  ;;  %2173 = vrot.lane.b32.xlu0 %v2169_v53, %s5994_s28  ;;  %s829_s27 = scalar_lea.vmem %s5997_s25, %s5122_s6 }
 0x61c   : > { %v840_v26 = vld [vmem:[%s829_s27] sm:$0xff]  ;;  %4563 = vmatpush3.bf16.msra.mxu1 %v4760_v33 }
 0x61d   : > { %v841_v27 = vpack.c.bf16 %v840_v26, %v840_v26  ;;  %4564 = vmatprep.subr.bf16.mxu1 %v4927_v8 }
 0x61f   : > { %2181 = vrot.lane.b32.xlu0 %v2171_v36, %s5995_s4 }
 0x620   : > { %4565 = vmatpush3.bf16.msra.mxu1 %v4761_v34 }
 0x621   : > { %4566 = vmatprep.subr.bf16.mxu1 %v4927_v8 }
 0x624   : > { %4567 = vmatpush3.bf16.msra.mxu1 %v4762_v35 }
 0x625   : > { %4568 = vmatprep.subr.bf16.mxu1 %v4927_v8 }
 0x628   : > { %4569 = vmatpush3.bf16.msra.mxu1 %v4763_v37 }
 0x629   : > { %4570 = vmatprep.subr.bf16.mxu1 %v4927_v8 }
 0x62c   : > { %4571 = vmatpush3.bf16.msra.mxu1 %v4764_v39 }
 0x62d   : > { %4572 = vmatprep.subr.bf16.mxu1 %v4927_v8 }
 0x630   : > { %4573 = vmatpush3.bf16.msra.mxu1 %v4765_v29 }
 0x631   : > { %4578 = vmatprep.subr.bf16.mxu1 %v4927_v8 }
 0x68d   : > { %v2174_v54 = vpop.permute.xlu0 %2173  ;;  %v2178_v56 = vpop.permute.xlu1 %2177 }
 0x68e   : > { %v2184_v57 = vsel %vm1609_vm3, %v2168_v38, %v2174_v54 }
 0x68f   : > { %v2186_v59 = vsel %vm2185_vm7, %v2184_v57, %v2178_v56 }
 0x691   : > { %v2182_v58 = vpop.permute.xlu0 %2181 }
 0x692   : > { %v2188_v60 = vsel %vm2187_vm8, %v2186_v59, %v2182_v58 }
 0x693   : > { %v2189_v61 = vpack.c.bf16 %v2188_v60, %v2188_v60 }
 0x695   : > { %4555 = vmatmul.mubr.bf16.vlgmr.msra.gmra.mrb[12].mxu0 %v2189_v61  ;;  %v4287_v61 = vld [vmem:[%s5999_s10] ss:$0 sm:$0xff]  ;;  %s819_s10 = sand.u32 1, %s4917_s3  }
 0x696   : > { %2571 = vmatprep.mubr.bf16.mxu0 %v4928_v22  ;;  %2540 = vmatpush1.bf16.msra.mxu0 %v4734_v6  ;;  %s4231_s27 = sshll.u32 %s819_s10, 3  ;;  %s4119_s1 = scalar_lea.sflag [#allocation3], %s819_s10 }
 0x697   : > { %2541 = vmatprep.subr.bf16.mxu0 %v4739_v10  ;;  %s821_s5 = scalar_lea.vmem [#allocation2], %s4231_s27  ;;  %s4867_s27 = sshll.u32 %s4936_s8, 4  ;;  %s4868_s27 = int_to_ptr.vmem [resolvable:$false] %s4867_s27 }
 0x698   : > { %s4132_s9 = sshll.u32 %s821_s5, 4  ;;  %s5879_s9 = int_to_ptr.vmem [resolvable:$true] %s4132_s9 }
 0x699   : > { %p4870_p0 = scmp.lt.s32.totalorder %s5879_s9, %s4868_s27 }
 0x69a   : > { %2542 = vmatpush1.bf16.msra.mxu0 %v4737_v11 }
 0x69b   : > { %2543 = vmatprep.subr.bf16.mxu0 %v4742_v12 }
 0x69e   : > { %2544 = vmatpush1.bf16.msra.mxu0 %v4740_v13 }
 0x69f   : > { %2545 = vmatprep.subr.bf16.mxu0 %v4745_v15 }
 0x6a2   : > { %2546 = vmatpush1.bf16.msra.mxu0 %v4743_v16 }
 0x6a3   : > { %2547 = vmatprep.subr.bf16.mxu0 %v4748_v17 }
 0x6a6   : > { %2548 = vmatpush1.bf16.msra.mxu0 %v4746_v18 }
 0x6a7   : > { %2549 = vmatprep.subr.bf16.mxu0 %v4751_v19 }
 0x6aa   : > { %2550 = vmatpush1.bf16.msra.mxu0 %v4749_v20 }
 0x6ab   : > { %2551 = vmatprep.subr.bf16.mxu0 %v4754_v21 }
 0x6ae   : > { %2552 = vmatpush1.bf16.msra.mxu0 %v4752_v23 }
 0x6af   : > { %2553 = vmatprep.subr.bf16.mxu0 %v4757_v24 }
 0x6b2   : > { %2554 = vmatpush1.bf16.msra.mxu0 %v4755_v25 }
 0x6b3   : > { %4602 = vmatprep.subr.bf16.mxu0 %v4927_v8 }
 0x6b5   : > { %2572 = vmatmul.mubr.bf16.vlgmr.msra.gmra.mrb[16].mxu0 %v841_v27 }
 0x6b6   : > { %4604 = vmatprep.mubr.msk.bf16.mxu0 %vm4929_vm0, %v4927_v8 }
 0x768   : > { %v2278_v63 = vpop.f32.mrb[12].mxu0 }
 0x769   : > { %v2279_v0 = vadd.f32 %v4278_v62, %v2278_v63  ;;  %v4556_v1 = vpop.f32.mrb[13].mxu0  ;;  %v4288_v63 = vld [vmem:[%s6000_s11] ss:$0 sm:$0xff]  ;;  %s5877_s11 = scalar_lea.hbm %s6004_s7, %s4377_s24 }
 0x76a   : > { %v2281_v2 = vpop.f32.mrb[14].mxu0 }
 0x76b   : > { %v5443_v4 = vadd.f32 %v4862_v3, %v2279_v0  ;;  %v4557_v5 = vpop.f32.mrb[15].mxu0 }
 0x76d   : > { %2287 = vadd.xlane.f32.xlu1 %v5443_v4 }
 0x788   : > { %v2573_v42 = vpop.f32.mrb[16].mxu0 }
 0x789   : > { %v2574_v43 = vadd.f32 %v2573_v42, %v2452_v40  ;;  %v2575_v44 = vpop.f32.mrb[17].mxu0 }
 0x78a   : > { %v5539_v45 = vadd.f32 %v2575_v44, %v2456_v41  ;;  %v2577_v50 = vpop.f32.mrb[18].mxu0 }
 0x78b   : > { %2751 = vrot.lane.b32.xlu1 %v2574_v43, %s5998_s0  ;;  %v2578_v51 = vpop.f32.mrb[19].mxu0 }
 0x78f   : > { %2754 = vrot.lane.b32.xlu1 %v2574_v43, %s5994_s28 }
 0x7fa   : > { %v2288_v28 = vpop.xlane.xlu1 %2287 }
 0x7fb   : > { %v2289_v30 = vmul.f32 0.0078125, %v2288_v28 }
 0x7fd   : > { %v2290_v49 = vsub.f32 %v5443_v4, %v2289_v30 }
 0x7fe   : > { %v2752_v3 = vpop.permute.xlu1 %2751 }
 0x7ff   : > { %v2291_v52 = vmul.f32 %v2290_v49, %v2290_v49  ;;  %v2757_v9 = vcombine.low %v2574_v43, %v2752_v3  ;;  %v2758_v10 = vcombine.high %v2574_v43, %v2752_v3 }
 0x801   : > { %2292 = vadd.xlane.f32.xlu0 %v2291_v52  ;;  %v2765_v13 = vrot.slane %v2757_v9, %v5257_v7  ;;  %v2772_v15 = vrot.slane %v2758_v10, %v5257_v7 }
 0x802   : > { %v2755_v5 = vpop.permute.xlu1 %2754 }
 0x817   : > { %2748 = vrot.lane.b32.xlu0 %v2574_v43, %s5995_s4 }
 0x88e   : > { %v2293_v53 = vpop.xlane.xlu0 %2292 }
 0x88f   : > { %v2294_v36 = vmul.f32 0.007874016, %v2293_v53 }
 0x891   : > { %4834 = vrsqrt.f32 %v2294_v36  ;;  %vm2297_vm9 = vcmp.eq.f32.partialorder %v2294_v36, inf  ;;  %v2300_v56 = vand.u32 2147483648, %v2294_v36  ;;  %vm2299_vm10 = vcmp.eq.f32.partialorder %v2294_v36, 0.0 }
 0x892   : > { %v2749_v6 = vpop.permute.xlu0 %2748 }
 0x893   : > { %v2773_v11 = vcombine.low %v2749_v6, %v2755_v5  ;;  %v2774_v12 = vcombine.high %v2749_v6, %v2755_v5 }
 0x895   : > { %v2781_v16 = vrot.slane %v2773_v11, %v5257_v7  ;;  %v2788_v17 = vrot.slane %v2774_v12, %v5257_v7 }
 0x897   : > { %v2789_v18 = vcombine.low %v2765_v13, %v2781_v16  ;;  %v2790_v19 = vcombine.high %v2765_v13, %v2781_v16  ;;  %v2805_v20 = vcombine.low %v2772_v15, %v2788_v17  ;;  %v2806_v21 = vcombine.high %v2772_v15, %v2788_v17 }
 0x899   : > { %v2797_v23 = vrot.slane %v2789_v18, %v5260_v14  ;;  %v2804_v24 = vrot.slane %v2790_v19, %v5260_v14  ;;  %v2813_v25 = vrot.slane %v2805_v20, %v5260_v14  ;;  %v2820_v26 = vrot.slane %v2806_v21, %v5260_v14 }
 0x89b   : > { %v4835_v38 = vpop.eup %4834  ;;  %v2825_v27 = vcombine.low %v2797_v23, %v2804_v24  ;;  %v4316_v28 = vcombine.high %v2797_v23, %v2804_v24  ;;  %v2841_v30 = vcombine.low %v2813_v25, %v2820_v26 }
 0x89c   : > { %v2296_v54 = vmul.f32 %v4835_v38, %v2294_v36 }
 0x89d   : > { %v2832_v52 = vrot.slane %v2825_v27, %v5257_v7  ;;  %v2840_v31 = vrot.slane %v4316_v28, %v5257_v7  ;;  %v2848_v32 = vrot.slane %v2841_v30, %v5257_v7 }
 0x89e   : > { %v2298_v57 = vsel %vm2297_vm9, %v2294_v36, %v2296_v54  ;;  %v4289_v36 = vld [vmem:[%s5932_s13] ss:$0 sm:$0xff] }
 0x89f   : > { %v2301_v58 = vsel %vm2299_vm10, %v2300_v56, %v2298_v57  ;;  %v2857_v34 = vcombine.low %v2832_v52, %v2840_v31  ;;  %v2858_v37 = vcombine.high %v2832_v52, %v2840_v31 }
 0x8a0   : > { %v2302_v59 = vadd.f32 1e-06, %v2301_v58 }
 0x8a1   : > { %v2865_v29 = vrot.slane %v2857_v34, %v5260_v14  ;;  %v2872_v40 = vrot.slane %v2858_v37, %v5260_v14 }
 0x8a2   : > { %4836 = vrcp.f32 %v2302_v59 }
 0x8ac   : > { %v4837_v60 = vpop.eup %4836 }
 0x8ad   : > { %v2304_v62 = vmul.f32 %v4837_v60, %v2290_v49  ;;  %v4317_v49 = vcombine.high %v2813_v25, %v2820_v26 }
 0x8af   : > { %v2311_v0 = vmul.f32 %v4287_v61, %v2304_v62  ;;  %v2856_v33 = vrot.slane %v4317_v49, %v5257_v7 }
 0x8b1   : > { %v2318_v1 = vadd.f32 %v4288_v63, %v2311_v0  ;;  %v2873_v35 = vcombine.low %v2848_v32, %v2856_v33  ;;  %v2874_v39 = vcombine.high %v2848_v32, %v2856_v33 }
 0x8b3   : > { %v2319_v2 = vpack.c.bf16 %v2318_v1, %v2318_v1  ;;  %v2881_v47 = vrot.slane %v2873_v35, %v5260_v14  ;;  %v2888_v41 = vrot.slane %v2874_v39, %v5260_v14 }
 0x8b5   : > { %4575 = vmatmul.mubr.bf16.vlgmr.msra.gmra.mrb[28].mxu1 %v2319_v2  ;;  %v2889_v42 = vcombine.low %v2865_v29, %v2881_v47  ;;  %v2890_v43 = vcombine.high %v2865_v29, %v2881_v47  ;;  %v5568_v44 = vcombine.low %v2872_v40, %v2888_v41  ;;  %v5570_v50 = vcombine.high %v2872_v40, %v2888_v41 }
 0x8b6   : > { %4580 = vmatprep.mubr.msk.bf16.mxu1 %vm4929_vm0, %v4927_v8 }
 0x8b7   : > { %v2893_v51 = vpack.c.bf16 %v2889_v42, %v2889_v42  ;;  %v2894_v31 = vpack.c.bf16 %v2890_v43, %v2890_v43  ;;  %v2895_v39 = vpack.c.bf16 %v5568_v44, %v5568_v44  ;;  %v2896_v43 = vpack.c.bf16 %v5570_v50, %v5570_v50  ;;  %v845_v50 = vld [vmem:[%s837_s29] sm:$0xff] }
 0x8b8   : > { %vm846_vm11 = vcmp.ne.f32.partialorder %v845_v50, 0.0 }
 0x8b9   : > { %v3051_v53 = vsel %vm1609_vm3, %v2893_v51, 0  ;;  %v3097_v33 = vsel %vm1609_vm3, %v2894_v31, 0  ;;  %v3143_v41 = vsel %vm1609_vm3, %v2895_v39, 0  ;;  %v3189_v51 = vsel %vm1609_vm3, %v2896_v43, 0 }
 0x8ba   : > { %4579 = vmatpush3.bf16.xpose.msra.mxu1 %v3051_v53 }
 0x8bb   : > { %4584 = vmatprep.subr.bf16.mxu1 %v4927_v8 }
 0x988   : > { %v2425_v38 = vpop.f32.mrb[28].mxu1 }
 0x989   : > { %v2426_v54 = vadd.f32 %v4289_v36, %v2425_v38  ;;  %v4576_v56 = vpop.f32.mrb[29].mxu1 }
 0x98a   : > { %v2428_v57 = vpop.f32.mrb[30].mxu1 }
 0x98b   : > { %2601 = vrot.lane.b32.xlu1 %v2426_v54, %s5998_s0  ;;  %2598 = vrot.lane.b32.xlu0 %v2426_v54, %s5995_s4  ;;  %v4577_v58 = vpop.f32.mrb[31].mxu1 }
 0x98f   : > { %2604 = vrot.lane.b32.xlu0 %v2426_v54, %s5994_s28 }
 0x9fd   : > { %v2602_v59 = vpop.permute.xlu1 %2601  ;;  %v2599_v60 = vpop.permute.xlu0 %2598 }
 0x9fe   : > { %v2607_v61 = vcombine.low %v2426_v54, %v2602_v59  ;;  %v2608_v62 = vcombine.high %v2426_v54, %v2602_v59  ;;  %v847_v54 = vsel %vm846_vm11, 0.0, %v4935_v46 }
 0xa00   : > { %v2615_v2 = vrot.slane %v2607_v61, %v5257_v7  ;;  %v2622_v3 = vrot.slane %v2608_v62, %v5257_v7 }
 0xa01   : > { %v2605_v63 = vpop.permute.xlu0 %2604 }
 0xa02   : > { %v2623_v0 = vcombine.low %v2599_v60, %v2605_v63  ;;  %v2624_v1 = vcombine.high %v2599_v60, %v2605_v63 }
 0xa04   : > { %v2631_v5 = vrot.slane %v2623_v0, %v5257_v7  ;;  %v2638_v6 = vrot.slane %v2624_v1, %v5257_v7 }
 0xa06   : > { %v2639_v9 = vcombine.low %v2615_v2, %v2631_v5  ;;  %v2640_v10 = vcombine.high %v2615_v2, %v2631_v5  ;;  %v2655_v11 = vcombine.low %v2622_v3, %v2638_v6  ;;  %v2656_v12 = vcombine.high %v2622_v3, %v2638_v6 }
 0xa08   : > { %v2647_v13 = vrot.slane %v2639_v9, %v5260_v14  ;;  %v2654_v15 = vrot.slane %v2640_v10, %v5260_v14  ;;  %v2663_v16 = vrot.slane %v2655_v11, %v5260_v14  ;;  %v2670_v17 = vrot.slane %v2656_v12, %v5260_v14 }
 0xa0a   : > { %v2675_v18 = vcombine.low %v2647_v13, %v2654_v15  ;;  %v4314_v19 = vcombine.high %v2647_v13, %v2654_v15  ;;  %v2691_v20 = vcombine.low %v2663_v16, %v2670_v17  ;;  %v4315_v21 = vcombine.high %v2663_v16, %v2670_v17 }
 0xa0c   : > { %v2682_v23 = vrot.slane %v2675_v18, %v5257_v7  ;;  %v2690_v24 = vrot.slane %v4314_v19, %v5257_v7  ;;  %v2698_v25 = vrot.slane %v2691_v20, %v5257_v7  ;;  %v2706_v26 = vrot.slane %v4315_v21, %v5257_v7 }
 0xa0e   : > { %v2707_v27 = vcombine.low %v2682_v23, %v2690_v24  ;;  %v2723_v28 = vcombine.low %v2698_v25, %v2706_v26  ;;  %v2708_v34 = vcombine.high %v2682_v23, %v2690_v24  ;;  %v2724_v35 = vcombine.high %v2698_v25, %v2706_v26 }
 0xa10   : > { %v2715_v30 = vrot.slane %v2707_v27, %v5260_v14  ;;  %v2731_v49 = vrot.slane %v2723_v28, %v5260_v14  ;;  %v2722_v47 = vrot.slane %v2708_v34, %v5260_v14  ;;  %v2738_v40 = vrot.slane %v2724_v35, %v5260_v14 }
 0xa12   : > { %v2739_v52 = vcombine.low %v2715_v30, %v2731_v49  ;;  %v2740_v37 = vcombine.high %v2715_v30, %v2731_v49  ;;  %v2741_v42 = vcombine.low %v2722_v47, %v2738_v40  ;;  %v2742_v53 = vcombine.high %v2722_v47, %v2738_v40 }
 0xa14   : > { %v2743_v32 = vpack.c.bf16 %v2739_v52, %v2739_v52  ;;  %v2744_v29 = vpack.c.bf16 %v2740_v37, %v2740_v37  ;;  %v2745_v44 = vpack.c.bf16 %v2741_v42, %v2741_v42  ;;  %v2746_v36 = vpack.c.bf16 %v2742_v53, %v2742_v53 }
 0xa16   : > { %4581 = vmatmul.mubr.msk.bf16.vlgmr.msra.gmra.mrb[32].mxu1 %vm1609_vm3, %v2743_v32 }
 0xa17   : > { %4585 = vmatpush3.bf16.xpose.msra.mxu1 %v3097_v33  ;;  %4586 = vmatprep.mubr.msk.bf16.mxu1 %vm4929_vm0, %v4927_v8 }
 0xa18   : > { %4590 = vmatprep.subr.bf16.mxu1 %v4927_v8 }
 0xa1e   : > { %4587 = vmatmul.mubr.msk.bf16.vlgmr.msra.gmra.mrb[36].mxu1 %vm1609_vm3, %v2744_v29 }
 0xa1f   : > { %4591 = vmatpush3.bf16.xpose.msra.mxu1 %v3143_v41  ;;  %4592 = vmatprep.mubr.msk.bf16.mxu1 %vm4929_vm0, %v4927_v8 }
 0xa20   : > { %4596 = vmatprep.subr.bf16.mxu1 %v4927_v8 }
 0xa26   : > { %4593 = vmatmul.mubr.msk.bf16.vlgmr.msra.gmra.mrb[40].mxu1 %vm1609_vm3, %v2745_v44 }
 0xa27   : > { %4597 = vmatpush3.bf16.xpose.msra.mxu1 %v3189_v51  ;;  %4598 = vmatprep.mubr.msk.bf16.mxu1 %vm4929_vm0, %v4927_v8 }
 0xa28   : > { %4608 = vmatprep.subr.bf16.mxu1 %v4927_v8 }
 0xa2e   : > { %4599 = vmatmul.mubr.msk.bf16.vlgmr.msra.gmra.mrb[44].mxu1 %vm1609_vm3, %v2746_v36 }
 0xa2f   : > { %4610 = vmatprep.mubr.msk.bf16.mxu1 %vm4929_vm0, %v4927_v8 }
 0xae9   : > { %v3087_v38 = vpop.f32.mrb[32].mxu1 }
 0xaea   : > { %v3231_v56 = vmul.f32 0.17677669, %v3087_v38  ;;  %v4582_v57 = vpop.f32.mrb[33].mxu1 }
 0xaeb   : > { %v3090_v58 = vpop.f32.mrb[34].mxu1 }
 0xaec   : > { %v4583_v59 = vpop.f32.mrb[35].mxu1  ;;  %v3235_v60 = vadd.f32 %v3231_v56, %v847_v54 }
 0xaee   : > { %v3239_v61 = vsel %vm1802_vm5, %v3235_v60, -inf }
 0xaef   : > { %3240 = vmax.xlane.f32.xlu1 %v3239_v61 }
 0xaf1   : > { %v3133_v62 = vpop.f32.mrb[36].mxu1 }
 0xaf2   : > { %v3232_v63 = vmul.f32 0.17677669, %v3133_v62  ;;  %v4588_v0 = vpop.f32.mrb[37].mxu1 }
 0xaf3   : > { %v3136_v1 = vpop.f32.mrb[38].mxu1 }
 0xaf4   : > { %v4589_v2 = vpop.f32.mrb[39].mxu1  ;;  %v3236_v3 = vadd.f32 %v3232_v63, %v847_v54 }
 0xaf6   : > { %v3242_v5 = vsel %vm1802_vm5, %v3236_v3, -inf }
 0xaf7   : > { %3243 = vmax.xlane.f32.xlu0 %v3242_v5 }
 0xaf9   : > { %v3179_v6 = vpop.f32.mrb[40].mxu1 }
 0xafa   : > { %v3233_v9 = vmul.f32 0.17677669, %v3179_v6  ;;  %v4594_v46 = vpop.f32.mrb[41].mxu1 }
 0xafb   : > { %v3182_v10 = vpop.f32.mrb[42].mxu1 }
 0xafc   : > { %v4595_v11 = vpop.f32.mrb[43].mxu1  ;;  %v3237_v12 = vadd.f32 %v3233_v9, %v847_v54 }
 0xafe   : > { %v3245_v13 = vsel %vm1802_vm5, %v3237_v12, -inf }
 0xaff   : > { %3246 = vmax.xlane.f32.xlu0 %v3245_v13 }
 0xb01   : > { %v3225_v15 = vpop.f32.mrb[44].mxu1 }
 0xb02   : > { %v3234_v16 = vmul.f32 0.17677669, %v3225_v15  ;;  %v4600_v17 = vpop.f32.mrb[45].mxu1 }
 0xb03   : > { %v3228_v18 = vpop.f32.mrb[46].mxu1 }
 0xb04   : > { %v4601_v19 = vpop.f32.mrb[47].mxu1  ;;  %v3238_v20 = vadd.f32 %v3234_v16, %v847_v54 }
 0xb06   : > { %v3248_v21 = vsel %vm1802_vm5, %v3238_v20, -inf }
 0xb07   : > { %3249 = vmax.xlane.f32.xlu1 %v3248_v21 }
 0xb18   : > { %2901 = vrot.lane.b32.xlu1 %v5539_v45, %s5998_s0 }
 0xb7c   : > { %v3241_v23 = vpop.xlane.xlu1 %3240 }
 0xb7d   : > { %v3251_v24 = vsub.f32 %v3235_v60, %v3241_v23 }
 0xb7f   : > { %v3255_v25 = vmul.f32 1.442695, %v3251_v24 }
 0xb81   : > { %4838 = vpow2.f32 %v3255_v25 }
 0xb84   : > { %v3244_v26 = vpop.xlane.xlu0 %3243 }
 0xb85   : > { %v3252_v27 = vsub.f32 %v3236_v3, %v3244_v26 }
 0xb87   : > { %v3257_v28 = vmul.f32 1.442695, %v3252_v27 }
 0xb89   : > { %4840 = vpow2.f32 %v3257_v28 }
 0xb8b   : > { %v5629_v30 = vpop.eup %4838 }
 0xb8c   : > { %v3263_v49 = vsel %vm1802_vm5, %v5629_v30, 0.0  ;;  %v3247_v32 = vpop.xlane.xlu0 %3246 }
 0xb8d   : > { %3264 = vadd.xlane.f32.xlu0 %v3263_v49  ;;  %v3253_v33 = vsub.f32 %v3237_v12, %v3247_v32 }
 0xb8f   : > { %v3259_v34 = vmul.f32 1.442695, %v3253_v33 }
 0xb91   : > { %4842 = vpow2.f32 %v3259_v34 }
 0xb93   : > { %v5633_v52 = vpop.eup %4840 }
 0xb94   : > { %v3266_v31 = vsel %vm1802_vm5, %v5633_v52, 0.0  ;;  %v3250_v35 = vpop.xlane.xlu1 %3249 }
 0xb95   : > { %3267 = vadd.xlane.f32.xlu1 %v3266_v31  ;;  %v3254_v37 = vsub.f32 %v3238_v20, %v3250_v35 }
 0xb97   : > { %v3261_v39 = vmul.f32 1.442695, %v3254_v37 }
 0xb98   : > { %v2902_v42 = vpop.permute.xlu1 %2901 }
 0xb99   : > { %4844 = vpow2.f32 %v3261_v39  ;;  %v2907_v51 = vcombine.low %v5539_v45, %v2902_v42  ;;  %v2908_v53 = vcombine.high %v5539_v45, %v2902_v42 }
 0xb9b   : > { %v5641_v29 = vpop.eup %4842  ;;  %v2915_v56 = vrot.slane %v2907_v51, %v5257_v7  ;;  %v2922_v57 = vrot.slane %v2908_v53, %v5257_v7 }
 0xb9c   : > { %v3269_v47 = vsel %vm1802_vm5, %v5641_v29, 0.0 }
 0xba3   : > { %2898 = vrot.lane.b32.xlu0 %v5539_v45, %s5995_s4  ;;  %v5645_v40 = vpop.eup %4844 }
 0xba4   : > { %v3272_v41 = vsel %vm1802_vm5, %v5645_v40, 0.0 }
 0xba6   : > { %2904 = vrot.lane.b32.xlu1 %v5539_v45, %s5994_s28 }
 0xbc2   : > { %3270 = vadd.xlane.f32.xlu0 %v3269_v47 }
 0xbca   : > { %3273 = vadd.xlane.f32.xlu1 %v3272_v41 }
 0xc1a   : > { %v3265_v43 = vpop.xlane.xlu0 %3264 }
 0xc1b   : > { %4846 = vrcp.f32 %v3265_v43 }
 0xc1e   : > { %v2899_v36 = vpop.permute.xlu0 %2898 }
 0xc22   : > { %v3268_v44 = vpop.xlane.xlu1 %3267 }
 0xc23   : > { %4848 = vrcp.f32 %v3268_v44 }
 0xc25   : > { %v4847_v18 = vpop.eup %4846 }
 0xc26   : > { %v2905_v50 = vpop.permute.xlu1 %2904  ;;  %v3279_v49 = vmul.f32 %v4847_v18, %v5629_v30 }
 0xc27   : > { %v2923_v38 = vcombine.low %v2899_v36, %v2905_v50  ;;  %v2924_v54 = vcombine.high %v2899_v36, %v2905_v50 }
 0xc28   : > { %v3283_v47 = vpack.c.bf16 %v3279_v49, %v3279_v49 }
 0xc29   : > { %v2931_v58 = vrot.slane %v2923_v38, %v5257_v7  ;;  %v2938_v59 = vrot.slane %v2924_v54, %v5257_v7  ;;  %v4766_v54 = vld [vmem:[%s5935_s16] sm:$0xff]  }
 0xc2b   : > { %v2939_v60 = vcombine.low %v2915_v56, %v2931_v58  ;;  %v2940_v61 = vcombine.high %v2915_v56, %v2931_v58  ;;  %v2955_v62 = vcombine.low %v2922_v57, %v2938_v59  ;;  %v2956_v63 = vcombine.high %v2922_v57, %v2938_v59  ;;  %v4770_v56 = vld [vmem:[%s5935_s16 + $0x20] sm:$0xff]   ;;  %v4771_v57 = vld [vmem:[%s5935_s16 + $0x28] sm:$0xff]  }
 0xc2d   : > { %v2947_v45 = vrot.slane %v2939_v60, %v5260_v14  ;;  %v2954_v0 = vrot.slane %v2940_v61, %v5260_v14  ;;  %v2963_v1 = vrot.slane %v2955_v62, %v5260_v14  ;;  %v2970_v2 = vrot.slane %v2956_v63, %v5260_v14  ;;  %v4849_v24 = vpop.eup %4848 }
 0xc2e   : > { %v3280_v31 = vmul.f32 %v4849_v24, %v5633_v52 }
 0xc2f   : > { %v2975_v3 = vcombine.low %v2947_v45, %v2954_v0  ;;  %v4318_v5 = vcombine.high %v2947_v45, %v2954_v0  ;;  %v2991_v6 = vcombine.low %v2963_v1, %v2970_v2  ;;  %v4319_v9 = vcombine.high %v2963_v1, %v2970_v2 }
 0xc30   : > { %v3284_v41 = vpack.c.bf16 %v3280_v31, %v3280_v31 }
 0xc31   : > { %v2982_v46 = vrot.slane %v2975_v3, %v5257_v7  ;;  %v2990_v10 = vrot.slane %v4318_v5, %v5257_v7  ;;  %v2998_v11 = vrot.slane %v2991_v6, %v5257_v7  ;;  %v3006_v12 = vrot.slane %v4319_v9, %v5257_v7 }
 0xc33   : > { %v3007_v13 = vcombine.low %v2982_v46, %v2990_v10  ;;  %v3023_v15 = vcombine.low %v2998_v11, %v3006_v12  ;;  %v3008_v16 = vcombine.high %v2982_v46, %v2990_v10  ;;  %v3024_v17 = vcombine.high %v2998_v11, %v3006_v12 }
 0xc35   : > { %v3015_v19 = vrot.slane %v3007_v13, %v5260_v14  ;;  %v3031_v20 = vrot.slane %v3023_v15, %v5260_v14  ;;  %v3022_v21 = vrot.slane %v3008_v16, %v5260_v14  ;;  %v3038_v23 = vrot.slane %v3024_v17, %v5260_v14 }
 0xc37   : > { %v3039_v25 = vcombine.low %v3015_v19, %v3031_v20  ;;  %v3040_v26 = vcombine.high %v3015_v19, %v3031_v20  ;;  %v3041_v27 = vcombine.low %v3022_v21, %v3038_v23  ;;  %v3042_v28 = vcombine.high %v3022_v21, %v3038_v23 }
 0xc39   : > { %v3043_v32 = vpack.c.bf16 %v3039_v25, %v3039_v25  ;;  %v3044_v33 = vpack.c.bf16 %v3040_v26, %v3040_v26  ;;  %v3045_v37 = vpack.c.bf16 %v3041_v27, %v3041_v27  ;;  %v3046_v39 = vpack.c.bf16 %v3042_v28, %v3042_v28  ;;  %v4772_v25 = vld [vmem:[%s5935_s16 + $0x30] sm:$0xff]  }
 0xc3b   : > { %v3291_v34 = vsel %vm1854_vm6, %v3043_v32, 0  ;;  %v3337_v35 = vsel %vm1854_vm6, %v3044_v33, 0  ;;  %v3383_v30 = vsel %vm1854_vm6, %v3045_v37, 0  ;;  %v3429_v52 = vsel %vm1854_vm6, %v3046_v39, 0 }
 0xc3c   : > { %4603 = vmatpush3.bf16.msra.mxu0 %v3291_v34  ;;  %4609 = vmatpush3.bf16.msra.mxu1 %v3337_v35  ;;  %v4773_v35 = vld [vmem:[%s5935_s16 + $0x38] sm:$0xff]  }
 0xc3d   : > { %4614 = vmatprep.subr.bf16.mxu0 %v4927_v8  ;;  %4620 = vmatprep.subr.bf16.mxu1 %v4927_v8 }
 0xc3f   : > { %4605 = vmatmul.mubr.msk.bf16.vlgmr.msra.gmra.mrb[20].mxu0 %vm1802_vm5, %v3283_v47  ;;  %4611 = vmatmul.mubr.msk.bf16.vlgmr.msra.gmra.mrb[48].mxu1 %vm1802_vm5, %v3284_v41 }
 0xc40   : > { %4615 = vmatpush3.bf16.msra.mxu0 %v3383_v30  ;;  %4621 = vmatpush3.bf16.msra.mxu1 %v3429_v52 }
 0xc41   : > { %4616 = vmatprep.mubr.msk.bf16.mxu0 %vm4929_vm0, %v4927_v8  ;;  %4622 = vmatprep.mubr.msk.bf16.mxu1 %vm4929_vm0, %v4927_v8 }
 0xc42   : > { %4626 = vmatprep.subr.bf16.mxu0 %v4927_v8 }
 0xc4f   : > { %v3271_v42 = vpop.xlane.xlu0 %3270 }
 0xc50   : > { %4850 = vrcp.f32 %v3271_v42 }
 0xc57   : > { %v3274_v43 = vpop.xlane.xlu1 %3273 }
 0xc58   : > { %4852 = vrcp.f32 %v3274_v43 }
 0xc5a   : > { %v4851_v44 = vpop.eup %4850 }
 0xc5b   : > { %v3281_v51 = vmul.f32 %v4851_v44, %v5641_v29  ;;  %v4767_v29 = vld [vmem:[%s5935_s16 + $0x8] sm:$0xff]  }
 0xc5d   : > { %v3285_v53 = vpack.c.bf16 %v3281_v51, %v3281_v51 }
 0xc5f   : > { %4617 = vmatmul.mubr.msk.bf16.vlgmr.msra.gmra.mrb[24].mxu0 %vm1802_vm5, %v3285_v53 }
 0xc60   : > { %4642 = vmatprep.mubr.msk.bf16.mxu0 %vm4929_vm0, %v4927_v8  ;;  %4627 = vmatpush3.bf16.msra.mxu0 %v4766_v54 }
 0xc61   : > { %4628 = vmatprep.subr.bf16.mxu0 %v4927_v8 }
 0xc62   : > { %v4853_v36 = vpop.eup %4852 }
 0xc63   : > { %v3282_v50 = vmul.f32 %v4853_v36, %v5645_v40  ;;  %v4768_v40 = vld [vmem:[%s5935_s16 + $0x10] sm:$0xff]  }
 0xc64   : > { %4629 = vmatpush3.bf16.msra.mxu0 %v4767_v29 }
 0xc65   : > { %v3286_v38 = vpack.c.bf16 %v3282_v50, %v3282_v50  ;;  %4630 = vmatprep.subr.bf16.mxu0 %v4927_v8 }
 0xc67   : > { %4623 = vmatmul.mubr.msk.bf16.vlgmr.msra.gmra.mrb[52].mxu1 %vm1802_vm5, %v3286_v38 }
 0xc68   : > { %3893 = vmatprep.mubr.bf16.mxu1 %v4928_v22  ;;  %4631 = vmatpush3.bf16.msra.mxu0 %v4768_v40  ;;  %v4769_v22 = vld [vmem:[%s5935_s16 + $0x18] sm:$0xff]  }
 0xc69   : > { %4632 = vmatprep.subr.bf16.mxu0 %v4927_v8 }
 0xc6c   : > { %4633 = vmatpush3.bf16.msra.mxu0 %v4769_v22 }
 0xc6d   : > { %4634 = vmatprep.subr.bf16.mxu0 %v4927_v8 }
 0xc70   : > { %4635 = vmatpush3.bf16.msra.mxu0 %v4770_v56 }
 0xc71   : > { %4636 = vmatprep.subr.bf16.mxu0 %v4927_v8 }
 0xc74   : > { %4637 = vmatpush3.bf16.msra.mxu0 %v4771_v57 }
 0xc75   : > { %4638 = vmatprep.subr.bf16.mxu0 %v4927_v8 }
 0xc78   : > { %4639 = vmatpush3.bf16.msra.mxu0 %v4772_v25  ;;  %v4800_v25 = vld [vmem:[%s5941_s22 + $0x48] sm:$0xff]  }
 0xc79   : > { %4640 = vmatprep.subr.bf16.mxu0 %v4927_v8 }
 0xc7c   : > { %4641 = vmatpush3.bf16.msra.mxu0 %v4773_v35  ;;  %v4809_v35 = vld [vmem:[%s5941_s22 + $0x28] sm:$0xff]  }
 0xd12   : > { %v3327_v58 = vpop.f32.mrb[20].mxu0  ;;  %v3373_v59 = vpop.f32.mrb[48].mxu1 }
 0xd13   : > { %v4606_v60 = vpop.f32.mrb[21].mxu0  ;;  %v4612_v61 = vpop.f32.mrb[49].mxu1 }
 0xd14   : > { %v3330_v62 = vpop.f32.mrb[22].mxu0  ;;  %v3376_v63 = vpop.f32.mrb[50].mxu1 }
 0xd15   : > { %v4607_v45 = vpop.f32.mrb[23].mxu0  ;;  %v4613_v0 = vpop.f32.mrb[51].mxu1 }
 0xd32   : > { %v3419_v1 = vpop.f32.mrb[24].mxu0 }
 0xd33   : > { %v3471_v2 = vcombine.low %v3327_v58, %v3419_v1  ;;  %v3472_v3 = vcombine.high %v3327_v58, %v3419_v1  ;;  %v4618_v5 = vpop.f32.mrb[25].mxu0  ;;  %v4330_v58 = vld [vmem:[%s5936_s17] ss:$0 sm:$0xff] }
 0xd34   : > { %v3422_v6 = vpop.f32.mrb[26].mxu0  ;;  %v4776_v5 = vld [vmem:[%s5939_s20 + $0x4] ss:$8 sps:$4 sm:$0xff]  }
 0xd35   : > { %v4619_v9 = vpop.f32.mrb[27].mxu0  ;;  %v3479_v15 = vrot.slane %v3471_v2, %v5257_v7  ;;  %v3486_v16 = vrot.slane %v3472_v3, %v5257_v7  ;;  %3861 = vmatprep.subr.bf16.mxu1 %v4776_v5  ;;  %v4779_v6 = vld [vmem:[%s5939_s20 + $0x14] ss:$8 sps:$4 sm:$0xff]  }
 0xd36   : > { %v4777_v9 = vld [vmem:[%s5939_s20 + $0x10] ss:$8 sps:$4 sm:$0xff]  }
 0xd3a   : > { %v3465_v46 = vpop.f32.mrb[52].mxu1 }
 0xd3b   : > { %v3487_v10 = vcombine.low %v3373_v59, %v3465_v46  ;;  %v3488_v11 = vcombine.high %v3373_v59, %v3465_v46  ;;  %v4624_v12 = vpop.f32.mrb[53].mxu1  ;;  %v4782_v46 = vld [vmem:[%s5939_s20 + $0x24] ss:$8 sps:$4 sm:$0xff]  }
 0xd3c   : > { %v3468_v13 = vpop.f32.mrb[54].mxu1  ;;  %v4783_v12 = vld [vmem:[%s5939_s20 + $0x30] ss:$8 sps:$4 sm:$0xff]  }
 0xd3d   : > { %v3495_v17 = vrot.slane %v3487_v10, %v5257_v7  ;;  %v3502_v18 = vrot.slane %v3488_v11, %v5257_v7  ;;  %v4625_v19 = vpop.f32.mrb[55].mxu1  ;;  %v4780_v10 = vld [vmem:[%s5939_s20 + $0x20] ss:$8 sps:$4 sm:$0xff]   ;;  %v4785_v11 = vld [vmem:[%s5939_s20 + $0x34] ss:$8 sps:$4 sm:$0xff]  }
 0xd3e   : > { %v4788_v13 = vld [vmem:[%s5939_s20 + $0x44] ss:$8 sps:$4 sm:$0xff]   ;;  %v4792_v19 = vld [vmem:[%s5939_s20 + $0x60] ss:$8 sps:$4 sm:$0xff]  }
 0xd3f   : > { %v3503_v20 = vcombine.low %v3479_v15, %v3495_v17  ;;  %v3504_v21 = vcombine.high %v3479_v15, %v3495_v17  ;;  %v3519_v23 = vcombine.low %v3486_v16, %v3502_v18  ;;  %v3520_v24 = vcombine.high %v3486_v16, %v3502_v18  ;;  %v4786_v15 = vld [vmem:[%s5939_s20 + $0x40] ss:$8 sps:$4 sm:$0xff]   ;;  %v4791_v16 = vld [vmem:[%s5939_s20 + $0x54] ss:$8 sps:$4 sm:$0xff]   ;;  %v4789_v17 = vld [vmem:[%s5939_s20 + $0x50] ss:$8 sps:$4 sm:$0xff]  }
 0xd40   : > { %v4794_v18 = vld [vmem:[%s5939_s20 + $0x64] ss:$8 sps:$4 sm:$0xff]  }
 0xd41   : > { %v3511_v26 = vrot.slane %v3503_v20, %v5260_v14  ;;  %v3518_v27 = vrot.slane %v3504_v21, %v5260_v14  ;;  %v3527_v28 = vrot.slane %v3519_v23, %v5260_v14  ;;  %v3534_v49 = vrot.slane %v3520_v24, %v5260_v14  ;;  %v4797_v20 = vld [vmem:[%s5939_s20 + $0x74] ss:$8 sps:$4 sm:$0xff]   ;;  %v4795_v21 = vld [vmem:[%s5939_s20 + $0x70] ss:$8 sps:$4 sm:$0xff]   ;;  %v4798_v23 = vld [vmem:[%s5941_s22 + $0x40] sm:$0xff]  }
 0xd42   : > { %v4799_v24 = vld [vmem:[%s5941_s22] sm:$0xff]   ;;  %4448 = vmatprep.subr.bf16.mxu0 %v4798_v23 }
 0xd43   : > { %v3539_v31 = vcombine.low %v3511_v26, %v3518_v27  ;;  %v4328_v32 = vcombine.high %v3511_v26, %v3518_v27  ;;  %v3555_v33 = vcombine.low %v3527_v28, %v3534_v49  ;;  %v4329_v34 = vcombine.high %v3527_v28, %v3534_v49  ;;  %v4801_v26 = vld [vmem:[%s5941_s22 + $0x8] sm:$0xff]   ;;  %v4802_v27 = vld [vmem:[%s5941_s22 + $0x50] sm:$0xff]   ;;  %v4804_v49 = vld [vmem:[%s5941_s22 + $0x58] sm:$0xff]  }
 0xd44   : > { %v4803_v28 = vld [vmem:[%s5941_s22 + $0x10] sm:$0xff]  }
 0xd45   : > { %v3546_v37 = vrot.slane %v3539_v31, %v5257_v7  ;;  %v3554_v39 = vrot.slane %v4328_v32, %v5257_v7  ;;  %v3562_v47 = vrot.slane %v3555_v33, %v5257_v7  ;;  %v3570_v41 = vrot.slane %v4329_v34, %v5257_v7  ;;  %v4805_v31 = vld [vmem:[%s5941_s22 + $0x18] sm:$0xff]   ;;  %v4806_v32 = vld [vmem:[%s5941_s22 + $0x60] sm:$0xff]   ;;  %v4808_v34 = vld [vmem:[%s5941_s22 + $0x68] sm:$0xff]  }
 0xd46   : > { %v4807_v33 = vld [vmem:[%s5941_s22 + $0x20] sm:$0xff]  }
 0xd47   : > { %v3572_v30 = vcombine.high %v3546_v37, %v3554_v39  ;;  %v3588_v52 = vcombine.high %v3562_v47, %v3570_v41  ;;  %v3571_v8 = vcombine.low %v3546_v37, %v3554_v39  ;;  %v3587_v42 = vcombine.low %v3562_v47, %v3570_v41 }
 0xd49   : > { %v3586_v43 = vrot.slane %v3572_v30, %v5260_v14  ;;  %v3602_v44 = vrot.slane %v3588_v52, %v5260_v14  ;;  %v3579_v51 = vrot.slane %v3571_v8, %v5260_v14  ;;  %v3595_v53 = vrot.slane %v3587_v42, %v5260_v14 }
 0xd4b   : > { %v3605_v36 = vcombine.low %v3586_v43, %v3602_v44  ;;  %v3604_v50 = vcombine.high %v3579_v51, %v3595_v53  ;;  %v3606_v38 = vcombine.high %v3586_v43, %v3602_v44  ;;  %v3603_v54 = vcombine.low %v3579_v51, %v3595_v53  ;;  %v4339_v44 = vld [vmem:[%s5937_s18] ss:$0 sm:$0xff] }
 0xd4c   : > { %v4340_v53 = vld [vmem:[%s5938_s19] ss:$0 sm:$0xff] }
 0xd4d   : > { %3612 = vrot.lane.b32.xlu1 %v3605_v36, %s5998_s0  ;;  %3608 = vrot.lane.b32.xlu0 %v3604_v50, %s5994_s28  ;;  %s4863_s28 = scalar_lea.vmem %s5879_s9, 128 }
 0xd4e   : > { %p4864_p11 = scmp.ne.s32.totalorder %s5879_s9, %s4863_s28 }
 0xd50   : > { %p4865_p12 = pnand %p4864_p11, %p5110_p5 }
 0xd51   : > { %3616 = vrot.lane.b32.xlu0 %v3606_v38, %s5995_s4  ;;  %s6002_s4 = sld [smem:[#allocation23_spill]] }
 0xd52   : > { %p4866_p13 = pneg %p4865_p12 }
 0xdbf   : > { %v3609_v7 = vpop.permute.xlu0 %3608  ;;  %v3613_v29 = vpop.permute.xlu1 %3612 }
 0xdc0   : > { %v3619_v40 = vsel %vm1609_vm3, %v3603_v54, %v3609_v7  ;;  %v4810_v54 = vld [vmem:[%s5941_s22 + $0x70] sm:$0xff]  }
 0xdc1   : > { %v3620_v56 = vsel %vm2185_vm7, %v3619_v40, %v3613_v29  ;;  %v4811_v7 = vld [vmem:[%s5941_s22 + $0x30] sm:$0xff]   ;;  %v4812_v29 = vld [vmem:[%s5941_s22 + $0x78] sm:$0xff]  }
 0xdc2   : > { %v4813_v40 = vld [vmem:[%s5941_s22 + $0x38] sm:$0xff]  }
 0xdc3   : > { %v3617_v22 = vpop.permute.xlu0 %3616 }
 0xdc4   : > { %v3621_v57 = vsel %vm2187_vm8, %v3620_v56, %v3617_v22  ;;  %v3769_v22 = vld [vmem:[%s5940_s21] sm:$0x3] }
 0xdc5   : > { %v3622_v14 = vpack.c.bf16 %v3621_v57, %v3621_v57  ;;  %v3774_v56 = vrot.slane %v3769_v22, %v5246_v55  ;;  %v3778_v57 = vrot.slane %v3769_v22, %v5234_v48  ;;  %v4373_v48 = vld [vmem:[%s5942_s23] ss:$0 sm:$0xff] }
 0xdc7   : > { %4643 = vmatmul.mubr.bf16.vlgmr.msra.gmra.mrb[28].mxu0 %v3622_v14 }
 0xdc8   : > { %4449 = vmatpush3.bf16.msra.mxu0 %v4799_v24  ;;  %v4374_v24 = vld [vmem:[%s6002_s4] ss:$0 sm:$0xff]  ;;  %s4869_s4 = scalar_lea.vmem %s4868_s27, 256 }
 0xdc9   : > { %4450 = vmatprep.subr.bf16.mxu0 %v4800_v25  ;;  %p4871_p1 = scmp.lt.s32.totalorder %s4869_s4, %s4863_s28 }
 0xdcb   : > { %p4872_p2 = por %p4871_p1, %p4870_p0 }
 0xdcc   : > { %4451 = vmatpush3.bf16.msra.mxu0 %v4801_v26  ;;  %v4375_v26 = vld [vmem:[%s6003_s26] ss:$0 sm:$0xff] }
 0xdcd   : > { %4452 = vmatprep.subr.bf16.mxu0 %v4802_v27  ;;  %p4873_p3 = pnand %p4872_p2, %p4866_p13 }
 0xdd0   : > { %4453 = vmatpush3.bf16.msra.mxu0 %v4803_v28 }
 0xdd1   : > { %4454 = vmatprep.subr.bf16.mxu0 %v4804_v49 }
 0xdd4   : > { %4455 = vmatpush3.bf16.msra.mxu0 %v4805_v31 }
 0xdd5   : > { %4456 = vmatprep.subr.bf16.mxu0 %v4806_v32 }
 0xdd8   : > { %4457 = vmatpush3.bf16.msra.mxu0 %v4807_v33 }
 0xdd9   : > { %4458 = vmatprep.subr.bf16.mxu0 %v4808_v34 }
 0xddc   : > { %4459 = vmatpush3.bf16.msra.mxu0 %v4809_v35 }
 0xddd   : > { %4460 = vmatprep.subr.bf16.mxu0 %v4810_v54 }
 0xde0   : > { %4461 = vmatpush3.bf16.msra.mxu0 %v4811_v7 }
 0xde1   : > { %4462 = vmatprep.subr.bf16.mxu0 %v4812_v29 }
 0xde4   : > { %4463 = vmatpush3.bf16.msra.mxu0 %v4813_v40 }
 0xe9a   : > { %v3711_v59 = vpop.f32.mrb[28].mxu0 }
 0xe9b   : > { %v3712_v60 = vadd.f32 %v4330_v58, %v3711_v59  ;;  %v4644_v61 = vpop.f32.mrb[29].mxu0 }
 0xe9c   : > { %v3714_v62 = vpop.f32.mrb[30].mxu0 }
 0xe9d   : > { %v5746_v63 = vadd.f32 %v3712_v60, %v5443_v4  ;;  %v4645_v45 = vpop.f32.mrb[31].mxu0  ;;  %v4774_v4 = vld [vmem:[%s5939_s20] ss:$8 sps:$4 sm:$0xff]  }
 0xe9e   : > { %3862 = vmatpush1.bf16.msra.mxu1 %v4774_v4 }
 0xe9f   : > { %3720 = vadd.xlane.f32.xlu1 %v5746_v63  ;;  %3863 = vmatprep.subr.bf16.mxu1 %v4779_v6 }
 0xea2   : > { %3864 = vmatpush1.bf16.msra.mxu1 %v4777_v9 }
 0xea3   : > { %3865 = vmatprep.subr.bf16.mxu1 %v4782_v46 }
 0xea6   : > { %3866 = vmatpush1.bf16.msra.mxu1 %v4780_v10 }
 0xea7   : > { %3867 = vmatprep.subr.bf16.mxu1 %v4785_v11 }
 0xeaa   : > { %3868 = vmatpush1.bf16.msra.mxu1 %v4783_v12 }
 0xeab   : > { %3869 = vmatprep.subr.bf16.mxu1 %v4788_v13 }
 0xeae   : > { %3870 = vmatpush1.bf16.msra.mxu1 %v4786_v15 }
 0xeaf   : > { %3871 = vmatprep.subr.bf16.mxu1 %v4791_v16 }
 0xeb2   : > { %3872 = vmatpush1.bf16.msra.mxu1 %v4789_v17 }
 0xeb3   : > { %3873 = vmatprep.subr.bf16.mxu1 %v4794_v18 }
 0xeb6   : > { %3874 = vmatpush1.bf16.msra.mxu1 %v4792_v19 }
 0xeb7   : > { %3875 = vmatprep.subr.bf16.mxu1 %v4797_v20 }
 0xeba   : > { %3876 = vmatpush1.bf16.msra.mxu1 %v4795_v21 }
 0xf2c   : > { %v3721_v0 = vpop.xlane.xlu1 %3720 }
 0xf2d   : > { %v3722_v1 = vmul.f32 0.0078125, %v3721_v0 }
 0xf2f   : > { %v5750_v2 = vsub.f32 %v5746_v63, %v3722_v1 }
 0xf31   : > { %v3724_v3 = vmul.f32 %v5750_v2, %v5750_v2 }
 0xf33   : > { %3725 = vadd.xlane.f32.xlu0 %v3724_v3 }
 0xfc0   : > { %v3726_v37 = vpop.xlane.xlu0 %3725 }
 0xfc1   : > { %v3727_v39 = vmul.f32 0.007874016, %v3726_v37 }
 0xfc3   : > { %4854 = vrsqrt.f32 %v3727_v39  ;;  %vm3730_vm12 = vcmp.eq.f32.partialorder %v3727_v39, inf  ;;  %v3733_v30 = vand.u32 2147483648, %v3727_v39  ;;  %vm3732_vm13 = vcmp.eq.f32.partialorder %v3727_v39, 0.0 }
 0xfcd   : > { %v4855_v47 = vpop.eup %4854 }
 0xfce   : > { %v3729_v41 = vmul.f32 %v4855_v47, %v3727_v39 }
 0xfd0   : > { %v3731_v52 = vsel %vm3730_vm12, %v3727_v39, %v3729_v41 }
 0xfd1   : > { %v3734_v8 = vsel %vm3732_vm13, %v3733_v30, %v3731_v52 }
 0xfd2   : > { %v3735_v42 = vadd.f32 1e-06, %v3734_v8 }
 0xfd4   : > { %4856 = vrcp.f32 %v3735_v42 }
 0xfde   : > { %v4857_v43 = vpop.eup %4856 }
 0xfdf   : > { %v3737_v51 = vmul.f32 %v4857_v43, %v5750_v2 }
 0xfe1   : > { %v3744_v36 = vmul.f32 %v4339_v44, %v3737_v51 }
 0xfe3   : > { %v3751_v50 = vadd.f32 %v4340_v53, %v3744_v36 }
 0xfe5   : > { %v3752_v38 = vpack.c.bf16 %v3751_v50, %v3751_v50 }
 0xfe7   : > { %3894 = vmatmul.mubr.bf16.vlgmr.msra.gmra.mrb[56].mxu1 %v3752_v38 }
0x10ba   : > { %v3895_v14 = vpop.f32.mrb[56].mxu1 }
0x10bb   : > { %v3896_v58 = vadd.f32 %v3895_v14, %v3774_v56  ;;  %v3897_v59 = vpop.f32.mrb[57].mxu1 }
0x10bc   : > { %v3898_v60 = vadd.f32 %v3897_v59, %v3778_v57  ;;  %v3899_v61 = vpop.f32.mrb[58].mxu1 }
0x10bd   : > { %v3902_v62 = vmax.f32 %v3896_v58, 0.0  ;;  %v3900_v45 = vpop.f32.mrb[59].mxu1 }
0x10be   : > { %v3903_v0 = vmax.f32 %v3898_v60, 0.0 }
0x10bf   : > { %v3904_v2 = vpack.c.bf16 %v3902_v62, %v3902_v62 }
0x10c0   : > { %v3905_v1 = vpack.c.bf16 %v3903_v0, %v3903_v0 }
0x10c2   : > { %4066 = vmatprep.mubr.bf16.mxu0 %v3905_v1 }
0x10c3   : > { %4067 = vmatmul.mubr.bf16.vlgmr.msra.gmra.mrb[32].mxu0 %v3904_v2 }
0x1196   : > { %v4464_v3 = vpop.f32.mrb[32].mxu0 }
0x1197   : > { %v4465_v5 = vpop.f32.mrb[33].mxu0 }
0x1198   : > { %v4466_v4 = vadd.f32 %v4465_v5, %v4464_v3  ;;  %v4467_v6 = vpop.f32.mrb[34].mxu0 }
0x1199   : > { %v4468_v9 = vpop.f32.mrb[35].mxu0 }
0x119a   : > { %v4074_v55 = vadd.f32 %v4466_v4, %v5746_v63 }
0x119c   : > { %v4082_v46 = vadd.f32 %v4373_v48, %v4074_v55 }
0x119e   : > { %4085 = vadd.xlane.f32.xlu0 %v4082_v46 }
0x122b   : > { %v4086_v10 = vpop.xlane.xlu0 %4085 }
0x122c   : > { %v4087_v11 = vmul.f32 0.0078125, %v4086_v10 }
0x122e   : > { %v4088_v12 = vsub.f32 %v4082_v46, %v4087_v11 }
0x1230   : > { %v4089_v13 = vmul.f32 %v4088_v12, %v4088_v12 }
0x1232   : > { %4090 = vadd.xlane.f32.xlu1 %v4089_v13 }
0x12bf   : > { %v4091_v15 = vpop.xlane.xlu1 %4090 }
0x12c0   : > { %v4092_v16 = vmul.f32 0.007874016, %v4091_v15 }
0x12c2   : > { %4858 = vrsqrt.f32 %v4092_v16  ;;  %vm4095_vm14 = vcmp.eq.f32.partialorder %v4092_v16, inf  ;;  %v4098_v19 = vand.u32 2147483648, %v4092_v16  ;;  %vm4097_vm15 = vcmp.eq.f32.partialorder %v4092_v16, 0.0 }
0x12cc   : > { %v4859_v17 = vpop.eup %4858 }
0x12cd   : > { %v4094_v18 = vmul.f32 %v4859_v17, %v4092_v16 }
0x12cf   : > { %v4096_v20 = vsel %vm4095_vm14, %v4092_v16, %v4094_v18 }
0x12d0   : > { %v4099_v21 = vsel %vm4097_vm15, %v4098_v19, %v4096_v20 }
0x12d1   : > { %v4100_v63 = vadd.f32 1e-06, %v4099_v21 }
0x12d3   : > { %4860 = vrcp.f32 %v4100_v63 }
0x12dd   : > { %v4861_v23 = vpop.eup %4860 }
0x12de   : > { %v4102_v25 = vmul.f32 %v4861_v23, %v4088_v12 }
0x12e0   : > { %v4109_v27 = vmul.f32 %v4374_v24, %v4102_v25 }
0x12e2   : > { %v4116_v28 = vadd.f32 %v4375_v26, %v4109_v27 }
0x12e4   : > { %4117 = vst [vmem:[%s821_s5] sm:$0xff] %v4116_v28 }
0x12e5   : > { %4876 = shalt.err (!%p4873_p3)
}
0x12e6   : > { %s4877_s10 = scalar_lea.hbm %s5877_s11, 128  ;;  %s4881_s26 = scalar_lea.hbm %s6005_s30, 256 }
0x12e7   : > { %p4878_p4 = scmp.ne.s32.totalorder %s5877_s11, %s4877_s10  ;;  %p4882_p9 = scmp.lt.u32.totalorder %s5877_s11, %s6005_s30 }
0x12e8   : > { %p4883_p10 = scmp.lt.u32.totalorder %s4881_s26, %s4877_s10  ;;  %p4885_p12 = scmp.lt.u32.totalorder %s4877_s10, %s5877_s11 }
0x12e9   : > { %p4879_p7 = pnand %p4878_p4, %p5110_p5 }
0x12ea   : > { %p4884_p11 = por %p4883_p10, %p4882_p9 }
0x12eb   : > { %p4880_p8 = pneg %p4879_p7 }
0x12ec   : > { %p4886_p13 = por %p4885_p12, %p4884_p11 }
0x12ee   : > { %p4887_p0 = pnand %p4886_p13, %p4880_p8 }
0x12f0   : > { %4890 = shalt.err (!%p4887_p0)
}
0x12f1   : > { %4646 = dma.vmem_to_hbm [thread:$0]  (%p5110_p5), %s5879_s9, 128, %s5877_s11, %s4119_s1  }
0x12f2 PF: > { %s6006_s29 = sld [smem:[#allocation7_spill]]  ;;  %s6007_s6 = sld [smem:[#allocation5_spill]] }
0x12f8   : > { %p4652_p1 = scmp.ge.s32.totalorder %s6006_s29, 2  ;;  %s4144_s28 = sand.u32 1, %s6007_s6  }
0x12f9   : > { %s4145_s8 = scalar_lea.sflag [#allocation3], %s4144_s28 }
0x12fa   : > { %p4649_p2 = pnand %p4652_p1, %p5114_p6 }
0x12fc   : > { %4908 = dma.done.wait (!%p4649_p2), %s4145_s8, 128  }
0x12fd   : > { %4910 = vsyncadd (!%p4649_p2), %s4145_s8, 4294967168  ;;  %s6009_s28 = sld [smem:[#allocation8_spill]]  ;;  %s6010_s4 = sld [smem:[#allocation6_spill]] }
0x12fe   : > { %s6011_s7 = sld [smem:[#allocation9_spill]]  ;;  %s6012_s27 = smov %s4917_s3 }
0x1303   : > { %p36_p3 = scmp.ge.s32.totalorder %s6009_s28, 4   ;;  %s6013_s3 = smov %s6010_s4 }
0x1305   :  { %38 = sbr.rel (!%p36_p3) target bundleno = 19 (0x13), region = 168 }
0x130c   :  { %4150 = vsyncpa [#allocation3], 1 }
0x130d   :  { %4152 = vsyncpa [#allocation3 + $0x1], 1 }

</bundles_post_ra>
